<compile_context>
chip_gen: v6e
topology: v6e:2x2x1
jax: 0.10.0
libtpu: 0.0.40
codegen_flags: <defaults>
</compile_context>

<pallas_src>
import jax
import jax.numpy as jnp
import numpy as np
from jax import lax
from jax.experimental import pallas as pl
from jax.experimental.pallas import tpu as pltpu

EPS = 1e-5

# MXU operand dtype. bf16 on all generations; accumulation is f32 via
# preferred_element_type, and all BatchNorm / elementwise math stays f32.
MATMUL_DTYPE = jnp.bfloat16


# ----------------------------- layout helpers ------------------------------ #

def nchw_to_packed(x_nchw):
    """NCHW -> lane-dense packed (N, H, W*C). Do this only at network edges."""
    n, c, h, w = x_nchw.shape
    return jnp.transpose(x_nchw, (0, 2, 3, 1)).reshape(n, h, w * c)


def packed_to_nchw(x_packed, c):
    n, h, wc = x_packed.shape
    w = wc // c
    return jnp.transpose(x_packed.reshape(n, h, w, c), (0, 3, 1, 2))


# --------------------------- tile-size derivation --------------------------- #

def _vmem_capacity_bytes():
    try:
        info = pltpu.get_tpu_info()
        cap = getattr(info, "vmem_capacity_bytes", None)
        if cap:
            return int(cap)
    except Exception:
        pass
    return 64 * 1024 * 1024        # conservative (v7x-sized) fallback


def _pick_images_per_tile(n, h, wc, act_budget_bytes):
    """Largest divisor of n whose working set fits; stop once rows >= 256."""
    best = 1
    for bt in range(1, n + 1):
        if n % bt:
            continue
        rows = bt * h
        # double-buffered f32 x/out tiles plus ~5 row-block f32 intermediates
        need = (2 + 2 + 5) * rows * wc * 4
        if bt > 1 and need > act_budget_bytes:
            break
        best = bt
        if rows >= 256:            # MXU M dimension fully fed (v6e/v7x target)
            break
    return best


# ------------------------------ BN finalize --------------------------------- #

def _fold_bn(psum, psumsq, gamma, beta, width, count):
    """Per-tile partial sums -> folded per-lane BN scale/shift (tiny, plain JAX)."""
    cout = gamma.shape[0]
    s_c = jnp.sum(psum.reshape(-1, width, cout), axis=(0, 1))
    ss_c = jnp.sum(psumsq.reshape(-1, width, cout), axis=(0, 1))
    mean = s_c / count
    var = jnp.maximum(ss_c / count - mean * mean, 0.0)   # clamp: cancellation-safe
    scale_c = gamma * lax.rsqrt(var + EPS)
    shift_c = beta - mean * scale_c
    scale = jnp.tile(scale_c, width).reshape(1, width * cout)
    shift = jnp.tile(shift_c, width).reshape(1, width * cout)
    return scale, shift


# ------------------------------ Pallas wrapper ------------------------------ #

def residual_block_forward(x_packed, params, *, images_per_tile=None):
    """Residual block forward on packed (N, H, W*C) f32 activations."""
    n, h, wc_in = x_packed.shape
    wc_mid = params["w1big"].shape[1]          # W * Cout
    wc_out = params["w3big"].shape[1]          # W * Cexp
    cout = params["g1"].shape[0]
    width = wc_mid // cout                     # spatial W
    assert wc_out == wc_in, "identity residual needs Cexp == Cin (stride-1 block)"

    f32 = jnp.float32
    mmdt = MATMUL_DTYPE

    cap = _vmem_capacity_bytes()
    vmem_limit = min(cap * 3 // 4, 100 * 1024 * 1024)
    if images_per_tile is None:
        images_per_tile = _pick_images_per_tile(
            n, h, max(wc_in, wc_mid, wc_out), vmem_limit // 2)
    bt = images_per_tile                       # images per grid step
    assert n % bt == 0
    t = n // bt                                # grid length
    rows = bt * h                              # matmul rows per grid step
    count = float(n * h * width)               # positions per BN channel

    # ----------------------- in-kernel building blocks ---------------------- #

    def _conv1(x2d, w1_ref):
        return jnp.dot(x2d.astype(mmdt), w1_ref[...], preferred_element_type=f32)

    def _conv3x3(a1, wrow_ref):
        # 3x3 / pad=1 conv as 3 accumulated matmuls: the kx taps and the W zero
        # padding are baked into block-banded (W*C, W*C) weights; the +-1 H
        # shifts are circular sublane rolls (XLU) with image-boundary rows
        # masked to zero (no zero-padded concatenated copies).
        rowid = lax.broadcasted_iota(jnp.int32, (rows, 1), 0)
        acc = jnp.dot(a1.astype(mmdt), wrow_ref[1], preferred_element_type=f32)
        up = pltpu.roll(a1, 1, 0)                      # up[r] = a1[r-1] (circular)
        up = jnp.where(rowid % h == 0, 0.0, up)        # zero first row of each image
        acc += jnp.dot(up.astype(mmdt), wrow_ref[0], preferred_element_type=f32)
        dn = pltpu.roll(a1, rows - 1, 0)               # dn[r] = a1[r+1] (circular)
        dn = jnp.where(rowid % h == h - 1, 0.0, dn)    # zero last row of each image
        acc += jnp.dot(dn.astype(mmdt), wrow_ref[2], preferred_element_type=f32)
        return acc

    # -------------------------------- kernels ------------------------------- #

    def k_bn1_stats(x_ref, w1_ref, sum_ref, sumsq_ref):
        h1 = _conv1(x_ref[...].reshape(rows, wc_in), w1_ref)
        sum_ref[...] = jnp.sum(h1, axis=0, keepdims=True).reshape(1, 1, wc_mid)
        sumsq_ref[...] = jnp.sum(h1 * h1, axis=0, keepdims=True).reshape(1, 1, wc_mid)

    def k_bn2_stats(x_ref, w1_ref, wrow_ref, sc1_ref, sh1_ref, sum_ref, sumsq_ref):
        x2d = x_ref[...].reshape(rows, wc_in)
        a1 = jnp.maximum(_conv1(x2d, w1_ref) * sc1_ref[...] + sh1_ref[...], 0.0)
        h2 = _conv3x3(a1, wrow_ref)
        sum_ref[...] = jnp.sum(h2, axis=0, keepdims=True).reshape(1, 1, wc_mid)
        sumsq_ref[...] = jnp.sum(h2 * h2, axis=0, keepdims=True).reshape(1, 1, wc_mid)

    def k_apply(x_ref, w1_ref, wrow_ref, w3_ref, sc1_ref, sh1_ref,
                sc2_ref, sh2_ref, out_ref):
        x2d = x_ref[...].reshape(rows, wc_in)
        a1 = jnp.maximum(_conv1(x2d, w1_ref) * sc1_ref[...] + sh1_ref[...], 0.0)
        a2 = jnp.maximum(_conv3x3(a1, wrow_ref) * sc2_ref[...] + sh2_ref[...], 0.0)
        h3 = jnp.dot(a2.astype(mmdt), w3_ref[...], preferred_element_type=f32)
        out_ref[...] = jnp.maximum(h3 + x2d, 0.0).reshape(bt, h, wc_out)

    # ------------------------------ specs / calls --------------------------- #

    x_spec = pl.BlockSpec((bt, h, wc_in), lambda i: (i, 0, 0))
    out_spec = pl.BlockSpec((bt, h, wc_out), lambda i: (i, 0, 0))
    w1_spec = pl.BlockSpec((wc_in, wc_mid), lambda i: (0, 0))
    wrow_spec = pl.BlockSpec((3, wc_mid, wc_mid), lambda i: (0, 0, 0))
    w3_spec = pl.BlockSpec((wc_mid, wc_out), lambda i: (0, 0))
    vec_spec = pl.BlockSpec((1, wc_mid), lambda i: (0, 0))
    stat_spec = pl.BlockSpec((1, 1, wc_mid), lambda i: (i, 0, 0))
    stat_shape = jax.ShapeDtypeStruct((t, 1, wc_mid), f32)

    # All passes are fully data-parallel over image tiles (stats are per-tile
    # partials reduced in JAX), so the grid axis is "parallel" everywhere and
    # shards across v7x's two TensorCores.
    # TODO(synk): weight BlockSpecs keep the default double-buffering; at real
    #   channel counts use pipeline_mode=pl.Buffered(1) on the constant-index
    #   weight inputs to reclaim VMEM (negligible at this demo size).
    cp = pltpu.CompilerParams(dimension_semantics=("parallel",),
                              vmem_limit_bytes=int(vmem_limit))

    bytes_x = n * h * wc_in * 4
    bytes_w = (wc_in * wc_mid + 3 * wc_mid * wc_mid + wc_mid * wc_out) * 2
    f_c1 = 2 * n * h * wc_in * wc_mid
    f_c2 = 2 * n * h * 3 * wc_mid * wc_mid
    f_c3 = 2 * n * h * wc_mid * wc_out

    # Pass 1: per-tile BN1 partial statistics over conv1 output.
    sum1, sumsq1 = pl.pallas_call(
        k_bn1_stats,
        grid=(t,),
        in_specs=[x_spec, w1_spec],
        out_specs=(stat_spec, stat_spec),
        out_shape=(stat_shape, stat_shape),
        compiler_params=cp,
        cost_estimate=pl.CostEstimate(flops=int(f_c1), transcendentals=0,
                                      bytes_accessed=int(bytes_x + bytes_w)),
    )(x_packed, params["w1big"])
    scale1, shift1 = _fold_bn(sum1, sumsq1, params["g1"], params["b1"], width, count)

    # Pass 2: per-tile BN2 partial statistics over conv2 output (conv1 is
    # recomputed instead of round-tripping activations through HBM).
    sum2, sumsq2 = pl.pallas_call(
        k_bn2_stats,
        grid=(t,),
        in_specs=[x_spec, w1_spec, wrow_spec, vec_spec, vec_spec],
        out_specs=(stat_spec, stat_spec),
        out_shape=(stat_shape, stat_shape),
        compiler_params=cp,
        cost_estimate=pl.CostEstimate(flops=int(f_c1 + f_c2), transcendentals=0,
                                      bytes_accessed=int(bytes_x + bytes_w)),
    )(x_packed, params["w1big"], params["wrow"], scale1, shift1)
    scale2, shift2 = _fold_bn(sum2, sumsq2, params["g2"], params["b2"], width, count)

    # Pass 3: apply bn1/relu, conv2, bn2/relu, conv3, residual add, relu.
    out = pl.pallas_call(
        k_apply,
        grid=(t,),
        in_specs=[x_spec, w1_spec, wrow_spec, w3_spec,
                  vec_spec, vec_spec, vec_spec, vec_spec],
        out_specs=out_spec,
        out_shape=jax.ShapeDtypeStruct((n, h, wc_out), f32),
        compiler_params=cp,
        cost_estimate=pl.CostEstimate(flops=int(f_c1 + f_c2 + f_c3),
                                      transcendentals=0,
                                      bytes_accessed=int(2 * bytes_x + bytes_w)),
    )(x_packed, params["w1big"], params["wrow"], params["w3big"],
      scale1, shift1, scale2, shift2)
    return out


# ----------------------------- weight repacking ----------------------------- #

def build_params(w1_pt, w2_pt, w3_pt, g1, b1, g2, b2, width,
                 matmul_dtype=MATMUL_DTYPE):
    """Repack PyTorch-layout (OIHW) weights for the lane-packed kernels.

    TODO(synk): the kron / block-banded expansion is only efficient while W*C
      stays around 128-256 lanes; at real ResNet widths the 1x1 convs should be
      plain (rows*W, Cin)x(Cin, Cout) matmuls and the 3x3 conv 9 accumulated
      (C, C) matmuls (the banded weights here scale quadratically with W*C).
    """
    w1 = np.asarray(w1_pt, np.float32)[:, :, 0, 0].T            # (Cin,  Cout)
    w3 = np.asarray(w3_pt, np.float32)[:, :, 0, 0].T            # (Cout, Cexp)
    cout = w1.shape[1]
    eye_w = np.eye(width, dtype=np.float32)
    w1big = np.kron(eye_w, w1)                                   # (W*Cin,  W*Cout)
    w3big = np.kron(eye_w, w3)                                   # (W*Cout, W*Cexp)

    # Block-banded per-row weights for the 3x3 / pad=1 conv: wrow[ky] maps the
    # packed lanes of input row (y+ky-1) to the packed output lanes of row y;
    # the kx taps and the zero padding along W are baked in.
    w2t = np.transpose(np.asarray(w2_pt, np.float32), (2, 3, 1, 0))  # (3,3,Ci,Co)
    ci2 = w2t.shape[2]
    wrow = np.zeros((3, width * ci2, width * cout), np.float32)
    for ky in range(3):
        for xs in range(width):
            for xd in range(width):
                kx = xs - xd + 1
                if 0 <= kx <= 2:
                    wrow[ky, xs * ci2:(xs + 1) * ci2,
                         xd * cout:(xd + 1) * cout] = w2t[ky, kx]

    return {
        "w1big": jnp.asarray(w1big, matmul_dtype),
        "wrow": jnp.asarray(wrow, matmul_dtype),
        "w3big": jnp.asarray(w3big, matmul_dtype),
        "g1": jnp.asarray(np.asarray(g1, np.float32).reshape(cout)),
        "b1": jnp.asarray(np.asarray(b1, np.float32).reshape(cout)),
        "g2": jnp.asarray(np.asarray(g2, np.float32).reshape(cout)),
        "b2": jnp.asarray(np.asarray(b2, np.float32).reshape(cout)),
    }


# --------------------------- reference (pure JAX) --------------------------- #

def ref_forward(x, w1_pt, w2_pt, w3_pt, g1, b1, g2, b2):
    dn = ("NCHW", "OIHW", "NCHW")

    def bn(v, g, b):
        mean = jnp.mean(v, axis=(0, 2, 3), keepdims=True)
        var = jnp.mean((v - mean) ** 2, axis=(0, 2, 3), keepdims=True)
        return ((v - mean) * lax.rsqrt(var + EPS)
                * g.reshape(1, -1, 1, 1) + b.reshape(1, -1, 1, 1))

    out = lax.conv_general_dilated(x, w1_pt, (1, 1), "VALID", dimension_numbers=dn)
    out = jnp.maximum(bn(out, g1, b1), 0.0)
    out = lax.conv_general_dilated(out, w2_pt, (1, 1), ((1, 1), (1, 1)),
                                   dimension_numbers=dn)
    out = jnp.maximum(bn(out, g2, b2), 0.0)
    out = lax.conv_general_dilated(out, w3_pt, (1, 1), "VALID", dimension_numbers=dn)
    return jnp.maximum(out + x, 0.0)


# ---------------------------------- main ------------------------------------ #

if __name__ == "__main__":
    # Small shapes consistent with the block as instantiated with stride=1,
    # expansion=1, downsample=None (identity residual).  W*C = 128 makes the
    # packed lane axis exactly one vreg lane width; N=32 gives a 2-step grid
    # (256 matmul rows per step) that exercises the multi-tile BN stats path.
    N, CIN, H, W = 32, 8, 16, 16
    COUT = 8

    key = jax.random.PRNGKey(0)
    k_x, k1, k2, k3, kg1, kb1, kg2, kb2 = jax.random.split(key, 8)

    x = jax.random.normal(k_x, (N, CIN, H, W), dtype=jnp.float32)

    # PyTorch-layout weights (OIHW), deterministic init.
    w1_pt = 0.1 * jax.random.normal(k1, (COUT, CIN, 1, 1), dtype=jnp.float32)
    w2_pt = 0.1 * jax.random.normal(k2, (COUT, COUT, 3, 3), dtype=jnp.float32)
    w3_pt = 0.1 * jax.random.normal(k3, (COUT, COUT, 1, 1), dtype=jnp.float32)

    # Non-trivial BatchNorm affine params (exercise the scale/shift fold).
    g1 = 1.0 + 0.1 * jax.random.normal(kg1, (COUT,), dtype=jnp.float32)
    b1 = 0.1 * jax.random.normal(kb1, (COUT,), dtype=jnp.float32)
    g2 = 1.0 + 0.1 * jax.random.normal(kg2, (COUT,), dtype=jnp.float32)
    b2 = 0.1 * jax.random.normal(kb2, (COUT,), dtype=jnp.float32)

    params = build_params(w1_pt, w2_pt, w3_pt, g1, b1, g2, b2, W)

    # Packed layout is the canonical inter-block activation layout; convert
    # only at the network boundary.
    xp = nchw_to_packed(x)
    fwd = jax.jit(residual_block_forward)
    out_packed = jax.block_until_ready(fwd(xp, params))
    out = packed_to_nchw(out_packed, CIN)

    ref = jax.block_until_ready(
        ref_forward(x, w1_pt, w2_pt, w3_pt, g1, b1, g2, b2))

    # bf16 MXU operands (f32 accumulation / BN math) vs. the f32 reference.
    np.testing.assert_allclose(np.asarray(out), np.asarray(ref),
                               rtol=2e-2, atol=2e-2)
    print("KERNEL_OK")
</pallas_src>

<mosaic_0001>
module attributes {stable_mosaic.version = 11 : i64} {
  func.func @k_bn1_stats(%arg0: i32, %arg1: memref<16x16x128xf32, #tpu.memory_space<vmem>>, %arg2: memref<128x128xbf16, #tpu.memory_space<vmem>>, %arg3: memref<1x1x128xf32, #tpu.memory_space<vmem>>, %arg4: memref<1x1x128xf32, #tpu.memory_space<vmem>>) attributes {dimension_semantics = [#tpu.dimension_semantics<parallel>], iteration_bounds = array<i64: 2>, scalar_prefetch = 0 : i64, scratch_operands = 0 : i64, tpu.core_type = #tpu.core_type<tc>, window_params = [{transform_indices = @transform_0, window_bounds = array<i64: 16, 16, 128>}, {pipeline_mode = #tpu.pipeline_mode<synchronous>, transform_indices = @transform_1, window_bounds = array<i64: 128, 128>}, {transform_indices = @transform_2, window_bounds = array<i64: 1, 1, 128>}, {transform_indices = @transform_3, window_bounds = array<i64: 1, 1, 128>}]} {
    %c0 = arith.constant 0 : index
    %c0_0 = arith.constant 0 : index
    %c0_1 = arith.constant 0 : index
    %0 = vector.load %arg1[%c0, %c0_0, %c0_1] : memref<16x16x128xf32, #tpu.memory_space<vmem>>, vector<16x16x128xf32>
    %1 = vector.shape_cast %0 : vector<16x16x128xf32> to vector<256x128xf32>
    %2 = arith.truncf %1 : vector<256x128xf32> to vector<256x128xbf16>
    %c0_2 = arith.constant 0 : index
    %c0_3 = arith.constant 0 : index
    %3 = vector.load %arg2[%c0_2, %c0_3] : memref<128x128xbf16, #tpu.memory_space<vmem>>, vector<128x128xbf16>
    %cst = arith.constant dense<0.000000e+00> : vector<256x128xf32>
    %4 = tpu.matmul %2, %3, %cst {dimension_numbers = #tpu.dot_dimension_numbers<[1], [0], [0], [1], [0, 0, 1, 1], [], []>} : vector<256x128xbf16>, vector<128x128xbf16>, vector<256x128xf32> -> vector<256x128xf32>
    %cst_4 = arith.constant dense<0.000000e+00> : vector<128xf32>
    %5 = vector.multi_reduction <add>, %4, %cst_4 [0] : vector<256x128xf32> to vector<128xf32>
    %6 = vector.shape_cast %5 : vector<128xf32> to vector<1x128xf32>
    %7 = vector.shape_cast %6 : vector<1x128xf32> to vector<1x1x128xf32>
    %c0_5 = arith.constant 0 : index
    %c0_6 = arith.constant 0 : index
    %c0_7 = arith.constant 0 : index
    %8 = vector.load %arg3[%c0_5, %c0_6, %c0_7] : memref<1x1x128xf32, #tpu.memory_space<vmem>>, vector<1x1x128xf32>
    tpu.vector_store %arg3[%c0_5, %c0_6, %c0_7], %7 {strides = array<i32>} : memref<1x1x128xf32, #tpu.memory_space<vmem>>, vector<1x1x128xf32>,
    %9 = arith.mulf %4, %4 : vector<256x128xf32>
    %cst_8 = arith.constant dense<0.000000e+00> : vector<128xf32>
    %10 = vector.multi_reduction <add>, %9, %cst_8 [0] : vector<256x128xf32> to vector<128xf32>
    %11 = vector.shape_cast %10 : vector<128xf32> to vector<1x128xf32>
    %12 = vector.shape_cast %11 : vector<1x128xf32> to vector<1x1x128xf32>
    %c0_9 = arith.constant 0 : index
    %c0_10 = arith.constant 0 : index
    %c0_11 = arith.constant 0 : index
    %13 = vector.load %arg4[%c0_9, %c0_10, %c0_11] : memref<1x1x128xf32, #tpu.memory_space<vmem>>, vector<1x1x128xf32>
    tpu.vector_store %arg4[%c0_9, %c0_10, %c0_11], %12 {strides = array<i32>} : memref<1x1x128xf32, #tpu.memory_space<vmem>>, vector<1x1x128xf32>,
    return
  }
  func.func @transform_0(%arg0: i32) -> (i32, i32, i32) {
    %c0_i32 = arith.constant 0 : i32
    %c0_i32_0 = arith.constant 0 : i32
    %c0_i32_1 = arith.constant 0 : i32
    return %arg0, %c0_i32, %c0_i32_0 : i32, i32, i32
  }
  func.func @transform_1(%arg0: i32) -> (i32, i32) {
    %c0_i32 = arith.constant 0 : i32
    %c0_i32_0 = arith.constant 0 : i32
    %c0_i32_1 = arith.constant 0 : i32
    return %c0_i32, %c0_i32_0 : i32, i32
  }
  func.func @transform_2(%arg0: i32) -> (i32, i32, i32) {
    %c0_i32 = arith.constant 0 : i32
    %c0_i32_0 = arith.constant 0 : i32
    %c0_i32_1 = arith.constant 0 : i32
    return %arg0, %c0_i32, %c0_i32_0 : i32, i32, i32
  }
  func.func @transform_3(%arg0: i32) -> (i32, i32, i32) {
    %c0_i32 = arith.constant 0 : i32
    %c0_i32_0 = arith.constant 0 : i32
    %c0_i32_1 = arith.constant 0 : i32
    return %arg0, %c0_i32, %c0_i32_0 : i32, i32, i32
  }
}

module attributes {stable_mosaic.version = 11 : i64} {
  func.func @k_bn2_stats(%arg0: i32, %arg1: memref<16x16x128xf32, #tpu.memory_space<vmem>>, %arg2: memref<128x128xbf16, #tpu.memory_space<vmem>>, %arg3: memref<3x128x128xbf16, #tpu.memory_space<vmem>>, %arg4: memref<1x128xf32, #tpu.memory_space<vmem>>, %arg5: memref<1x128xf32, #tpu.memory_space<vmem>>, %arg6: memref<1x1x128xf32, #tpu.memory_space<vmem>>, %arg7: memref<1x1x128xf32, #tpu.memory_space<vmem>>) attributes {dimension_semantics = [#tpu.dimension_semantics<parallel>], iteration_bounds = array<i64: 2>, scalar_prefetch = 0 : i64, scratch_operands = 0 : i64, tpu.core_type = #tpu.core_type<tc>, window_params = [{transform_indices = @transform_0, window_bounds = array<i64: 16, 16, 128>}, {pipeline_mode = #tpu.pipeline_mode<synchronous>, transform_indices = @transform_1, window_bounds = array<i64: 128, 128>}, {pipeline_mode = #tpu.pipeline_mode<synchronous>, transform_indices = @transform_2, window_bounds = array<i64: 3, 128, 128>}, {pipeline_mode = #tpu.pipeline_mode<synchronous>, transform_indices = @transform_3, window_bounds = array<i64: 1, 128>}, {pipeline_mode = #tpu.pipeline_mode<synchronous>, transform_indices = @transform_4, window_bounds = array<i64: 1, 128>}, {transform_indices = @transform_5, window_bounds = array<i64: 1, 1, 128>}, {transform_indices = @transform_6, window_bounds = array<i64: 1, 1, 128>}]} {
    %c0 = arith.constant 0 : index
    %c0_0 = arith.constant 0 : index
    %c0_1 = arith.constant 0 : index
    %0 = vector.load %arg1[%c0, %c0_0, %c0_1] : memref<16x16x128xf32, #tpu.memory_space<vmem>>, vector<16x16x128xf32>
    %1 = vector.shape_cast %0 : vector<16x16x128xf32> to vector<256x128xf32>
    %2 = arith.truncf %1 : vector<256x128xf32> to vector<256x128xbf16>
    %c0_2 = arith.constant 0 : index
    %c0_3 = arith.constant 0 : index
    %3 = vector.load %arg2[%c0_2, %c0_3] : memref<128x128xbf16, #tpu.memory_space<vmem>>, vector<128x128xbf16>
    %cst = arith.constant dense<0.000000e+00> : vector<256x128xf32>
    %4 = tpu.matmul %2, %3, %cst {dimension_numbers = #tpu.dot_dimension_numbers<[1], [0], [0], [1], [0, 0, 1, 1], [], []>} : vector<256x128xbf16>, vector<128x128xbf16>, vector<256x128xf32> -> vector<256x128xf32>
    %c0_4 = arith.constant 0 : index
    %c0_5 = arith.constant 0 : index
    %5 = vector.load %arg4[%c0_4, %c0_5] : memref<1x128xf32, #tpu.memory_space<vmem>>, vector<1x128xf32>
    %6 = vector.broadcast %5 : vector<1x128xf32> to vector<256x128xf32>
    %7 = arith.mulf %4, %6 : vector<256x128xf32>
    %c0_6 = arith.constant 0 : index
    %c0_7 = arith.constant 0 : index
    %8 = vector.load %arg5[%c0_6, %c0_7] : memref<1x128xf32, #tpu.memory_space<vmem>>, vector<1x128xf32>
    %9 = vector.broadcast %8 : vector<1x128xf32> to vector<256x128xf32>
    %10 = arith.addf %7, %9 : vector<256x128xf32>
    %cst_8 = arith.constant 0.000000e+00 : f32
    %11 = vector.broadcast %cst_8 : f32 to vector<256x128xf32>
    %12 = arith.maximumf %10, %11 : vector<256x128xf32>
    %13 = tpu.iota {dimensions = array<i32: 0>} : vector<256x1xi32>
    %14 = arith.truncf %12 : vector<256x128xf32> to vector<256x128xbf16>
    %c1 = arith.constant 1 : index
    %c0_9 = arith.constant 0 : index
    %c0_10 = arith.constant 0 : index
    %15 = vector.load %arg3[%c1, %c0_9, %c0_10] : memref<3x128x128xbf16, #tpu.memory_space<vmem>>, vector<1x128x128xbf16>
    %16 = vector.shape_cast %15 : vector<1x128x128xbf16> to vector<128x128xbf16>
    %cst_11 = arith.constant dense<0.000000e+00> : vector<256x128xf32>
    %17 = tpu.matmul %14, %16, %cst_11 {dimension_numbers = #tpu.dot_dimension_numbers<[1], [0], [0], [1], [0, 0, 1, 1], [], []>} : vector<256x128xbf16>, vector<128x128xbf16>, vector<256x128xf32> -> vector<256x128xf32>
    %c1_i32 = arith.constant 1 : i32
    %18 = tpu.dynamic_rotate %12 by %c1_i32 dim 0 : vector<256x128xf32>, i32 -> vector<256x128xf32>
    %c16_i32 = arith.constant 16 : i32
    %c0_i32 = arith.constant 0 : i32
    %19 = arith.cmpi eq, %c16_i32, %c0_i32 : i32
    %c1_i32_12 = arith.constant 1 : i32
    %20 = arith.select %19, %c1_i32_12, %c16_i32 : i32
    %21 = vector.broadcast %20 : i32 to vector<256x1xi32>
    %22 = arith.remsi %13, %21 : vector<256x1xi32>
    %c0_i32_13 = arith.constant 0 : i32
    %23 = vector.broadcast %c0_i32_13 : i32 to vector<256x1xi32>
    %24 = arith.cmpi ne, %22, %23 : vector<256x1xi32>
    %c0_i32_14 = arith.constant 0 : i32
    %25 = vector.broadcast %c0_i32_14 : i32 to vector<256x1xi32>
    %26 = arith.cmpi slt, %22, %25 : vector<256x1xi32>
    %c0_i32_15 = arith.constant 0 : i32
    %27 = arith.cmpi slt, %20, %c0_i32_15 : i32
    %28 = vector.broadcast %27 : i1 to vector<256x1xi1>
    %29 = vector.broadcast %28 : vector<256x1xi1> to vector<256x1xi1>
    %30 = arith.xori %26, %29 : vector<256x1xi1>
    %31 = arith.andi %30, %24 : vector<256x1xi1>
    %32 = vector.broadcast %20 : i32 to vector<256x1xi32>
    %33 = arith.addi %22, %32 : vector<256x1xi32>
    %34 = arith.select %31, %33, %22 : vector<256x1xi1>, vector<256x1xi32>
    %c0_i32_16 = arith.constant 0 : i32
    %35 = vector.broadcast %c0_i32_16 : i32 to vector<256x1xi32>
    %36 = arith.cmpi eq, %34, %35 : vector<256x1xi32>
    %cst_17 = arith.constant 0.000000e+00 : f32
    %37 = vector.shape_cast %36 : vector<256x1xi1> to vector<256x1xi1>
    %38 = vector.broadcast %37 : vector<256x1xi1> to vector<256x128xi1>
    %39 = vector.broadcast %cst_17 : f32 to vector<256x128xf32>
    %40 = arith.select %38, %39, %18 : vector<256x128xi1>, vector<256x128xf32>
    %41 = arith.truncf %40 : vector<256x128xf32> to vector<256x128xbf16>
    %c0_18 = arith.constant 0 : index
    %c0_19 = arith.constant 0 : index
    %c0_20 = arith.constant 0 : index
    %42 = vector.load %arg3[%c0_18, %c0_19, %c0_20] : memref<3x128x128xbf16, #tpu.memory_space<vmem>>, vector<1x128x128xbf16>
    %43 = vector.shape_cast %42 : vector<1x128x128xbf16> to vector<128x128xbf16>
    %cst_21 = arith.constant dense<0.000000e+00> : vector<256x128xf32>
    %44 = tpu.matmul %41, %43, %cst_21 {dimension_numbers = #tpu.dot_dimension_numbers<[1], [0], [0], [1], [0, 0, 1, 1], [], []>} : vector<256x128xbf16>, vector<128x128xbf16>, vector<256x128xf32> -> vector<256x128xf32>
    %45 = arith.addf %17, %44 : vector<256x128xf32>
    %c255_i32 = arith.constant 255 : i32
    %46 = tpu.dynamic_rotate %12 by %c255_i32 dim 0 : vector<256x128xf32>, i32 -> vector<256x128xf32>
    %c16_i32_22 = arith.constant 16 : i32
    %c0_i32_23 = arith.constant 0 : i32
    %47 = arith.cmpi eq, %c16_i32_22, %c0_i32_23 : i32
    %c1_i32_24 = arith.constant 1 : i32
    %48 = arith.select %47, %c1_i32_24, %c16_i32_22 : i32
    %49 = vector.broadcast %48 : i32 to vector<256x1xi32>
    %50 = arith.remsi %13, %49 : vector<256x1xi32>
    %c0_i32_25 = arith.constant 0 : i32
    %51 = vector.broadcast %c0_i32_25 : i32 to vector<256x1xi32>
    %52 = arith.cmpi ne, %50, %51 : vector<256x1xi32>
    %c0_i32_26 = arith.constant 0 : i32
    %53 = vector.broadcast %c0_i32_26 : i32 to vector<256x1xi32>
    %54 = arith.cmpi slt, %50, %53 : vector<256x1xi32>
    %c0_i32_27 = arith.constant 0 : i32
    %55 = arith.cmpi slt, %48, %c0_i32_27 : i32
    %56 = vector.broadcast %55 : i1 to vector<256x1xi1>
    %57 = vector.broadcast %56 : vector<256x1xi1> to vector<256x1xi1>
    %58 = arith.xori %54, %57 : vector<256x1xi1>
    %59 = arith.andi %58, %52 : vector<256x1xi1>
    %60 = vector.broadcast %48 : i32 to vector<256x1xi32>
    %61 = arith.addi %50, %60 : vector<256x1xi32>
    %62 = arith.select %59, %61, %50 : vector<256x1xi1>, vector<256x1xi32>
    %c15_i32 = arith.constant 15 : i32
    %63 = vector.broadcast %c15_i32 : i32 to vector<256x1xi32>
    %64 = arith.cmpi eq, %62, %63 : vector<256x1xi32>
    %cst_28 = arith.constant 0.000000e+00 : f32
    %65 = vector.shape_cast %64 : vector<256x1xi1> to vector<256x1xi1>
    %66 = vector.broadcast %65 : vector<256x1xi1> to vector<256x128xi1>
    %67 = vector.broadcast %cst_28 : f32 to vector<256x128xf32>
    %68 = arith.select %66, %67, %46 : vector<256x128xi1>, vector<256x128xf32>
    %69 = arith.truncf %68 : vector<256x128xf32> to vector<256x128xbf16>
    %c2 = arith.constant 2 : index
    %c0_29 = arith.constant 0 : index
    %c0_30 = arith.constant 0 : index
    %70 = vector.load %arg3[%c2, %c0_29, %c0_30] : memref<3x128x128xbf16, #tpu.memory_space<vmem>>, vector<1x128x128xbf16>
    %71 = vector.shape_cast %70 : vector<1x128x128xbf16> to vector<128x128xbf16>
    %cst_31 = arith.constant dense<0.000000e+00> : vector<256x128xf32>
    %72 = tpu.matmul %69, %71, %cst_31 {dimension_numbers = #tpu.dot_dimension_numbers<[1], [0], [0], [1], [0, 0, 1, 1], [], []>} : vector<256x128xbf16>, vector<128x128xbf16>, vector<256x128xf32> -> vector<256x128xf32>
    %73 = arith.addf %45, %72 : vector<256x128xf32>
    %cst_32 = arith.constant dense<0.000000e+00> : vector<128xf32>
    %74 = vector.multi_reduction <add>, %73, %cst_32 [0] : vector<256x128xf32> to vector<128xf32>
    %75 = vector.shape_cast %74 : vector<128xf32> to vector<1x128xf32>
    %76 = vector.shape_cast %75 : vector<1x128xf32> to vector<1x1x128xf32>
    %c0_33 = arith.constant 0 : index
    %c0_34 = arith.constant 0 : index
    %c0_35 = arith.constant 0 : index
    %77 = vector.load %arg6[%c0_33, %c0_34, %c0_35] : memref<1x1x128xf32, #tpu.memory_space<vmem>>, vector<1x1x128xf32>
    tpu.vector_store %arg6[%c0_33, %c0_34, %c0_35], %76 {strides = array<i32>} : memref<1x1x128xf32, #tpu.memory_space<vmem>>, vector<1x1x128xf32>,
    %78 = arith.mulf %73, %73 : vector<256x128xf32>
    %cst_36 = arith.constant dense<0.000000e+00> : vector<128xf32>
    %79 = vector.multi_reduction <add>, %78, %cst_36 [0] : vector<256x128xf32> to vector<128xf32>
    %80 = vector.shape_cast %79 : vector<128xf32> to vector<1x128xf32>
    %81 = vector.shape_cast %80 : vector<1x128xf32> to vector<1x1x128xf32>
    %c0_37 = arith.constant 0 : index
    %c0_38 = arith.constant 0 : index
    %c0_39 = arith.constant 0 : index
    %82 = vector.load %arg7[%c0_37, %c0_38, %c0_39] : memref<1x1x128xf32, #tpu.memory_space<vmem>>, vector<1x1x128xf32>
    tpu.vector_store %arg7[%c0_37, %c0_38, %c0_39], %81 {strides = array<i32>} : memref<1x1x128xf32, #tpu.memory_space<vmem>>, vector<1x1x128xf32>,
    return
  }
  func.func @transform_0(%arg0: i32) -> (i32, i32, i32) {
    %c0_i32 = arith.constant 0 : i32
    %c0_i32_0 = arith.constant 0 : i32
    %c0_i32_1 = arith.constant 0 : i32
    return %arg0, %c0_i32, %c0_i32_0 : i32, i32, i32
  }
  func.func @transform_1(%arg0: i32) -> (i32, i32) {
    %c0_i32 = arith.constant 0 : i32
    %c0_i32_0 = arith.constant 0 : i32
    %c0_i32_1 = arith.constant 0 : i32
    return %c0_i32, %c0_i32_0 : i32, i32
  }
  func.func @transform_2(%arg0: i32) -> (i32, i32, i32) {
    %c0_i32 = arith.constant 0 : i32
    %c0_i32_0 = arith.constant 0 : i32
    %c0_i32_1 = arith.constant 0 : i32
    %c0_i32_2 = arith.constant 0 : i32
    return %c0_i32, %c0_i32_0, %c0_i32_1 : i32, i32, i32
  }
  func.func @transform_3(%arg0: i32) -> (i32, i32) {
    %c0_i32 = arith.constant 0 : i32
    %c0_i32_0 = arith.constant 0 : i32
    %c0_i32_1 = arith.constant 0 : i32
    return %c0_i32, %c0_i32_0 : i32, i32
  }
  func.func @transform_4(%arg0: i32) -> (i32, i32) {
    %c0_i32 = arith.constant 0 : i32
    %c0_i32_0 = arith.constant 0 : i32
    %c0_i32_1 = arith.constant 0 : i32
    return %c0_i32, %c0_i32_0 : i32, i32
  }
  func.func @transform_5(%arg0: i32) -> (i32, i32, i32) {
    %c0_i32 = arith.constant 0 : i32
    %c0_i32_0 = arith.constant 0 : i32
    %c0_i32_1 = arith.constant 0 : i32
    return %arg0, %c0_i32, %c0_i32_0 : i32, i32, i32
  }
  func.func @transform_6(%arg0: i32) -> (i32, i32, i32) {
    %c0_i32 = arith.constant 0 : i32
    %c0_i32_0 = arith.constant 0 : i32
    %c0_i32_1 = arith.constant 0 : i32
    return %arg0, %c0_i32, %c0_i32_0 : i32, i32, i32
  }
}

module attributes {stable_mosaic.version = 11 : i64} {
  func.func @k_apply(%arg0: i32, %arg1: memref<16x16x128xf32, #tpu.memory_space<vmem>>, %arg2: memref<128x128xbf16, #tpu.memory_space<vmem>>, %arg3: memref<3x128x128xbf16, #tpu.memory_space<vmem>>, %arg4: memref<128x128xbf16, #tpu.memory_space<vmem>>, %arg5: memref<1x128xf32, #tpu.memory_space<vmem>>, %arg6: memref<1x128xf32, #tpu.memory_space<vmem>>, %arg7: memref<1x128xf32, #tpu.memory_space<vmem>>, %arg8: memref<1x128xf32, #tpu.memory_space<vmem>>, %arg9: memref<16x16x128xf32, #tpu.memory_space<vmem>>) attributes {dimension_semantics = [#tpu.dimension_semantics<parallel>], iteration_bounds = array<i64: 2>, scalar_prefetch = 0 : i64, scratch_operands = 0 : i64, tpu.core_type = #tpu.core_type<tc>, window_params = [{transform_indices = @transform_0, window_bounds = array<i64: 16, 16, 128>}, {pipeline_mode = #tpu.pipeline_mode<synchronous>, transform_indices = @transform_1, window_bounds = array<i64: 128, 128>}, {pipeline_mode = #tpu.pipeline_mode<synchronous>, transform_indices = @transform_2, window_bounds = array<i64: 3, 128, 128>}, {pipeline_mode = #tpu.pipeline_mode<synchronous>, transform_indices = @transform_3, window_bounds = array<i64: 128, 128>}, {pipeline_mode = #tpu.pipeline_mode<synchronous>, transform_indices = @transform_4, window_bounds = array<i64: 1, 128>}, {pipeline_mode = #tpu.pipeline_mode<synchronous>, transform_indices = @transform_5, window_bounds = array<i64: 1, 128>}, {pipeline_mode = #tpu.pipeline_mode<synchronous>, transform_indices = @transform_6, window_bounds = array<i64: 1, 128>}, {pipeline_mode = #tpu.pipeline_mode<synchronous>, transform_indices = @transform_7, window_bounds = array<i64: 1, 128>}, {transform_indices = @transform_8, window_bounds = array<i64: 16, 16, 128>}]} {
    %c0 = arith.constant 0 : index
    %c0_0 = arith.constant 0 : index
    %c0_1 = arith.constant 0 : index
    %0 = vector.load %arg1[%c0, %c0_0, %c0_1] : memref<16x16x128xf32, #tpu.memory_space<vmem>>, vector<16x16x128xf32>
    %1 = vector.shape_cast %0 : vector<16x16x128xf32> to vector<256x128xf32>
    %2 = arith.truncf %1 : vector<256x128xf32> to vector<256x128xbf16>
    %c0_2 = arith.constant 0 : index
    %c0_3 = arith.constant 0 : index
    %3 = vector.load %arg2[%c0_2, %c0_3] : memref<128x128xbf16, #tpu.memory_space<vmem>>, vector<128x128xbf16>
    %cst = arith.constant dense<0.000000e+00> : vector<256x128xf32>
    %4 = tpu.matmul %2, %3, %cst {dimension_numbers = #tpu.dot_dimension_numbers<[1], [0], [0], [1], [0, 0, 1, 1], [], []>} : vector<256x128xbf16>, vector<128x128xbf16>, vector<256x128xf32> -> vector<256x128xf32>
    %c0_4 = arith.constant 0 : index
    %c0_5 = arith.constant 0 : index
    %5 = vector.load %arg5[%c0_4, %c0_5] : memref<1x128xf32, #tpu.memory_space<vmem>>, vector<1x128xf32>
    %6 = vector.broadcast %5 : vector<1x128xf32> to vector<256x128xf32>
    %7 = arith.mulf %4, %6 : vector<256x128xf32>
    %c0_6 = arith.constant 0 : index
    %c0_7 = arith.constant 0 : index
    %8 = vector.load %arg6[%c0_6, %c0_7] : memref<1x128xf32, #tpu.memory_space<vmem>>, vector<1x128xf32>
    %9 = vector.broadcast %8 : vector<1x128xf32> to vector<256x128xf32>
    %10 = arith.addf %7, %9 : vector<256x128xf32>
    %cst_8 = arith.constant 0.000000e+00 : f32
    %11 = vector.broadcast %cst_8 : f32 to vector<256x128xf32>
    %12 = arith.maximumf %10, %11 : vector<256x128xf32>
    %13 = tpu.iota {dimensions = array<i32: 0>} : vector<256x1xi32>
    %14 = arith.truncf %12 : vector<256x128xf32> to vector<256x128xbf16>
    %c1 = arith.constant 1 : index
    %c0_9 = arith.constant 0 : index
    %c0_10 = arith.constant 0 : index
    %15 = vector.load %arg3[%c1, %c0_9, %c0_10] : memref<3x128x128xbf16, #tpu.memory_space<vmem>>, vector<1x128x128xbf16>
    %16 = vector.shape_cast %15 : vector<1x128x128xbf16> to vector<128x128xbf16>
    %cst_11 = arith.constant dense<0.000000e+00> : vector<256x128xf32>
    %17 = tpu.matmul %14, %16, %cst_11 {dimension_numbers = #tpu.dot_dimension_numbers<[1], [0], [0], [1], [0, 0, 1, 1], [], []>} : vector<256x128xbf16>, vector<128x128xbf16>, vector<256x128xf32> -> vector<256x128xf32>
    %c1_i32 = arith.constant 1 : i32
    %18 = tpu.dynamic_rotate %12 by %c1_i32 dim 0 : vector<256x128xf32>, i32 -> vector<256x128xf32>
    %c16_i32 = arith.constant 16 : i32
    %c0_i32 = arith.constant 0 : i32
    %19 = arith.cmpi eq, %c16_i32, %c0_i32 : i32
    %c1_i32_12 = arith.constant 1 : i32
    %20 = arith.select %19, %c1_i32_12, %c16_i32 : i32
    %21 = vector.broadcast %20 : i32 to vector<256x1xi32>
    %22 = arith.remsi %13, %21 : vector<256x1xi32>
    %c0_i32_13 = arith.constant 0 : i32
    %23 = vector.broadcast %c0_i32_13 : i32 to vector<256x1xi32>
    %24 = arith.cmpi ne, %22, %23 : vector<256x1xi32>
    %c0_i32_14 = arith.constant 0 : i32
    %25 = vector.broadcast %c0_i32_14 : i32 to vector<256x1xi32>
    %26 = arith.cmpi slt, %22, %25 : vector<256x1xi32>
    %c0_i32_15 = arith.constant 0 : i32
    %27 = arith.cmpi slt, %20, %c0_i32_15 : i32
    %28 = vector.broadcast %27 : i1 to vector<256x1xi1>
    %29 = vector.broadcast %28 : vector<256x1xi1> to vector<256x1xi1>
    %30 = arith.xori %26, %29 : vector<256x1xi1>
    %31 = arith.andi %30, %24 : vector<256x1xi1>
    %32 = vector.broadcast %20 : i32 to vector<256x1xi32>
    %33 = arith.addi %22, %32 : vector<256x1xi32>
    %34 = arith.select %31, %33, %22 : vector<256x1xi1>, vector<256x1xi32>
    %c0_i32_16 = arith.constant 0 : i32
    %35 = vector.broadcast %c0_i32_16 : i32 to vector<256x1xi32>
    %36 = arith.cmpi eq, %34, %35 : vector<256x1xi32>
    %cst_17 = arith.constant 0.000000e+00 : f32
    %37 = vector.shape_cast %36 : vector<256x1xi1> to vector<256x1xi1>
    %38 = vector.broadcast %37 : vector<256x1xi1> to vector<256x128xi1>
    %39 = vector.broadcast %cst_17 : f32 to vector<256x128xf32>
    %40 = arith.select %38, %39, %18 : vector<256x128xi1>, vector<256x128xf32>
    %41 = arith.truncf %40 : vector<256x128xf32> to vector<256x128xbf16>
    %c0_18 = arith.constant 0 : index
    %c0_19 = arith.constant 0 : index
    %c0_20 = arith.constant 0 : index
    %42 = vector.load %arg3[%c0_18, %c0_19, %c0_20] : memref<3x128x128xbf16, #tpu.memory_space<vmem>>, vector<1x128x128xbf16>
    %43 = vector.shape_cast %42 : vector<1x128x128xbf16> to vector<128x128xbf16>
    %cst_21 = arith.constant dense<0.000000e+00> : vector<256x128xf32>
    %44 = tpu.matmul %41, %43, %cst_21 {dimension_numbers = #tpu.dot_dimension_numbers<[1], [0], [0], [1], [0, 0, 1, 1], [], []>} : vector<256x128xbf16>, vector<128x128xbf16>, vector<256x128xf32> -> vector<256x128xf32>
    %45 = arith.addf %17, %44 : vector<256x128xf32>
    %c255_i32 = arith.constant 255 : i32
    %46 = tpu.dynamic_rotate %12 by %c255_i32 dim 0 : vector<256x128xf32>, i32 -> vector<256x128xf32>
    %c16_i32_22 = arith.constant 16 : i32
    %c0_i32_23 = arith.constant 0 : i32
    %47 = arith.cmpi eq, %c16_i32_22, %c0_i32_23 : i32
    %c1_i32_24 = arith.constant 1 : i32
    %48 = arith.select %47, %c1_i32_24, %c16_i32_22 : i32
    %49 = vector.broadcast %48 : i32 to vector<256x1xi32>
    %50 = arith.remsi %13, %49 : vector<256x1xi32>
    %c0_i32_25 = arith.constant 0 : i32
    %51 = vector.broadcast %c0_i32_25 : i32 to vector<256x1xi32>
    %52 = arith.cmpi ne, %50, %51 : vector<256x1xi32>
    %c0_i32_26 = arith.constant 0 : i32
    %53 = vector.broadcast %c0_i32_26 : i32 to vector<256x1xi32>
    %54 = arith.cmpi slt, %50, %53 : vector<256x1xi32>
    %c0_i32_27 = arith.constant 0 : i32
    %55 = arith.cmpi slt, %48, %c0_i32_27 : i32
    %56 = vector.broadcast %55 : i1 to vector<256x1xi1>
    %57 = vector.broadcast %56 : vector<256x1xi1> to vector<256x1xi1>
    %58 = arith.xori %54, %57 : vector<256x1xi1>
    %59 = arith.andi %58, %52 : vector<256x1xi1>
    %60 = vector.broadcast %48 : i32 to vector<256x1xi32>
    %61 = arith.addi %50, %60 : vector<256x1xi32>
    %62 = arith.select %59, %61, %50 : vector<256x1xi1>, vector<256x1xi32>
    %c15_i32 = arith.constant 15 : i32
    %63 = vector.broadcast %c15_i32 : i32 to vector<256x1xi32>
    %64 = arith.cmpi eq, %62, %63 : vector<256x1xi32>
    %cst_28 = arith.constant 0.000000e+00 : f32
    %65 = vector.shape_cast %64 : vector<256x1xi1> to vector<256x1xi1>
    %66 = vector.broadcast %65 : vector<256x1xi1> to vector<256x128xi1>
    %67 = vector.broadcast %cst_28 : f32 to vector<256x128xf32>
    %68 = arith.select %66, %67, %46 : vector<256x128xi1>, vector<256x128xf32>
    %69 = arith.truncf %68 : vector<256x128xf32> to vector<256x128xbf16>
    %c2 = arith.constant 2 : index
    %c0_29 = arith.constant 0 : index
    %c0_30 = arith.constant 0 : index
    %70 = vector.load %arg3[%c2, %c0_29, %c0_30] : memref<3x128x128xbf16, #tpu.memory_space<vmem>>, vector<1x128x128xbf16>
    %71 = vector.shape_cast %70 : vector<1x128x128xbf16> to vector<128x128xbf16>
    %cst_31 = arith.constant dense<0.000000e+00> : vector<256x128xf32>
    %72 = tpu.matmul %69, %71, %cst_31 {dimension_numbers = #tpu.dot_dimension_numbers<[1], [0], [0], [1], [0, 0, 1, 1], [], []>} : vector<256x128xbf16>, vector<128x128xbf16>, vector<256x128xf32> -> vector<256x128xf32>
    %73 = arith.addf %45, %72 : vector<256x128xf32>
    %c0_32 = arith.constant 0 : index
    %c0_33 = arith.constant 0 : index
    %74 = vector.load %arg7[%c0_32, %c0_33] : memref<1x128xf32, #tpu.memory_space<vmem>>, vector<1x128xf32>
    %75 = vector.broadcast %74 : vector<1x128xf32> to vector<256x128xf32>
    %76 = arith.mulf %73, %75 : vector<256x128xf32>
    %c0_34 = arith.constant 0 : index
    %c0_35 = arith.constant 0 : index
    %77 = vector.load %arg8[%c0_34, %c0_35] : memref<1x128xf32, #tpu.memory_space<vmem>>, vector<1x128xf32>
    %78 = vector.broadcast %77 : vector<1x128xf32> to vector<256x128xf32>
    %79 = arith.addf %76, %78 : vector<256x128xf32>
    %cst_36 = arith.constant 0.000000e+00 : f32
    %80 = vector.broadcast %cst_36 : f32 to vector<256x128xf32>
    %81 = arith.maximumf %79, %80 : vector<256x128xf32>
    %82 = arith.truncf %81 : vector<256x128xf32> to vector<256x128xbf16>
    %c0_37 = arith.constant 0 : index
    %c0_38 = arith.constant 0 : index
    %83 = vector.load %arg4[%c0_37, %c0_38] : memref<128x128xbf16, #tpu.memory_space<vmem>>, vector<128x128xbf16>
    %cst_39 = arith.constant dense<0.000000e+00> : vector<256x128xf32>
    %84 = tpu.matmul %82, %83, %cst_39 {dimension_numbers = #tpu.dot_dimension_numbers<[1], [0], [0], [1], [0, 0, 1, 1], [], []>} : vector<256x128xbf16>, vector<128x128xbf16>, vector<256x128xf32> -> vector<256x128xf32>
    %85 = arith.addf %84, %1 : vector<256x128xf32>
    %cst_40 = arith.constant 0.000000e+00 : f32
    %86 = vector.broadcast %cst_40 : f32 to vector<256x128xf32>
    %87 = arith.maximumf %85, %86 : vector<256x128xf32>
    %88 = vector.shape_cast %87 : vector<256x128xf32> to vector<16x16x128xf32>
    %c0_41 = arith.constant 0 : index
    %c0_42 = arith.constant 0 : index
    %c0_43 = arith.constant 0 : index
    %89 = vector.load %arg9[%c0_41, %c0_42, %c0_43] : memref<16x16x128xf32, #tpu.memory_space<vmem>>, vector<16x16x128xf32>
    tpu.vector_store %arg9[%c0_41, %c0_42, %c0_43], %88 {strides = array<i32>} : memref<16x16x128xf32, #tpu.memory_space<vmem>>, vector<16x16x128xf32>,
    return
  }
  func.func @transform_0(%arg0: i32) -> (i32, i32, i32) {
    %c0_i32 = arith.constant 0 : i32
    %c0_i32_0 = arith.constant 0 : i32
    %c0_i32_1 = arith.constant 0 : i32
    return %arg0, %c0_i32, %c0_i32_0 : i32, i32, i32
  }
  func.func @transform_1(%arg0: i32) -> (i32, i32) {
    %c0_i32 = arith.constant 0 : i32
    %c0_i32_0 = arith.constant 0 : i32
    %c0_i32_1 = arith.constant 0 : i32
    return %c0_i32, %c0_i32_0 : i32, i32
  }
  func.func @transform_2(%arg0: i32) -> (i32, i32, i32) {
    %c0_i32 = arith.constant 0 : i32
    %c0_i32_0 = arith.constant 0 : i32
    %c0_i32_1 = arith.constant 0 : i32
    %c0_i32_2 = arith.constant 0 : i32
    return %c0_i32, %c0_i32_0, %c0_i32_1 : i32, i32, i32
  }
  func.func @transform_3(%arg0: i32) -> (i32, i32) {
    %c0_i32 = arith.constant 0 : i32
    %c0_i32_0 = arith.constant 0 : i32
    %c0_i32_1 = arith.constant 0 : i32
    return %c0_i32, %c0_i32_0 : i32, i32
  }
  func.func @transform_4(%arg0: i32) -> (i32, i32) {
    %c0_i32 = arith.constant 0 : i32
    %c0_i32_0 = arith.constant 0 : i32
    %c0_i32_1 = arith.constant 0 : i32
    return %c0_i32, %c0_i32_0 : i32, i32
  }
  func.func @transform_5(%arg0: i32) -> (i32, i32) {
    %c0_i32 = arith.constant 0 : i32
    %c0_i32_0 = arith.constant 0 : i32
    %c0_i32_1 = arith.constant 0 : i32
    return %c0_i32, %c0_i32_0 : i32, i32
  }
  func.func @transform_6(%arg0: i32) -> (i32, i32) {
    %c0_i32 = arith.constant 0 : i32
    %c0_i32_0 = arith.constant 0 : i32
    %c0_i32_1 = arith.constant 0 : i32
    return %c0_i32, %c0_i32_0 : i32, i32
  }
  func.func @transform_7(%arg0: i32) -> (i32, i32) {
    %c0_i32 = arith.constant 0 : i32
    %c0_i32_0 = arith.constant 0 : i32
    %c0_i32_1 = arith.constant 0 : i32
    return %c0_i32, %c0_i32_0 : i32, i32
  }
  func.func @transform_8(%arg0: i32) -> (i32, i32, i32) {
    %c0_i32 = arith.constant 0 : i32
    %c0_i32_0 = arith.constant 0 : i32
    %c0_i32_1 = arith.constant 0 : i32
    return %arg0, %c0_i32, %c0_i32_0 : i32, i32, i32
  }
}

</mosaic_0001>

<bundles_post_ra>
// kernel: tile.29
= control target key start
LH: loop header
LB: loop body
LE: loop exit
PB: predicated region body
PF: predicated region fallthrough
CT: control target
= control target key end

     0   :  { %s133_s10 = smov 120   ;;  %s134_s11 = smov 104   ;;  %vm3_vm0 = vcmask 64512   ;;  %vm9_vm1 = vcmask 1048512   ;;  %vm15_vm2 = vcmask 982912   ;;  %vm21_vm3 = vcmask 917312   ;;  %s209_s0 = inlined_call_operand.vmem [shape: f32[16,8], index: 0, kind: input, shape index: {}]   ;;  %s210_s1 = inlined_call_operand.vmem [shape: f32[1,128], index: 1, kind: output, shape index: {}]  }
   0x1   :  { %v103_v0 = vld [vmem:[%s209_s0 + $0xf] sm:$0x1]   ;;  %v105_v1 = vld [vmem:[%s209_s0 + $0xd] sm:$0x1]   ;;  %v104_v2 = vld [vmem:[%s209_s0 + $0xe] sm:$0x1]  }
   0x2   :  { %7 = vrot.lane.b32.xlu0 %v103_v0, %s133_s10  ;;  %19 = vrot.lane.b32.xlu1 %v105_v1, %s134_s11  ;;  %v106_v3 = vld [vmem:[%s209_s0 + $0xc] sm:$0x1]   ;;  %s135_s16 = smov 112   ;;  %s136_s17 = smov 96   ;;  %v107_v4 = vld [vmem:[%s209_s0 + $0xb] sm:$0x1]  }
   0x3   :  { %v108_v5 = vld [vmem:[%s209_s0 + $0xa] sm:$0x1]   ;;  %v2_v6 = vld [vmem:[%s209_s0] sm:$0x1]   ;;  %s137_s24 = smov 88   ;;  %s138_s25 = smov 80  }
   0x4   :  { %4 = vst.msk [vmem:[#allocation0] sm:$0x1] %vm3_vm0, %v2_v6   ;;  %v109_v7 = vld [vmem:[%s209_s0 + $0x9] sm:$0x1]   ;;  %v110_v8 = vld [vmem:[%s209_s0 + $0x8] sm:$0x1]  }
   0x5   :  { %s139_s30 = smov 72   ;;  %s140_s2 = smov 64   ;;  %v111_v9 = vld [vmem:[%s209_s0 + $0x7] sm:$0x1]   ;;  %v112_v10 = vld [vmem:[%s209_s0 + $0x6] sm:$0x1]  }
   0x6   :  { %13 = vrot.lane.b32.xlu0 %v104_v2, %s135_s16  ;;  %25 = vrot.lane.b32.xlu1 %v106_v3, %s136_s17  ;;  %s141_s7 = smov 56   ;;  %s142_s8 = smov 48   ;;  %v113_v11 = vld [vmem:[%s209_s0 + $0x5] sm:$0x1]   ;;  %v114_v12 = vld [vmem:[%s209_s0 + $0x4] sm:$0x1]  }
   0x7   :  { %s143_s13 = smov 40   ;;  %s144_s14 = smov 32   ;;  %v115_v13 = vld [vmem:[%s209_s0 + $0x3] sm:$0x1]   ;;  %v116_v14 = vld [vmem:[%s209_s0 + $0x2] sm:$0x1]  }
   0x8   :  { %s145_s19 = smov 24   ;;  %s146_s20 = smov 16   ;;  %v117_v15 = vld [vmem:[%s209_s0 + $0x1] sm:$0x1]   ;;  %vm27_vm4 = vcmask 851712   ;;  %vm33_vm5 = vcmask 786112  }
   0x9   :  { %s147_s0 = smov 8   ;;  %vm39_vm6 = vcmask 720512   ;;  %vm45_vm7 = vcmask 654912   ;;  %vm51_vm8 = vcmask 589312   ;;  %vm57_vm9 = vcmask 523712  }
   0xa   :  { %31 = vrot.lane.b32.xlu0 %v107_v4, %s137_s24  ;;  %37 = vrot.lane.b32.xlu1 %v108_v5, %s138_s25  ;;  %vm63_vm10 = vcmask 458112   ;;  %vm69_vm11 = vcmask 392512   ;;  %vm75_vm12 = vcmask 326912   ;;  %vm81_vm13 = vcmask 261312  }
   0xb   :  { %vm87_vm14 = vcmask 195712   ;;  %vm93_vm15 = vcmask 130112  }
   0xe   :  { %43 = vrot.lane.b32.xlu0 %v109_v7, %s139_s30  ;;  %49 = vrot.lane.b32.xlu1 %v110_v8, %s140_s2 }
  0x12   :  { %55 = vrot.lane.b32.xlu0 %v111_v9, %s141_s7  ;;  %61 = vrot.lane.b32.xlu1 %v112_v10, %s142_s8 }
  0x16   :  { %67 = vrot.lane.b32.xlu0 %v113_v11, %s143_s13  ;;  %73 = vrot.lane.b32.xlu1 %v114_v12, %s144_s14 }
  0x1a   :  { %79 = vrot.lane.b32.xlu0 %v115_v13, %s145_s19  ;;  %85 = vrot.lane.b32.xlu1 %v116_v14, %s146_s20 }
  0x1e   :  { %91 = vrot.lane.b32.xlu0 %v117_v15, %s147_s0 }
  0x74   :  { %v8_v16 = vpop.permute.xlu0 %7   ;;  %v20_v17 = vpop.permute.xlu1 %19  }
  0x75   :  { %10 = vst.msk [vmem:[#allocation0] sm:$0x1] %vm9_vm1, %v8_v16  }
  0x78   :  { %v14_v18 = vpop.permute.xlu0 %13   ;;  %v26_v19 = vpop.permute.xlu1 %25  }
  0x79   :  { %16 = vst.msk [vmem:[#allocation0] sm:$0x1] %vm15_vm2, %v14_v18  }
  0x7a   :  { %22 = vst.msk [vmem:[#allocation0] sm:$0x1] %vm21_vm3, %v20_v17  }
  0x7b   :  { %28 = vst.msk [vmem:[#allocation0] sm:$0x1] %vm27_vm4, %v26_v19  }
  0x7c   :  { %v32_v20 = vpop.permute.xlu0 %31   ;;  %v38_v21 = vpop.permute.xlu1 %37  }
  0x7d   :  { %34 = vst.msk [vmem:[#allocation0] sm:$0x1] %vm33_vm5, %v32_v20  }
  0x7e   :  { %40 = vst.msk [vmem:[#allocation0] sm:$0x1] %vm39_vm6, %v38_v21  }
  0x80   :  { %v44_v22 = vpop.permute.xlu0 %43   ;;  %v50_v23 = vpop.permute.xlu1 %49  }
  0x81   :  { %46 = vst.msk [vmem:[#allocation0] sm:$0x1] %vm45_vm7, %v44_v22  }
  0x82   :  { %52 = vst.msk [vmem:[#allocation0] sm:$0x1] %vm51_vm8, %v50_v23  }
  0x84   :  { %v56_v24 = vpop.permute.xlu0 %55   ;;  %v62_v25 = vpop.permute.xlu1 %61  }
  0x85   :  { %58 = vst.msk [vmem:[#allocation0] sm:$0x1] %vm57_vm9, %v56_v24  }
  0x86   :  { %64 = vst.msk [vmem:[#allocation0] sm:$0x1] %vm63_vm10, %v62_v25  }
  0x88   :  { %v68_v26 = vpop.permute.xlu0 %67   ;;  %v74_v27 = vpop.permute.xlu1 %73  }
  0x89   :  { %70 = vst.msk [vmem:[#allocation0] sm:$0x1] %vm69_vm11, %v68_v26  }
  0x8a   :  { %76 = vst.msk [vmem:[#allocation0] sm:$0x1] %vm75_vm12, %v74_v27  }
  0x8c   :  { %v80_v28 = vpop.permute.xlu0 %79   ;;  %v86_v29 = vpop.permute.xlu1 %85  }
  0x8d   :  { %82 = vst.msk [vmem:[#allocation0] sm:$0x1] %vm81_vm13, %v80_v28  }
  0x8e   :  { %88 = vst.msk [vmem:[#allocation0] sm:$0x1] %vm87_vm14, %v86_v29  }
  0x90   :  { %v92_v30 = vpop.permute.xlu0 %91  }
  0x91   :  { %94 = vst.msk [vmem:[#allocation0] sm:$0x1] %vm93_vm15, %v92_v30  }
  0x98   :  { %v99_v31 = vld [vmem:[#allocation0] sm:$0x1] }
  0x99   :  { %102 = vst [vmem:[%s210_s1] sm:$0x1] %v99_v31 }

// kernel: tile.28
= control target key start
LH: loop header
LB: loop body
LE: loop exit
PB: predicated region body
PF: predicated region fallthrough
CT: control target
= control target key end

     0   :  { %s28_s0 = inlined_call_operand.vmem [shape: f32[8], index: 0, kind: input, shape index: {}]   ;;  %s29_s1 = inlined_call_operand.vmem [shape: f32[16,8], index: 1, kind: output, shape index: {}]  }
   0x1   :  { %v4_v0 = vld [vmem:[%s28_s0] ss:$0 sm:$0xff] }
   0x2   :  { %5 = vst [vmem:[%s29_s1] sm:$0xff] %v4_v0  ;;  %8 = vst [vmem:[%s29_s1 + $0x8] sm:$0xff] %v4_v0 }

// kernel: residual_block_forward.3
= control target key start
LH: loop header
LB: loop body
LE: loop exit
PB: predicated region body
PF: predicated region fallthrough
CT: control target
= control target key end

     0   :  { %9 = vsyncpa [#allocation3], 0  ;;  %s1165_s0 = inlined_call_operand.hbm [shape: f32[32,16,128], index: 0, kind: input, shape index: {}]   ;;  %s1166_s1 = inlined_call_operand.hbm [shape: bf16[128,128], index: 1, kind: input, shape index: {}]   ;;  %s1167_s2 = inlined_call_operand.vmem [shape: f32[2,1,128], index: 2, kind: output, shape index: {0}]   ;;  %s1168_s3 = inlined_call_operand.vmem [shape: f32[2,1,128], index: 3, kind: output, shape index: {1}]  }
   0x1   :  { %11 = vsyncpa [#allocation3 + $0x1], 0 }
   0x2   :  { %12 = vsyncpa [#allocation5], 0  ;;  %s982_s12 = smov 0   ;;  %s984_s13 = smov 0  }
   0x3   :  { %s986_s14 = smov 0   ;;  %s988_s15 = smov 0  }
   0x4 LB: > { %s1001_s16 = sadd.s32 4294967295, %s954_s15   ;;  %p38_p0 = scmp.ne.s32.totalorder %s946_s13, %s942_s12  ;;  %s954_s15 = sphi %s988_s15, %s1183_s15   ;;  %s950_s14 = sphi %s986_s14, %s1182_s14   ;;  %s946_s13 = sphi %s984_s13, %s1181_s13   ;;  %s942_s12 = sphi %s982_s12, %s1180_s12  }
   0x5   : > { %p1169_p1 = scmp.eq.s32.totalorder %s1001_s16, 0  ;;  %p690_p2 = scmp.ge.s32.totalorder %s954_s15, 1 }
   0x6   : > { %p122_p3 = scmp.lt.s32.totalorder %s954_s15, 3  ;;  %s956_s19 = smov [#allocation4]  }
   0x7   : > { %p1009_p4 = por %p1169_p1, %p38_p0  ;;  %s134_s20 = sshll.u32 %s956_s19, 4  ;;  %s135_s20 = int_to_ptr.vmem [resolvable:$true] %s134_s20 }
   0x8   : > { %p1013_p5 = pnand %p690_p2, %p122_p3  ;;  %s1026_s22 = sadd.s32 1, %s954_s15  }
   0x9   : > { %s1172_s17 = scalar_select %p1009_p4, 1, 0 }
   0xa   : > { %s1173_s18 = scalar_select %p1013_p5, 1, 0 }
   0xb   : > { %p806_p6 = pneg %p1013_p5  ;;  %s25_s23 = sadd.s32 1, %s950_s14 }
   0xc   : > { %s22_s24 = ssub.s32 %s954_s15, %s1026_s22  ;;  %s873_s25 = scalar_lea.vmem %s135_s20, 1024 }
   0xd   : > { %p1021_p7 = pnand %p806_p6, %p1169_p1  ;;  %p874_p9 = scmp.ne.s32.totalorder %s135_s20, %s873_s25 }
   0xe   : > { %p881_p12 = scmp.lt.s32.totalorder %s135_s20, %s135_s20  ;;  %p882_p13 = scmp.lt.s32.totalorder %s873_s25, %s873_s25 }
   0xf   : > { %p864_p8 = pneg %p1021_p7 }
  0x10   : > { %p883_p0 = por %p882_p13, %p881_p12 }
  0x11   : > { %p876_p10 = pnand %p874_p9, %p864_p8 }
  0x13   : > { %p877_p11 = pneg %p876_p10 }
  0x15   : > { %p884_p2 = pnand %p883_p0, %p877_p11 }
  0x17   : > { %887 = shalt.err (!%p884_p2)
}
  0x18   : > { %s957_s26 = smov 64   ;;  %s958_s27 = smov 4  }
  0x19   : > { %809 = dma.hbm_to_vmem [thread:$0]  (!%p1021_p7), %s1166_s1, 1024, %s135_s20, [#allocation5], %s957_s26, %s957_s26, %s958_s27  }
  0x1a   : > { %p23_p3 = scmp.eq.s32.totalorder %s22_s24, 0  ;;  %p32_p6 = scmp.ne.s32.totalorder %s950_s14, %s946_s13 }
  0x1b   : > { %p33_p8 = scmp.eq.s32.totalorder %s954_s15, 0  ;;  %p815_p9 = scmp.lt.s32.totalorder %s954_s15, 2 }
  0x1c   : > { %s1043_s30 = scalar_select %p23_p3, %s950_s14, %s25_s23  }
  0x1d   : > { %p34_p10 = por %p33_p8, %p32_p6  ;;  %s148_s4 = sand.u32 1, %s950_s14  }
  0x1e   : > { %s693_s5 = sshll.u32 %s148_s4, 8  ;;  %s711_s6 = sshll.u32 %s954_s15, 12 }
  0x1f   : > { %s1050_s9 = scalar_lea.hbm %s1165_s0, %s711_s6  ;;  %s152_s10 = scalar_lea.vmem [#allocation2], %s693_s5 }
  0x20   : > { %s160_s11 = sshll.u32 %s152_s10, 4  ;;  %p1054_p7 = pnand %p815_p9, %p34_p10  ;;  %s1052_s11 = int_to_ptr.vmem [resolvable:$true] %s160_s11 }
  0x21   : > { %s1058_s19 = scalar_lea.sflag [#allocation3], %s148_s4  ;;  %s888_s15 = scalar_lea.hbm %s1050_s9, 4096 }
  0x22   : > { %p889_p11 = scmp.ne.s32.totalorder %s1050_s9, %s888_s15  ;;  %p890_p12 = pneg %p1054_p7 }
  0x23   : > { %s893_s23 = scalar_lea.hbm %s1165_s0, 8192  ;;  %p894_p2 = scmp.lt.s32.totalorder %s1050_s9, %s1165_s0 }
  0x24   : > { %p891_p13 = pnand %p890_p12, %p889_p11  ;;  %p895_p3 = scmp.lt.s32.totalorder %s893_s23, %s888_s15 }
  0x26   : > { %p892_p0 = pneg %p891_p13  ;;  %p896_p6 = por %p895_p3, %p894_p2 }
  0x28   : > { %p897_p8 = pnand %p896_p6, %p892_p0 }
  0x2a   : > { %900 = shalt.err (!%p897_p8)
}
  0x2b   : > { %s901_s26 = scalar_lea.vmem %s1052_s11, 4096  ;;  %s959_s27 = smov [#allocation2]  }
  0x2c   : > { %p902_p9 = scmp.ne.s32.totalorder %s1052_s11, %s901_s26  ;;  %s906_s28 = sshll.u32 %s959_s27, 4  ;;  %s907_s28 = int_to_ptr.vmem [resolvable:$false] %s906_s28 }
  0x2d   : > { %s908_s29 = scalar_lea.vmem %s907_s28, 8192  ;;  %p909_p13 = scmp.lt.s32.totalorder %s1052_s11, %s907_s28 }
  0x2e   : > { %p904_p10 = pnand %p902_p9, %p890_p12  ;;  %p910_p1 = scmp.lt.s32.totalorder %s908_s29, %s901_s26 }
  0x30   : > { %p905_p11 = pneg %p904_p10  ;;  %p911_p4 = por %p910_p1, %p909_p13 }
  0x32   : > { %p912_p5 = pnand %p911_p4, %p905_p11 }
  0x34   : > { %915 = shalt.err (!%p912_p5)
}
  0x35   : > { %s960_s4 = smov 128   ;;  %s961_s5 = smov 8  }
  0x36   : > { %813 = dma.hbm_to_vmem [thread:$0]  (!%p1054_p7), %s1050_s9, 4096, %s1052_s11, %s1058_s19, %s960_s4, %s960_s4, %s961_s5  }
  0x37   : > { %p1176_p12 = scmp.ne.s32.totalorder %s1173_s18, 0 }
  0x38   : > { %s174_s6 = sand.u32 (!%p1176_p12), 1, %s946_s13   ;;  %p1177_p1 = scmp.ne.s32.totalorder (!%p1176_p12), %s1172_s17, 0 }
  0x39   : > { %172 = sbr.rel (%p1176_p12) target bundleno = 375 (0x177), region = 28  ;;  %s698_s7 = sshll.u32 (!%p1176_p12), %s174_s6, 8 }
  0x3a   : > { %s175_s8 = scalar_lea.sflag (!%p1176_p12), [#allocation3], %s174_s6  ;;  %s1082_s10 = scalar_lea.vmem (!%p1176_p12), [#allocation2], %s698_s7 }
  0x3e   : > { %933 = dma.done.wait (%p1177_p1), %s175_s8, 4096  }
  0x3f   : > { %935 = vsyncadd (%p1177_p1), %s175_s8, 4294963200  ;;  %p1178_p4 = scmp.eq.s32.totalorder %s1001_s16, 0 }
  0x41   : > { %937 = dma.done.wait (%p1178_p4), [#allocation5], 1024   ;;  %p1179_p5 = pmov %p1178_p4 }
  0x42   : > { %v854_v0 = vld [vmem:[#allocation4 + $0x38] sm:$0xff]   ;;  %v855_v1 = vld [vmem:[#allocation4 + $0x30] sm:$0xff]   ;;  %v856_v2 = vld [vmem:[#allocation4 + $0x28] sm:$0xff]   ;;  %p207_p7 = scmp.lt.s32.totalorder %s1001_s16, 1 }
  0x43   : > { %939 = vsyncadd (%p1179_p5), [#allocation5], 4294966272  ;;  %736 = vmatprep.subr.bf16.mxu0 %v854_v0  ;;  %784 = vmatprep.subr.bf16.mxu1 %v854_v0  ;;  %v857_v3 = vld [vmem:[#allocation4 + $0x20] sm:$0xff]   ;;  %v215_v5 = vld [vmem:[%s1082_s10 + $0x8] sm:$0xff] }
  0x44   : > { %737 = vmatpush3.bf16.msra.mxu0 %v854_v0  ;;  %792 = vmatpush3.bf16.msra.mxu1 %v854_v0  ;;  %v214_v4 = vld [vmem:[%s1082_s10] sm:$0xff]  ;;  %v858_v7 = vld [vmem:[#allocation4 + $0x18] sm:$0xff]   ;;  %v231_v9 = vld [vmem:[%s1082_s10 + $0x88] sm:$0xff]  ;;  %s1185_s16 = smov (!%p207_p7, %s1001_s16), 1 }
  0x45   : > { %738 = vmatprep.subr.bf16.mxu0 %v855_v1  ;;  %785 = vmatprep.subr.bf16.mxu1 %v855_v1  ;;  %v246_v6 = vpack.c.bf16 %v215_v5, %v214_v4  ;;  %v230_v8 = vld [vmem:[%s1082_s10 + $0x80] sm:$0xff]  ;;  %v859_v11 = vld [vmem:[#allocation4 + $0x10] sm:$0xff]   ;;  %v860_v12 = vld [vmem:[#allocation4 + $0x8] sm:$0xff]   ;;  %s209_s9 = scalar_lea.vmem %s1167_s2, %s1185_s16  ;;  %s212_s19 = scalar_lea.vmem %s1168_s3, %s1185_s16 }
  0x46   : > { %v254_v10 = vpack.c.bf16 %v231_v9, %v230_v8  ;;  %v861_v13 = vld [vmem:[#allocation4] sm:$0xff]   ;;  %v216_v14 = vld [vmem:[%s1082_s10 + $0x10] sm:$0xff]  ;;  %v217_v15 = vld [vmem:[%s1082_s10 + $0x18] sm:$0xff] }
  0x47   : > { %752 = vmatprep.mubr.bf16.mxu0 %v246_v6  ;;  %v218_v16 = vld [vmem:[%s1082_s10 + $0x20] sm:$0xff]  ;;  %v219_v17 = vld [vmem:[%s1082_s10 + $0x28] sm:$0xff]  ;;  %v232_v18 = vld [vmem:[%s1082_s10 + $0x90] sm:$0xff]  ;;  %v247_v22 = vpack.c.bf16 %v217_v15, %v216_v14 }
  0x48   : > { %739 = vmatpush3.bf16.msra.mxu0 %v855_v1  ;;  %793 = vmatpush3.bf16.msra.mxu1 %v855_v1  ;;  %v233_v19 = vld [vmem:[%s1082_s10 + $0x98] sm:$0xff]  ;;  %v234_v20 = vld [vmem:[%s1082_s10 + $0xa0] sm:$0xff]  ;;  %v235_v21 = vld [vmem:[%s1082_s10 + $0xa8] sm:$0xff]  ;;  %v248_v23 = vpack.c.bf16 %v219_v17, %v218_v16 }
  0x49   : > { %740 = vmatprep.subr.bf16.mxu0 %v856_v2  ;;  %786 = vmatprep.subr.bf16.mxu1 %v856_v2  ;;  %v255_v24 = vpack.c.bf16 %v233_v19, %v232_v18  ;;  %v256_v25 = vpack.c.bf16 %v235_v21, %v234_v20  ;;  %v220_v26 = vld [vmem:[%s1082_s10 + $0x30] sm:$0xff]  ;;  %v221_v27 = vld [vmem:[%s1082_s10 + $0x38] sm:$0xff]  ;;  %v222_v28 = vld [vmem:[%s1082_s10 + $0x40] sm:$0xff] }
  0x4a   : > { %768 = vmatprep.mubr.bf16.mxu1 %v254_v10  ;;  %v223_v29 = vld [vmem:[%s1082_s10 + $0x48] sm:$0xff]  ;;  %v236_v30 = vld [vmem:[%s1082_s10 + $0xb0] sm:$0xff]  ;;  %v237_v31 = vld [vmem:[%s1082_s10 + $0xb8] sm:$0xff]  ;;  %v249_v34 = vpack.c.bf16 %v221_v27, %v220_v26 }
  0x4b   : > { %v238_v32 = vld [vmem:[%s1082_s10 + $0xc0] sm:$0xff]  ;;  %v239_v33 = vld [vmem:[%s1082_s10 + $0xc8] sm:$0xff]  ;;  %v250_v35 = vpack.c.bf16 %v223_v29, %v222_v28  ;;  %v257_v36 = vpack.c.bf16 %v237_v31, %v236_v30  ;;  %v224_v38 = vld [vmem:[%s1082_s10 + $0x50] sm:$0xff] }
  0x4c   : > { %741 = vmatpush3.bf16.msra.mxu0 %v856_v2  ;;  %794 = vmatpush3.bf16.msra.mxu1 %v856_v2  ;;  %v258_v37 = vpack.c.bf16 %v239_v33, %v238_v32  ;;  %v225_v39 = vld [vmem:[%s1082_s10 + $0x58] sm:$0xff]  ;;  %v226_v40 = vld [vmem:[%s1082_s10 + $0x60] sm:$0xff]  ;;  %v227_v41 = vld [vmem:[%s1082_s10 + $0x68] sm:$0xff] }
  0x4d   : > { %742 = vmatprep.subr.bf16.mxu0 %v857_v3  ;;  %787 = vmatprep.subr.bf16.mxu1 %v857_v3  ;;  %v240_v42 = vld [vmem:[%s1082_s10 + $0xd0] sm:$0xff]  ;;  %v241_v43 = vld [vmem:[%s1082_s10 + $0xd8] sm:$0xff]  ;;  %v242_v44 = vld [vmem:[%s1082_s10 + $0xe0] sm:$0xff]  ;;  %v251_v46 = vpack.c.bf16 %v225_v39, %v224_v38  ;;  %v252_v47 = vpack.c.bf16 %v227_v41, %v226_v40 }
  0x4e   : > { %v243_v45 = vld [vmem:[%s1082_s10 + $0xe8] sm:$0xff]  ;;  %v259_v48 = vpack.c.bf16 %v241_v43, %v240_v42  ;;  %v228_v50 = vld [vmem:[%s1082_s10 + $0x70] sm:$0xff]  ;;  %v229_v51 = vld [vmem:[%s1082_s10 + $0x78] sm:$0xff] }
  0x4f   : > { %v260_v49 = vpack.c.bf16 %v243_v45, %v242_v44  ;;  %v244_v52 = vld [vmem:[%s1082_s10 + $0xf0] sm:$0xff]  ;;  %v245_v53 = vld [vmem:[%s1082_s10 + $0xf8] sm:$0xff]  ;;  %v253_v54 = vpack.c.bf16 %v229_v51, %v228_v50 }
  0x50   : > { %743 = vmatpush3.bf16.msra.mxu0 %v857_v3  ;;  %795 = vmatpush3.bf16.msra.mxu1 %v857_v3  ;;  %v261_v55 = vpack.c.bf16 %v245_v53, %v244_v52 }
  0x51   : > { %744 = vmatprep.subr.bf16.mxu0 %v858_v7  ;;  %788 = vmatprep.subr.bf16.mxu1 %v858_v7 }
  0x54   : > { %745 = vmatpush3.bf16.msra.mxu0 %v858_v7  ;;  %796 = vmatpush3.bf16.msra.mxu1 %v858_v7 }
  0x55   : > { %746 = vmatprep.subr.bf16.mxu0 %v859_v11  ;;  %789 = vmatprep.subr.bf16.mxu1 %v859_v11 }
  0x58   : > { %747 = vmatpush3.bf16.msra.mxu0 %v859_v11  ;;  %797 = vmatpush3.bf16.msra.mxu1 %v859_v11 }
  0x59   : > { %748 = vmatprep.subr.bf16.mxu0 %v860_v12  ;;  %790 = vmatprep.subr.bf16.mxu1 %v860_v12 }
  0x5c   : > { %749 = vmatpush3.bf16.msra.mxu0 %v860_v12  ;;  %798 = vmatpush3.bf16.msra.mxu1 %v860_v12 }
  0x5d   : > { %750 = vmatprep.subr.bf16.mxu0 %v861_v13  ;;  %791 = vmatprep.subr.bf16.mxu1 %v861_v13 }
  0x60   : > { %751 = vmatpush3.bf16.msra.mxu0 %v861_v13  ;;  %799 = vmatpush3.bf16.msra.mxu1 %v861_v13 }
  0x63   : > { %753 = vmatmul.mubr.bf16.vlgmr.msra.gmra.mxu0 %v247_v22  ;;  %769 = vmatmul.mubr.bf16.vlgmr.msra.gmra.mxu1 %v255_v24 }
  0x64   : > { %756 = vmatprep.mubr.bf16.mxu0 %v248_v23  ;;  %772 = vmatprep.mubr.bf16.mxu1 %v256_v25 }
  0x6b   : > { %757 = vmatmul.mubr.bf16.gmra.mxu0 %v249_v34  ;;  %773 = vmatmul.mubr.bf16.gmra.mxu1 %v257_v36 }
  0x6c   : > { %760 = vmatprep.mubr.bf16.mxu0 %v250_v35  ;;  %776 = vmatprep.mubr.bf16.mxu1 %v258_v37 }
  0x73   : > { %761 = vmatmul.mubr.bf16.gmra.mxu0 %v251_v46  ;;  %777 = vmatmul.mubr.bf16.gmra.mxu1 %v259_v48 }
  0x74   : > { %764 = vmatprep.mubr.bf16.mxu0 %v252_v47  ;;  %780 = vmatprep.mubr.bf16.mxu1 %v260_v49 }
  0x7b   : > { %765 = vmatmul.mubr.bf16.gmra.mxu0 %v253_v54  ;;  %781 = vmatmul.mubr.bf16.gmra.mxu1 %v261_v55 }
 0x123   : > { %v754_v56 = vpop.f32.mrf.mxu0  ;;  %v1124_v57 = vpop.f32.mrf.mxu1 }
 0x124   : > { %v527_v3 = vmul.f32 %v754_v56, %v754_v56 }
 0x125   : > { %v360_v58 = vpop.f32.mrf.mxu0  ;;  %v1126_v60 = vpop.f32.mrf.mxu1 }
 0x126   : > { %v525_v62 = vmul.f32 %v360_v58, %v360_v58 }
 0x127   : > { %v755_v59 = vpop.f32.mrf.mxu0  ;;  %v1128_v2 = vpop.f32.mrf.mxu1 }
 0x128   : > { %v528_v7 = vmul.f32 %v755_v59, %v755_v59 }
 0x129   : > { %v363_v61 = vpop.f32.mrf.mxu0  ;;  %v427_v11 = vpop.f32.mrf.mxu1 }
 0x12a   : > { %v487_v63 = vadd.f32 %v363_v61, %v360_v58  ;;  %v526_v0 = vmul.f32 %v363_v61, %v363_v61 }
 0x12b   : > { %v758_v1 = vpop.f32.mrf.mxu0  ;;  %v1130_v20 = vpop.f32.mrf.mxu1 }
 0x12c   : > { %v488_v4 = vadd.f32 %v754_v56, %v487_v63  ;;  %v557_v5 = vadd.f32 %v526_v0, %v525_v62  ;;  %v531_v21 = vmul.f32 %v758_v1, %v758_v1 }
 0x12d   : > { %v376_v6 = vpop.f32.mrf.mxu0  ;;  %v440_v29 = vpop.f32.mrf.mxu1 }
 0x12e   : > { %v558_v8 = vadd.f32 %v557_v5, %v527_v3  ;;  %v489_v9 = vadd.f32 %v755_v59, %v488_v4  ;;  %v529_v13 = vmul.f32 %v376_v6, %v376_v6 }
 0x12f   : > { %v759_v10 = vpop.f32.mrf.mxu0  ;;  %v775_v38 = vpop.f32.mrf.mxu1 }
 0x130   : > { %v490_v12 = vadd.f32 %v489_v9, %v376_v6  ;;  %v559_v14 = vadd.f32 %v558_v8, %v528_v7  ;;  %v532_v25 = vmul.f32 %v759_v10, %v759_v10  ;;  %v542_v6 = vmul.f32 %v427_v11, %v427_v11 }
 0x131   : > { %v379_v15 = vpop.f32.mrf.mxu0  ;;  %v443_v47 = vpop.f32.mrf.mxu1  ;;  %v543_v9 = vmul.f32 %v1124_v57, %v1124_v57 }
 0x132   : > { %v560_v16 = vadd.f32 %v559_v14, %v529_v13  ;;  %v491_v17 = vadd.f32 %v490_v12, %v379_v15  ;;  %v530_v18 = vmul.f32 %v379_v15, %v379_v15  ;;  %v544_v13 = vmul.f32 %v1128_v2, %v1128_v2 }
 0x133   : > { %v762_v19 = vpop.f32.mrf.mxu0  ;;  %v778_v55 = vpop.f32.mrf.mxu1 }
 0x134   : > { %v492_v22 = vadd.f32 %v758_v1, %v491_v17  ;;  %v561_v23 = vadd.f32 %v560_v16, %v530_v18  ;;  %v535_v39 = vmul.f32 %v762_v19, %v762_v19  ;;  %v541_v1 = vmul.f32 %v1126_v60, %v1126_v60 }
 0x135   : > { %v392_v24 = vpop.f32.mrf.mxu0  ;;  %v456_v0 = vpop.f32.mrf.mxu1  ;;  %v545_v18 = vmul.f32 %v440_v29, %v440_v29 }
 0x136   : > { %v562_v26 = vadd.f32 %v561_v23, %v531_v21  ;;  %v493_v27 = vadd.f32 %v759_v10, %v492_v22  ;;  %v533_v31 = vmul.f32 %v392_v24, %v392_v24  ;;  %v546_v21 = vmul.f32 %v443_v47, %v443_v47 }
 0x137   : > { %v763_v28 = vpop.f32.mrf.mxu0  ;;  %v779_v8 = vpop.f32.mrf.mxu1  ;;  %v547_v23 = vmul.f32 %v1130_v20, %v1130_v20 }
 0x138   : > { %v494_v30 = vadd.f32 %v493_v27, %v392_v24  ;;  %v563_v32 = vadd.f32 %v562_v26, %v532_v25  ;;  %v536_v43 = vmul.f32 %v763_v28, %v763_v28  ;;  %v548_v25 = vmul.f32 %v775_v38, %v775_v38 }
 0x139   : > { %v395_v33 = vpop.f32.mrf.mxu0  ;;  %v459_v16 = vpop.f32.mrf.mxu1 }
 0x13a   : > { %v564_v34 = vadd.f32 %v563_v32, %v533_v31  ;;  %v495_v35 = vadd.f32 %v494_v30, %v395_v33  ;;  %v534_v36 = vmul.f32 %v395_v33, %v395_v33  ;;  %v550_v33 = vmul.f32 %v459_v16, %v459_v16 }
 0x13b   : > { %v766_v37 = vpop.f32.mrf.mxu0  ;;  %v782_v22 = vpop.f32.mrf.mxu1 }
 0x13c   : > { %v496_v40 = vadd.f32 %v762_v19, %v495_v35  ;;  %v565_v41 = vadd.f32 %v564_v34, %v534_v36  ;;  %v539_v56 = vmul.f32 %v766_v37, %v766_v37  ;;  %v551_v35 = vmul.f32 %v778_v55, %v778_v55 }
 0x13d   : > { %v408_v42 = vpop.f32.mrf.mxu0 }
 0x13e   : > { %v566_v44 = vadd.f32 %v565_v41, %v535_v39  ;;  %v497_v45 = vadd.f32 %v763_v28, %v496_v40  ;;  %v537_v49 = vmul.f32 %v408_v42, %v408_v42  ;;  %v472_v28 = vpop.f32.mrf.mxu1  ;;  %v552_v39 = vmul.f32 %v779_v8, %v779_v8 }
 0x13f   : > { %v767_v46 = vpop.f32.mrf.mxu0 }
 0x140   : > { %v498_v48 = vadd.f32 %v497_v45, %v408_v42  ;;  %v567_v50 = vadd.f32 %v566_v44, %v536_v43  ;;  %v540_v61 = vmul.f32 %v767_v46, %v767_v46  ;;  %v783_v34 = vpop.f32.mrf.mxu1  ;;  %v553_v43 = vmul.f32 %v472_v28, %v472_v28 }
 0x141   : > { %v411_v51 = vpop.f32.mrf.mxu0 }
 0x142   : > { %v568_v52 = vadd.f32 %v567_v50, %v537_v49  ;;  %v499_v53 = vadd.f32 %v498_v48, %v411_v51  ;;  %v538_v54 = vmul.f32 %v411_v51, %v411_v51  ;;  %v556_v50 = vmul.f32 %v783_v34, %v783_v34 }
 0x144   : > { %v500_v58 = vadd.f32 %v766_v37, %v499_v53  ;;  %v569_v59 = vadd.f32 %v568_v52, %v538_v54 }
 0x146   : > { %v501_v62 = vadd.f32 %v767_v46, %v500_v58  ;;  %v570_v63 = vadd.f32 %v569_v59, %v539_v56 }
 0x148   : > { %v571_v3 = vadd.f32 %v570_v63, %v540_v61  ;;  %v502_v4 = vadd.f32 %v501_v62, %v1126_v60 }
 0x14a   : > { %v503_v5 = vadd.f32 %v502_v4, %v427_v11  ;;  %v572_v7 = vadd.f32 %v571_v3, %v541_v1 }
 0x14c   : > { %v504_v10 = vadd.f32 %v1124_v57, %v503_v5  ;;  %v573_v12 = vadd.f32 %v572_v7, %v542_v6 }
 0x14e   : > { %v574_v14 = vadd.f32 %v573_v12, %v543_v9  ;;  %v505_v15 = vadd.f32 %v1128_v2, %v504_v10  ;;  %v549_v2 = vmul.f32 %v456_v0, %v456_v0 }
 0x150   : > { %v506_v17 = vadd.f32 %v505_v15, %v440_v29  ;;  %v575_v60 = vadd.f32 %v574_v14, %v544_v13 }
 0x152   : > { %v576_v19 = vadd.f32 %v575_v60, %v545_v18  ;;  %v507_v11 = vadd.f32 %v506_v17, %v443_v47  ;;  %v555_v47 = vmul.f32 %v782_v22, %v782_v22 }
 0x154   : > { %v508_v57 = vadd.f32 %v1130_v20, %v507_v11  ;;  %v577_v24 = vadd.f32 %v576_v19, %v546_v21  ;;  %v475_v20 = vpop.f32.mrf.mxu1 }
 0x155   : > { %v554_v46 = vmul.f32 %v475_v20, %v475_v20 }
 0x156   : > { %v578_v26 = vadd.f32 %v577_v24, %v547_v23  ;;  %v509_v27 = vadd.f32 %v775_v38, %v508_v57 }
 0x158   : > { %v510_v30 = vadd.f32 %v509_v27, %v456_v0  ;;  %v579_v31 = vadd.f32 %v578_v26, %v548_v25 }
 0x15a   : > { %v580_v32 = vadd.f32 %v579_v31, %v549_v2  ;;  %v511_v29 = vadd.f32 %v510_v30, %v459_v16 }
 0x15c   : > { %v512_v36 = vadd.f32 %v778_v55, %v511_v29  ;;  %v581_v37 = vadd.f32 %v580_v32, %v550_v33 }
 0x15e   : > { %v582_v40 = vadd.f32 %v581_v37, %v551_v35  ;;  %v513_v41 = vadd.f32 %v779_v8, %v512_v36 }
 0x160   : > { %v514_v42 = vadd.f32 %v513_v41, %v472_v28  ;;  %v583_v44 = vadd.f32 %v582_v40, %v552_v39 }
 0x162   : > { %v584_v38 = vadd.f32 %v583_v44, %v553_v43  ;;  %v515_v45 = vadd.f32 %v514_v42, %v475_v20 }
 0x164   : > { %v516_v48 = vadd.f32 %v782_v22, %v515_v45  ;;  %v585_v49 = vadd.f32 %v584_v38, %v554_v46 }
 0x166   : > { %v517_v51 = vadd.f32 %v783_v34, %v516_v48  ;;  %v586_v52 = vadd.f32 %v585_v49, %v555_v47 }
 0x168   : > { %v518_v53 = vrot.slane %v517_v51, 4  ;;  %v587_v54 = vadd.f32 %v586_v52, %v556_v50 }
 0x16a   : > { %v519_v55 = vadd.f32 %v518_v53, %v517_v51  ;;  %v588_v56 = vrot.slane %v587_v54, 4 }
 0x16c   : > { %v520_v58 = vrot.slane %v519_v55, 2  ;;  %v589_v59 = vadd.f32 %v588_v56, %v587_v54 }
 0x16e   : > { %v521_v61 = vadd.f32 %v520_v58, %v519_v55  ;;  %v590_v62 = vrot.slane %v589_v59, 2 }
 0x170   : > { %v522_v63 = vrot.slane %v521_v61, 1  ;;  %v591_v0 = vadd.f32 %v590_v62, %v589_v59 }
 0x172   : > { %v523_v1 = vadd.f32 %v522_v63, %v521_v61  ;;  %v592_v3 = vrot.slane %v591_v0, 1 }
 0x174   : > { %524 = vst [vmem:[%s209_s9] sm:$0x1] %v523_v1  ;;  %v593_v4 = vadd.f32 %v592_v3, %v591_v0 }
 0x176   : > { %594 = vst [vmem:[%s212_s19] sm:$0x1] %v593_v4 }
 0x177 PF: > { %p15_p0 = scmp.ge.s32.totalorder %s1026_s22, 4   ;;  %s1180_s12 = smov %s946_s13 }
 0x178   : > { %s1181_s13 = smov %s950_s14  ;;  %s1182_s14 = smov %s1043_s30 }
 0x179   : > { %s1183_s15 = smov %s1026_s22  ;;  %17 = sbr.rel (!%p15_p0) target bundleno = 4 (0x4), region = 84 }
 0x17e   :  { %624 = vsyncpa [#allocation3], 1 }
 0x17f   :  { %626 = vsyncpa [#allocation3 + $0x1], 1 }
 0x180   :  { %627 = vsyncpa [#allocation5], 1 }

// kernel: residual_block_forward.4
= control target key start
LH: loop header
LB: loop body
LE: loop exit
PB: predicated region body
PF: predicated region fallthrough
CT: control target
= control target key end

     0   :  { %12 = vsyncpa [#allocation3], 0  ;;  %s3071_s21 = smov 0   ;;  %s4005_s0 = inlined_call_operand.vmem [shape: f32[32,16,128], index: 0, kind: input, shape index: {}]   ;;  %s4006_s1 = inlined_call_operand.hbm [shape: bf16[128,128], index: 1, kind: input, shape index: {}]   ;;  %s4007_s2 = inlined_call_operand.vmem [shape: bf16[3,128,128], index: 2, kind: input, shape index: {}]   ;;  %s4008_s3 = inlined_call_operand.vmem [shape: f32[1,128], index: 3, kind: input, shape index: {}]   ;;  %s4009_s4 = inlined_call_operand.vmem [shape: f32[1,128], index: 4, kind: input, shape index: {}]   ;;  %s4010_s5 = inlined_call_operand.vmem [shape: f32[2,1,128], index: 5, kind: output, shape index: {0}]   ;;  %s4011_s6 = inlined_call_operand.vmem [shape: f32[2,1,128], index: 6, kind: output, shape index: {1}]  }
   0x1 LB: > { %s3077_s22 = sadd.s32 4294967295, %s3030_s21   ;;  %p2415_p0 = scmp.ge.s32.totalorder %s3030_s21, 1  ;;  %s3030_s21 = sphi %s3071_s21, %s18_s21  }
   0x2   : > { %p185_p1 = scmp.lt.s32.totalorder %s3030_s21, 3  ;;  %s3032_s23 = smov [#allocation2]  }
   0x3   : > { %s197_s24 = sshll.u32 %s3032_s23, 4  ;;  %p2948_p3 = scmp.eq.s32.totalorder %s3077_s22, 0  ;;  %s198_s24 = int_to_ptr.vmem [resolvable:$true] %s197_s24 }
   0x4   : > { %p3081_p2 = pnand %p2415_p0, %p185_p1  ;;  %s3005_s26 = scalar_lea.vmem %s198_s24, 1024 }
   0x5   : > { %p3006_p7 = scmp.ne.s32.totalorder %s198_s24, %s3005_s26  ;;  %p3013_p10 = scmp.lt.s32.totalorder %s198_s24, %s198_s24 }
   0x6   : > { %p2944_p4 = pneg %p3081_p2  ;;  %p3014_p11 = scmp.lt.s32.totalorder %s3005_s26, %s3005_s26 }
   0x8   : > { %p2945_p5 = pnand %p2948_p3, %p2944_p4  ;;  %p3015_p12 = por %p3014_p11, %p3013_p10 }
   0xa   : > { %p2996_p6 = pneg %p2945_p5 }
   0xc   : > { %p3008_p8 = pnand %p3006_p7, %p2996_p6 }
   0xe   : > { %p3009_p9 = pneg %p3008_p8 }
  0x10   : > { %p3016_p13 = pnand %p3015_p12, %p3009_p9 }
  0x12   : > { %3019 = shalt.err (!%p3016_p13)
}
  0x13   : > { %s3033_s27 = smov 64   ;;  %s3034_s28 = smov 4  }
  0x14   : > { %2947 = dma.hbm_to_vmem [thread:$0]  (!%p2945_p5), %s4006_s1, 1024, %s198_s24, [#allocation3], %s3033_s27, %s3033_s27, %s3034_s28  }
  0x15   : > { %232 = sbr.rel (%p3081_p2) target bundleno = 667 (0x29b), region = 40 }
  0x1a   : > { %3025 = dma.done.wait (%p2948_p3), [#allocation3], 1024  }
  0x1b   : > { %3027 = vsyncadd (%p2948_p3), [#allocation3], 4294966272  ;;  %s2420_s7 = sshll.u32 %s3077_s22, 4  ;;  %v2962_v0 = vld [vmem:[#allocation2 + $0x38] sm:$0xff]   ;;  %v2963_v1 = vld [vmem:[#allocation2 + $0x30] sm:$0xff]   ;;  %vm3035_vm7 = vmmov 1  }
  0x1c   : > { %p265_p0 = scmp.lt.s32.totalorder %s2420_s7, 31  ;;  %2748 = vmatprep.subr.bf16.mxu0 %v2962_v0  ;;  %v2964_v2 = vld [vmem:[#allocation2 + $0x28] sm:$0xff]   ;;  %v2965_v3 = vld [vmem:[#allocation2 + $0x20] sm:$0xff]   ;;  %v2966_v7 = vld [vmem:[#allocation2 + $0x18] sm:$0xff]   ;;  %p271_p1 = scmp.lt.s32.totalorder %s3077_s22, 1 }
  0x1d   : > { %2749 = vmatpush3.bf16.msra.mxu0 %v2962_v0  ;;  %v2967_v8 = vld [vmem:[#allocation2 + $0x10] sm:$0xff]   ;;  %v2968_v9 = vld [vmem:[#allocation2 + $0x8] sm:$0xff]   ;;  %v2969_v10 = vld [vmem:[#allocation2] sm:$0xff]  }
  0x1e   : > { %s4094_s7 = smov (!%p265_p0, %s2420_s7), 31  ;;  %2750 = vmatprep.subr.bf16.mxu0 %v2963_v1  ;;  %v2970_v15 = vld [vmem:[%s4007_s2 + $0x78] sm:$0xff]   ;;  %v2971_v17 = vld [vmem:[%s4007_s2 + $0x70] sm:$0xff]   ;;  %v2972_v23 = vld [vmem:[%s4007_s2 + $0x68] sm:$0xff]   ;;  %s4096_s22 = smov (!%p271_p1, %s3077_s22), 1 }
  0x1f   : > { %s2619_s8 = sshll.u32 %s4094_s7, 4  ;;  %v2973_v26 = vld [vmem:[%s4007_s2 + $0x60] sm:$0xff]   ;;  %v2974_v60 = vld [vmem:[%s4007_s2 + $0x58] sm:$0xff]   ;;  %v2975_v61 = vld [vmem:[%s4007_s2 + $0x50] sm:$0xff]   ;;  %s273_s24 = scalar_lea.vmem %s4010_s5, %s4096_s22 }
  0x20   : > { %s3103_s11 = scalar_lea.vmem %s4005_s0, %s2619_s8  ;;  %v2976_v62 = vld [vmem:[%s4007_s2 + $0x48] sm:$0xff]   ;;  %v2977_v63 = vld [vmem:[%s4007_s2 + $0x40] sm:$0xff]   ;;  %v2978_v0 = vld [vmem:[%s4007_s2 + $0x38] sm:$0xff]   ;;  %s276_s27 = scalar_lea.vmem %s4011_s6, %s4096_s22 }
  0x21   : > { %2751 = vmatpush3.bf16.msra.mxu0 %v2963_v1  ;;  %v278_v4 = vld [vmem:[%s3103_s11] sm:$0xff]  ;;  %v279_v5 = vld [vmem:[%s3103_s11 + $0x8] sm:$0xff]  ;;  %v280_v11 = vld [vmem:[%s3103_s11 + $0x10] sm:$0xff]  ;;  %2796 = vmatprep.subr.bf16.mxu1 %v2978_v0 }
  0x22   : > { %2752 = vmatprep.subr.bf16.mxu0 %v2964_v2  ;;  %v310_v6 = vpack.c.bf16 %v279_v5, %v278_v4  ;;  %v281_v12 = vld [vmem:[%s3103_s11 + $0x18] sm:$0xff]  ;;  %v282_v13 = vld [vmem:[%s3103_s11 + $0x20] sm:$0xff]  ;;  %v283_v14 = vld [vmem:[%s3103_s11 + $0x28] sm:$0xff]  ;;  %2797 = vmatpush3.bf16.msra.mxu1 %v2978_v0 }
  0x23   : > { %v311_v16 = vpack.c.bf16 %v281_v12, %v280_v11  ;;  %v312_v18 = vpack.c.bf16 %v283_v14, %v282_v13  ;;  %v284_v19 = vld [vmem:[%s3103_s11 + $0x30] sm:$0xff]  ;;  %v285_v20 = vld [vmem:[%s3103_s11 + $0x38] sm:$0xff]  ;;  %v286_v21 = vld [vmem:[%s3103_s11 + $0x40] sm:$0xff]  ;;  %v661_v14 = vlaneseq }
  0x24   : > { %2764 = vmatprep.mubr.bf16.mxu0 %v310_v6  ;;  %v287_v22 = vld [vmem:[%s3103_s11 + $0x48] sm:$0xff]  ;;  %v313_v24 = vpack.c.bf16 %v285_v20, %v284_v19  ;;  %v288_v27 = vld [vmem:[%s3103_s11 + $0x50] sm:$0xff]  ;;  %v289_v28 = vld [vmem:[%s3103_s11 + $0x58] sm:$0xff] }
  0x25   : > { %2753 = vmatpush3.bf16.msra.mxu0 %v2964_v2  ;;  %v314_v25 = vpack.c.bf16 %v287_v22, %v286_v21  ;;  %v290_v29 = vld [vmem:[%s3103_s11 + $0x60] sm:$0xff]  ;;  %v291_v30 = vld [vmem:[%s3103_s11 + $0x68] sm:$0xff]  ;;  %v315_v31 = vpack.c.bf16 %v289_v28, %v288_v27  ;;  %v292_v33 = vld [vmem:[%s3103_s11 + $0x70] sm:$0xff]  ;;  %v3205_v19 = vshrl.u32 %v661_v14, 7 }
  0x26   : > { %2754 = vmatprep.subr.bf16.mxu0 %v2965_v3  ;;  %v316_v32 = vpack.c.bf16 %v291_v30, %v290_v29  ;;  %v293_v34 = vld [vmem:[%s3103_s11 + $0x78] sm:$0xff]  ;;  %v294_v35 = vld [vmem:[%s3103_s11 + $0x80] sm:$0xff]  ;;  %v295_v36 = vld [vmem:[%s3103_s11 + $0x88] sm:$0xff] }
  0x27   : > { %v317_v37 = vpack.c.bf16 %v293_v34, %v292_v33  ;;  %v318_v38 = vpack.c.bf16 %v295_v36, %v294_v35  ;;  %v296_v39 = vld [vmem:[%s3103_s11 + $0x90] sm:$0xff]  ;;  %v297_v40 = vld [vmem:[%s3103_s11 + $0x98] sm:$0xff]  ;;  %v298_v41 = vld [vmem:[%s3103_s11 + $0xa0] sm:$0xff]  ;;  %vm1786_vm0 = vcmp.lt.s32.totalorder %v3205_v19, 7  ;;  %vm759_vm1 = vcmp.lt.s32.totalorder %v3205_v19, 1 }
  0x28   : > { %v299_v42 = vld [vmem:[%s3103_s11 + $0xa8] sm:$0xff]  ;;  %v319_v43 = vpack.c.bf16 %v297_v40, %v296_v39  ;;  %v300_v45 = vld [vmem:[%s3103_s11 + $0xb0] sm:$0xff]  ;;  %v301_v46 = vld [vmem:[%s3103_s11 + $0xb8] sm:$0xff] }
  0x29   : > { %2755 = vmatpush3.bf16.msra.mxu0 %v2965_v3  ;;  %v320_v44 = vpack.c.bf16 %v299_v42, %v298_v41  ;;  %v302_v47 = vld [vmem:[%s3103_s11 + $0xc0] sm:$0xff]  ;;  %v303_v48 = vld [vmem:[%s3103_s11 + $0xc8] sm:$0xff]  ;;  %v321_v49 = vpack.c.bf16 %v301_v46, %v300_v45  ;;  %v304_v51 = vld [vmem:[%s3103_s11 + $0xd0] sm:$0xff] }
  0x2a   : > { %2756 = vmatprep.subr.bf16.mxu0 %v2966_v7  ;;  %v322_v50 = vpack.c.bf16 %v303_v48, %v302_v47  ;;  %v305_v52 = vld [vmem:[%s3103_s11 + $0xd8] sm:$0xff]  ;;  %v306_v53 = vld [vmem:[%s3103_s11 + $0xe0] sm:$0xff]  ;;  %v307_v54 = vld [vmem:[%s3103_s11 + $0xe8] sm:$0xff] }
  0x2b   : > { %v323_v55 = vpack.c.bf16 %v305_v52, %v304_v51  ;;  %v324_v56 = vpack.c.bf16 %v307_v54, %v306_v53  ;;  %v308_v57 = vld [vmem:[%s3103_s11 + $0xf0] sm:$0xff]  ;;  %v309_v58 = vld [vmem:[%s3103_s11 + $0xf8] sm:$0xff]  ;;  %v2980_v2 = vld [vmem:[%s4007_s2 + $0x28] sm:$0xff]  }
  0x2c   : > { %v325_v59 = vpack.c.bf16 %v309_v58, %v308_v57  ;;  %v2979_v1 = vld [vmem:[%s4007_s2 + $0x30] sm:$0xff]   ;;  %v2981_v3 = vld [vmem:[%s4007_s2 + $0x20] sm:$0xff]   ;;  %v2982_v4 = vld [vmem:[%s4007_s2 + $0x18] sm:$0xff]  }
  0x2d   : > { %2757 = vmatpush3.bf16.msra.mxu0 %v2966_v7  ;;  %2798 = vmatprep.subr.bf16.mxu1 %v2979_v1  ;;  %v2983_v5 = vld [vmem:[%s4007_s2 + $0x10] sm:$0xff]   ;;  %v2984_v6 = vld [vmem:[%s4007_s2 + $0x8] sm:$0xff]   ;;  %v2985_v7 = vld [vmem:[%s4007_s2] sm:$0xff]  }
  0x2e   : > { %2758 = vmatprep.subr.bf16.mxu0 %v2967_v8  ;;  %2799 = vmatpush3.bf16.msra.mxu1 %v2979_v1  ;;  %v3199_v11 = vld [vmem:[%s4009_s4] ss:$0 sm:$0xff] }
  0x2f   : > { %2800 = vmatprep.subr.bf16.mxu1 %v2980_v2 }
  0x31   : > { %2759 = vmatpush3.bf16.msra.mxu0 %v2967_v8  ;;  %v3188_v8 = vld [vmem:[%s4007_s2 + $0xb8] sm:$0xff]  }
  0x32   : > { %2760 = vmatprep.subr.bf16.mxu0 %v2968_v9  ;;  %2801 = vmatpush3.bf16.msra.mxu1 %v2980_v2 }
  0x33   : > { %2802 = vmatprep.subr.bf16.mxu1 %v2981_v3 }
  0x35   : > { %2761 = vmatpush3.bf16.msra.mxu0 %v2968_v9  ;;  %v3194_v9 = vld [vmem:[%s4008_s3] ss:$0 sm:$0xff] }
  0x36   : > { %2762 = vmatprep.subr.bf16.mxu0 %v2969_v10  ;;  %2803 = vmatpush3.bf16.msra.mxu1 %v2981_v3 }
  0x37   : > { %2804 = vmatprep.subr.bf16.mxu1 %v2982_v4 }
  0x39   : > { %2763 = vmatpush3.bf16.msra.mxu0 %v2969_v10 }
  0x3a   : > { %2844 = vmatprep.subr.bf16.mxu0 %v2970_v15  ;;  %2805 = vmatpush3.bf16.msra.mxu1 %v2982_v4 }
  0x3b   : > { %2806 = vmatprep.subr.bf16.mxu1 %v2983_v5 }
  0x3c   : > { %2765 = vmatmul.mubr.bf16.vlgmr.msra.gmra.mxu0 %v311_v16 }
  0x3d   : > { %2768 = vmatprep.mubr.bf16.mxu0 %v312_v18  ;;  %2845 = vmatpush3.bf16.msra.mxu0 %v2970_v15 }
  0x3e   : > { %2846 = vmatprep.subr.bf16.mxu0 %v2971_v17  ;;  %2807 = vmatpush3.bf16.msra.mxu1 %v2983_v5 }
  0x3f   : > { %2808 = vmatprep.subr.bf16.mxu1 %v2984_v6 }
  0x41   : > { %2847 = vmatpush3.bf16.msra.mxu0 %v2971_v17 }
  0x42   : > { %2848 = vmatprep.subr.bf16.mxu0 %v2972_v23  ;;  %2809 = vmatpush3.bf16.msra.mxu1 %v2984_v6 }
  0x43   : > { %2810 = vmatprep.subr.bf16.mxu1 %v2985_v7 }
  0x44   : > { %2769 = vmatmul.mubr.bf16.gmra.mxu0 %v313_v24 }
  0x45   : > { %2772 = vmatprep.mubr.bf16.mxu0 %v314_v25  ;;  %2849 = vmatpush3.bf16.msra.mxu0 %v2972_v23 }
  0x46   : > { %2850 = vmatprep.subr.bf16.mxu0 %v2973_v26  ;;  %2811 = vmatpush3.bf16.msra.mxu1 %v2985_v7 }
  0x47   : > { %2892 = vmatprep.subr.bf16.mxu1 %v3188_v8 }
  0x49   : > { %2851 = vmatpush3.bf16.msra.mxu0 %v2973_v26 }
  0x4a   : > { %2852 = vmatprep.subr.bf16.mxu0 %v2974_v60 }
  0x4c   : > { %2773 = vmatmul.mubr.bf16.gmra.mxu0 %v315_v31 }
  0x4d   : > { %2776 = vmatprep.mubr.bf16.mxu0 %v316_v32  ;;  %2853 = vmatpush3.bf16.msra.mxu0 %v2974_v60 }
  0x4e   : > { %2854 = vmatprep.subr.bf16.mxu0 %v2975_v61 }
  0x51   : > { %2855 = vmatpush3.bf16.msra.mxu0 %v2975_v61 }
  0x52   : > { %2856 = vmatprep.subr.bf16.mxu0 %v2976_v62 }
  0x54   : > { %2777 = vmatmul.mubr.bf16.gmra.mxu0 %v317_v37 }
  0x55   : > { %2780 = vmatprep.mubr.bf16.mxu0 %v318_v38  ;;  %2857 = vmatpush3.bf16.msra.mxu0 %v2976_v62 }
  0x56   : > { %2858 = vmatprep.subr.bf16.mxu0 %v2977_v63 }
  0x59   : > { %2859 = vmatpush3.bf16.msra.mxu0 %v2977_v63 }
  0x5c   : > { %2781 = vmatmul.mubr.bf16.gmra.mxu0 %v319_v43 }
  0x5d   : > { %2784 = vmatprep.mubr.bf16.mxu0 %v320_v44 }
  0x64   : > { %2785 = vmatmul.mubr.bf16.gmra.mxu0 %v321_v49 }
  0x65   : > { %2788 = vmatprep.mubr.bf16.mxu0 %v322_v50 }
  0x6c   : > { %2789 = vmatmul.mubr.bf16.gmra.mxu0 %v323_v55 }
  0x6d   : > { %2792 = vmatprep.mubr.bf16.mxu0 %v324_v56 }
  0x74   : > { %2793 = vmatmul.mubr.bf16.gmra.mxu0 %v325_v59 }
  0xfc   : > { %v2766_v10 = vpop.f32.mrf.mxu0 }
  0xfd   : > { %v560_v12 = vmul.f32 %v2766_v10, %v3194_v9 }
  0xfe   : > { %v424_v13 = vpop.f32.mrf.mxu0 }
  0xff   : > { %v599_v15 = vadd.f32 %v3199_v11, %v560_v12  ;;  %v558_v16 = vmul.f32 %v3194_v9, %v424_v13 }
 0x100   : > { %v2767_v17 = vpop.f32.mrf.mxu0 }
 0x101   : > { %v561_v18 = vmul.f32 %v2767_v17, %v3194_v9  ;;  %v3207_v21 = vmax.f32 %v599_v15, 0.0  ;;  %v597_v23 = vadd.f32 %v3199_v11, %v558_v16 }
 0x102   : > { %v427_v20 = vpop.f32.mrf.mxu0 }
 0x103   : > { %v600_v22 = vadd.f32 %v3199_v11, %v561_v18  ;;  %v559_v24 = vmul.f32 %v3194_v9, %v427_v20  ;;  %v1756_v29 = vrot.slane %v3207_v21, 1  ;;  %v3218_v31 = vmax.f32 %v597_v23, 0.0 }
 0x104   : > { %v2770_v25 = vpop.f32.mrf.mxu0 }
 0x105   : > { %v3212_v26 = vmax.f32 %v600_v22, 0.0  ;;  %v598_v27 = vadd.f32 %v3199_v11, %v559_v24  ;;  %v564_v33 = vmul.f32 %v2770_v25, %v3194_v9  ;;  %v4012_v45 = vrot.slane %v3218_v31, 1 }
 0x106   : > { %v440_v28 = vpop.f32.mrf.mxu0 }
 0x107   : > { %v1757_v30 = vrot.slane %v3212_v26, 1  ;;  %v3220_v32 = vmax.f32 %v598_v27, 0.0  ;;  %v562_v34 = vmul.f32 %v3194_v9, %v440_v28  ;;  %v695_v42 = vpack.c.bf16 %v3212_v26, %v3207_v21 }
 0x108   : > { %v2771_v35 = vpop.f32.mrf.mxu0  ;;  %v603_v46 = vadd.f32 %v3199_v11, %v564_v33 }
 0x109   : > { %v3226_v36 = vsel %vm1786_vm0, %v1756_v29, %v1757_v30  ;;  %v565_v37 = vmul.f32 %v2771_v35, %v3194_v9  ;;  %v1755_v38 = vrot.slane %v3220_v32, 1  ;;  %v601_v39 = vadd.f32 %v3199_v11, %v562_v34 }
 0x10a   : > { %v443_v40 = vpop.f32.mrf.mxu0  ;;  %v694_v41 = vpack.c.bf16 %v3220_v32, %v3218_v31  ;;  %v3257_v56 = vmax.f32 %v603_v46, 0.0 }
 0x10b   : > { %v604_v43 = vadd.f32 %v3199_v11, %v565_v37  ;;  %v563_v44 = vmul.f32 %v3194_v9, %v443_v40  ;;  %v3239_v47 = vmax.f32 %v601_v39, 0.0  ;;  %v3243_v49 = vsel %vm1786_vm0, %v1755_v38, %v1756_v29 }
 0x10c   : > { %2860 = vmatprep.mubr.bf16.mxu0 %v694_v41  ;;  %v2774_v48 = vpop.f32.mrf.mxu0  ;;  %v3251_v53 = vsel %vm1786_vm0, %v4012_v45, %v1755_v38  ;;  %v1760_v5 = vrot.slane %v3257_v56, 1 }
 0x10d   : > { %v602_v50 = vadd.f32 %v3199_v11, %v563_v44  ;;  %2861 = vmatmul.mubr.bf16.vlgmr.msra.gmra.mxu0 %v695_v42  ;;  %v1758_v51 = vrot.slane %v3239_v47, 1  ;;  %v3253_v54 = vmax.f32 %v604_v43, 0.0  ;;  %v568_v61 = vmul.f32 %v2774_v48, %v3194_v9 }
 0x10e   : > { %v456_v52 = vpop.f32.mrf.mxu0  ;;  %v731_v45 = vrot.slane %v3239_v47, 7 }
 0x10f   : > { %v3255_v55 = vmax.f32 %v602_v50, 0.0  ;;  %v3261_v57 = vsel %vm1786_vm0, %v1757_v30, %v1758_v51  ;;  %v566_v58 = vmul.f32 %v3194_v9, %v456_v52  ;;  %v697_v4 = vpack.c.bf16 %v3253_v54, %v3257_v56 }
 0x110   : > { %v2775_v59 = vpop.f32.mrf.mxu0  ;;  %v607_v10 = vadd.f32 %v3199_v11, %v568_v61  ;;  %v1761_v37 = vrot.slane %v3253_v54, 1 }
 0x111   : > { %v1759_v62 = vrot.slane %v3255_v55, 1  ;;  %v605_v63 = vadd.f32 %v3199_v11, %v566_v58  ;;  %v569_v0 = vmul.f32 %v2775_v59, %v3194_v9  ;;  %v696_v2 = vpack.c.bf16 %v3255_v55, %v3239_v47 }
 0x112   : > { %v459_v1 = vpop.f32.mrf.mxu0  ;;  %v3296_v24 = vmax.f32 %v607_v10, 0.0  ;;  %v3326_v58 = vsel %vm1786_vm0, %v1760_v5, %v1761_v37 }
 0x113   : > { %v567_v3 = vmul.f32 %v3194_v9, %v459_v1  ;;  %v608_v6 = vadd.f32 %v3199_v11, %v569_v0  ;;  %2864 = vmatprep.mubr.bf16.mxu0 %v696_v2  ;;  %v3281_v14 = vmax.f32 %v605_v63, 0.0  ;;  %v3285_v16 = vsel %vm1786_vm0, %v1759_v62, %v1760_v5  ;;  %4027 = vst [vmem:[#allocation6_spill] sm:$0xff] %v3326_v58 }
 0x114   : > { %v2778_v7 = vpop.f32.mrf.mxu0  ;;  %v3293_v20 = vsel %vm1786_vm0, %v1758_v51, %v1759_v62 }
 0x115   : > { %v606_v12 = vadd.f32 %v3199_v11, %v567_v3  ;;  %2865 = vmatmul.mubr.bf16.gmra.mxu0 %v697_v4  ;;  %v3287_v17 = vmax.f32 %v608_v6, 0.0  ;;  %v572_v25 = vmul.f32 %v2778_v7, %v3194_v9  ;;  %v1762_v27 = vrot.slane %v3281_v14, 1 }
 0x116   : > { %v472_v15 = vpop.f32.mrf.mxu0 }
 0x117   : > { %v3289_v18 = vmax.f32 %v606_v12, 0.0  ;;  %v570_v22 = vmul.f32 %v3194_v9, %v472_v15  ;;  %v699_v35 = vpack.c.bf16 %v3287_v17, %v3296_v24  ;;  %v611_v41 = vadd.f32 %v3199_v11, %v572_v25 }
 0x118   : > { %v2779_v23 = vpop.f32.mrf.mxu0  ;;  %v3315_v44 = vsel %vm1786_vm0, %v1761_v37, %v1762_v27  ;;  %v1764_v25 = vrot.slane %v3296_v24, 1 }
 0x119   : > { %v573_v28 = vmul.f32 %v2779_v23, %v3194_v9  ;;  %v698_v30 = vpack.c.bf16 %v3289_v18, %v3281_v14  ;;  %v609_v38 = vadd.f32 %v3199_v11, %v570_v22  ;;  %4026 = vst [vmem:[#allocation5_spill] sm:$0xff] %v3315_v44  ;;  %v3328_v59 = vmax.f32 %v611_v41, 0.0 }
 0x11a   : > { %v475_v29 = vpop.f32.mrf.mxu0  ;;  %v1763_v12 = vrot.slane %v3289_v18, 1 }
 0x11b   : > { %v571_v34 = vmul.f32 %v3194_v9, %v475_v29  ;;  %v612_v39 = vadd.f32 %v3199_v11, %v573_v28  ;;  %2868 = vmatprep.mubr.bf16.mxu0 %v698_v30  ;;  %v3321_v50 = vmax.f32 %v609_v38, 0.0 }
 0x11c   : > { %v2782_v40 = vpop.f32.mrf.mxu0 }
 0x11d   : > { %v610_v42 = vadd.f32 %v3199_v11, %v571_v34  ;;  %2869 = vmatmul.mubr.bf16.gmra.mxu0 %v699_v35  ;;  %v3317_v46 = vmax.f32 %v612_v39, 0.0  ;;  %v576_v61 = vmul.f32 %v2782_v40, %v3194_v9  ;;  %v3362_v40 = vsel %vm1786_vm0, %v1763_v12, %v1764_v25 }
 0x11e   : > { %v488_v43 = vpop.f32.mrf.mxu0  ;;  %4028 = vst [vmem:[#allocation7_spill] sm:$0xff] %v3362_v40  ;;  %v1768_v40 = vrot.slane %v3328_v59, 1 }
 0x11f   : > { %v3319_v48 = vmax.f32 %v610_v42, 0.0  ;;  %v574_v51 = vmul.f32 %v3194_v9, %v488_v43  ;;  %v701_v2 = vpack.c.bf16 %v3317_v46, %v3328_v59  ;;  %v615_v7 = vadd.f32 %v3199_v11, %v576_v61 }
 0x120   : > { %v2783_v52 = vpop.f32.mrf.mxu0  ;;  %v3371_v61 = vsel %vm1786_vm0, %v1762_v27, %v1763_v12  ;;  %v666_v27 = vadd.s32 32, %v3205_v19 }
 0x121   : > { %v577_v62 = vmul.f32 %v2783_v52, %v3194_v9  ;;  %v700_v0 = vpack.c.bf16 %v3319_v48, %v3321_v50  ;;  %v613_v3 = vadd.f32 %v3199_v11, %v574_v51  ;;  %v3352_v34 = vmax.f32 %v615_v7, 0.0  ;;  %4029 = vst [vmem:[#allocation8_spill] sm:$0xff] %v3371_v61 }
 0x122   : > { %v491_v63 = vpop.f32.mrf.mxu0 }
 0x123   : > { %v575_v1 = vmul.f32 %v3194_v9, %v491_v63  ;;  %v616_v4 = vadd.f32 %v3199_v11, %v577_v62  ;;  %2872 = vmatprep.mubr.bf16.mxu0 %v700_v0  ;;  %v3349_v28 = vmax.f32 %v613_v3, 0.0  ;;  %v664_v3 = vadd.s32 16, %v3205_v19 }
 0x124   : > { %v2786_v5 = vpop.f32.mrf.mxu0 }
 0x125   : > { %v614_v10 = vadd.f32 %v3199_v11, %v575_v1  ;;  %2873 = vmatmul.mubr.bf16.gmra.mxu0 %v701_v2  ;;  %v3344_v22 = vmax.f32 %v616_v4, 0.0  ;;  %v580_v35 = vmul.f32 %v2786_v5, %v3194_v9 }
 0x126   : > { %v504_v15 = vpop.f32.mrf.mxu0 }
 0x127   : > { %v3346_v23 = vmax.f32 %v614_v10, 0.0  ;;  %v578_v29 = vmul.f32 %v3194_v9, %v504_v15  ;;  %v703_v42 = vpack.c.bf16 %v3344_v22, %v3352_v34  ;;  %v619_v62 = vadd.f32 %v3199_v11, %v580_v35 }
 0x128   : > { %v2787_v30 = vpop.f32.mrf.mxu0  ;;  %v730_v10 = vrot.slane %v3212_v26, 7 }
 0x129   : > { %v581_v37 = vmul.f32 %v2787_v30, %v3194_v9  ;;  %v702_v39 = vpack.c.bf16 %v3346_v23, %v3349_v28  ;;  %v617_v43 = vadd.f32 %v3199_v11, %v578_v29  ;;  %v3386_v12 = vmax.f32 %v619_v62, 0.0 }
 0x12a   : > { %v507_v38 = vpop.f32.mrf.mxu0  ;;  %v3391_v29 = vadd.s32 48, %v3205_v19  ;;  %v4013_v30 = vrot.slane %v3321_v50, 1 }
 0x12b   : > { %v579_v41 = vmul.f32 %v3194_v9, %v507_v38  ;;  %v620_v51 = vadd.f32 %v3199_v11, %v581_v37  ;;  %2876 = vmatprep.mubr.bf16.mxu0 %v702_v39  ;;  %v3380_v4 = vmax.f32 %v617_v43, 0.0  ;;  %v3398_v39 = vadd.s32 64, %v3205_v19 }
 0x12c   : > { %v2790_v52 = vpop.f32.mrf.mxu0  ;;  %v796_v43 = vand.u32 15, %v3205_v19  ;;  %v838_v33 = vand.u32 15, %v3391_v29 }
 0x12d   : > { %v618_v63 = vadd.f32 %v3199_v11, %v579_v41  ;;  %2877 = vmatmul.mubr.bf16.gmra.mxu0 %v703_v42  ;;  %v3375_v1 = vmax.f32 %v620_v51, 0.0  ;;  %v584_v15 = vmul.f32 %v2790_v52, %v3194_v9  ;;  %v810_v51 = vand.u32 15, %v664_v3 }
 0x12e   : > { %v520_v0 = vpop.f32.mrf.mxu0  ;;  %v1765_v52 = vrot.slane %v3287_v17, 1  ;;  %v729_v3 = vrot.slane %v3207_v21, 7  ;;  %v852_v13 = vand.u32 15, %v3398_v39  ;;  %v728_v21 = vrot.slane %v3220_v32, 7 }
 0x12f   : > { %v3377_v2 = vmax.f32 %v618_v63, 0.0  ;;  %v582_v5 = vmul.f32 %v3194_v9, %v520_v0  ;;  %v705_v42 = vpack.c.bf16 %v3375_v1, %v3386_v12  ;;  %v623_v6 = vadd.f32 %v3199_v11, %v584_v15 }
 0x130   : > { %v2791_v7 = vpop.f32.mrf.mxu0  ;;  %v3420_v26 = vsel %vm1786_vm0, %v1765_v52, %v4013_v30  ;;  %vm3428_vm2 = vcmp.ne.s32.totalorder %v796_v43, 0  ;;  %vm3435_vm3 = vcmp.ne.s32.totalorder %v810_v51, 0  ;;  %v3446_v32 = vsel %vm1786_vm0, %v1764_v25, %v1765_v52 }
 0x131   : > { %v585_v35 = vmul.f32 %v2791_v7, %v3194_v9  ;;  %v704_v38 = vpack.c.bf16 %v3377_v2, %v3380_v4  ;;  %v621_v62 = vadd.f32 %v3199_v11, %v582_v5  ;;  %v824_v7 = vand.u32 15, %v666_v27  ;;  %4030 = vst [vmem:[#allocation9_spill] sm:$0xff] %v3420_v26  ;;  %4035 = vst [vmem:[#allocation10_spill] sm:$0xff] %v3446_v32 }
 0x132   : > { %v523_v37 = vpop.f32.mrf.mxu0  ;;  %v3414_v5 = vadd.s32 80, %v3205_v19  ;;  %v3449_v43 = vmax.f32 %v623_v6, 0.0  ;;  %v3454_v51 = vsel %vm759_vm1, %v729_v3, %v730_v10  ;;  %v1767_v30 = vrot.slane %v3319_v48, 1  ;;  %vm2458_vm8 = vmpackc.low %vm3035_vm7, %vm3428_vm2 }
 0x133   : > { %v583_v41 = vmul.f32 %v3194_v9, %v523_v37  ;;  %v624_v63 = vadd.f32 %v3199_v11, %v585_v35  ;;  %2880 = vmatprep.mubr.bf16.mxu0 %v704_v38  ;;  %v3432_v38 = vmax.f32 %v621_v62, 0.0  ;;  %vm3456_vm4 = vcmp.ne.s32.totalorder %v824_v7, 0  ;;  %vm2462_vm9 = vmpackc.low %vm3035_vm7, %vm3435_vm3 }
 0x134   : > { %v2794_v0 = vpop.f32.mrf.mxu0  ;;  %v789_v61 = vsel %vm759_vm1, %v728_v21, %v729_v3  ;;  %vm3505_vm5 = vcmp.ne.s32.totalorder %v838_v33, 0  ;;  %vm3514_vm6 = vcmp.ne.s32.totalorder %v852_v13, 0  ;;  %v1773_v33 = vrot.slane %v3344_v22, 1  ;;  %vm3545_vm10 = vmpackc.low %vm3035_vm7, %vm3456_vm4 }
 0x135   : > { %v622_v37 = vadd.f32 %v3199_v11, %v583_v41  ;;  %2881 = vmatmul.mubr.bf16.gmra.mxu0 %v705_v42  ;;  %v3422_v27 = vmax.f32 %v624_v63, 0.0  ;;  %v727_v41 = vrot.slane %v3218_v31, 7  ;;  %v3440_v63 = vadd.s32 96, %v3205_v19  ;;  %v2987_v42 = vld [vmem:[%s4007_s2 + $0xb0] sm:$0xff]   ;;  %vm3630_vm11 = vmpackc.low %vm3035_vm7, %vm3505_vm5 }
 0x136   : > { %v536_v60 = vpop.f32.mrf.mxu0  ;;  %v588_v62 = vmul.f32 %v2794_v0, %v3194_v9  ;;  %v2463_v44 = vpack.c.bf16 %v3454_v51, %v789_v61  ;;  %v1775_v13 = vrot.slane %v3377_v2, 1  ;;  %v1778_v35 = vrot.slane %v3432_v38, 1  ;;  %vm2474_vm12 = vmpackc.low %vm3035_vm7, %vm3514_vm6 }
 0x137   : > { %v3424_v15 = vmax.f32 %v622_v37, 0.0  ;;  %v586_v29 = vmul.f32 %v3194_v9, %v536_v60  ;;  %v732_v60 = vrot.slane %v3255_v55, 7  ;;  %v707_v7 = vpack.c.bf16 %v3422_v27, %v3449_v43 }
 0x138   : > { %v2795_v39 = vpop.f32.mrf.mxu0  ;;  %v1777_v37 = vrot.slane %v3375_v1, 1 }
 0x139   : > { %v589_v25 = vmul.f32 %v2795_v39, %v3194_v9  ;;  %v706_v55 = vpack.c.bf16 %v3424_v15, %v3432_v38  ;;  %v625_v6 = vadd.f32 %v3199_v11, %v586_v29  ;;  %v627_v29 = vadd.f32 %v3199_v11, %v588_v62 }
 0x13a   : > { %v539_v52 = vpop.f32.mrf.mxu0  ;;  %v786_v3 = vsel %vm759_vm1, %v731_v45, %v732_v60 }
 0x13b   : > { %v587_v0 = vmul.f32 %v3194_v9, %v539_v52  ;;  %v628_v39 = vadd.f32 %v3199_v11, %v589_v25  ;;  %2884 = vmatprep.mubr.bf16.mxu0 %v706_v55  ;;  %v790_v52 = vsel %vm759_vm1, %v727_v41, %v728_v21  ;;  %v787_v25 = vsel %vm759_vm1, %v730_v10, %v731_v45 }
 0x13c   : > { %v3489_v55 = vsel %vm1786_vm0, %v1767_v30, %v1768_v40  ;;  %v3492_v62 = vmax.f32 %v625_v6, 0.0  ;;  %v4039_v21 = vrot.slane %v3321_v50, 1  ;;  %v1769_v45 = vrot.slane %v3317_v46, 1 }
 0x13d   : > { %v626_v9 = vadd.f32 %v3199_v11, %v587_v0  ;;  %2885 = vmatmul.mubr.bf16.gmra.mxu0 %v707_v7  ;;  %v3482_v47 = vmax.f32 %v628_v39, 0.0  ;;  %4038 = vst [vmem:[#allocation11_spill] sm:$0xff] %v3489_v55  ;;  %v1770_v11 = vrot.slane %v3349_v28, 1  ;;  %v2467_v51 = vpack.c.bf16 %v786_v3, %v787_v25 }
 0x13e   : > { %v3500_v7 = vsel %vm1786_vm0, %v4039_v21, %v1767_v30  ;;  %v1771_v6 = vrot.slane %v3346_v23, 1  ;;  %v1772_v3 = vrot.slane %v3352_v34, 1  ;;  %v1774_v25 = vrot.slane %v3380_v4, 1 }
 0x13f   : > { %v3494_v0 = vmax.f32 %v626_v9, 0.0  ;;  %4040 = vst [vmem:[#allocation12_spill] sm:$0xff] %v3500_v7  ;;  %v4019_v10 = vrot.slane %v3482_v47, 7  ;;  %v3510_v9 = vmax.f32 %v627_v29, 0.0  ;;  %v3538_v7 = vsel %vm1786_vm0, %v1769_v45, %v1770_v11 }
 0x140   : > { %v3565_v32 = vsel %vm1786_vm0, %v1771_v6, %v1772_v3  ;;  %v3569_v26 = vsel %vm1786_vm0, %v1770_v11, %v1771_v6  ;;  %v1780_v11 = vrot.slane %v3449_v43, 1  ;;  %v1782_v6 = vrot.slane %v3492_v62, 1 }
 0x141   : > { %v708_v58 = vpack.c.bf16 %v3494_v0, %v3492_v62  ;;  %v791_v29 = vsel %vm759_vm1, %v4019_v10, %v727_v41  ;;  %v709_v61 = vpack.c.bf16 %v3482_v47, %v3510_v9  ;;  %v1776_v41 = vrot.slane %v3386_v12, 1 }
 0x142   : > { %v2459_v21 = vpack.c.bf16 %v790_v52, %v791_v29  ;;  %v4047_v52 = vrot.slane %v3257_v56, 7  ;;  %v3558_v10 = vsel %vm1786_vm0, %v1768_v40, %v1769_v45  ;;  %v3580_v45 = vsel %vm1786_vm0, %v1772_v3, %v1773_v33 }
 0x143   : > { %2888 = vmatprep.mubr.bf16.mxu0 %v708_v58  ;;  %4049 = vst [vmem:[#allocation14_spill] sm:$0xff] %v3580_v45  ;;  %v1781_v3 = vrot.slane %v3422_v27, 1  ;;  %v4050_v40 = vrot.slane %v3253_v54, 7  ;;  %v866_v45 = vand.u32 15, %v3414_v5  ;;  %v1784_v58 = vrot.slane %v3510_v9, 1 }
 0x144   : > { %v785_v29 = vsel %vm759_vm1, %v732_v60, %v4047_v52  ;;  %2812 = vmatprep.mubr.msk.bf16.mxu1 %vm2458_vm8, %v2459_v21  ;;  %v736_v60 = vrot.slane %v3289_v18, 7  ;;  %v735_v21 = vrot.slane %v3281_v14, 7  ;;  %v1779_v52 = vrot.slane %v3424_v15, 1  ;;  %v2988_v14 = vld [vmem:[%s4007_s2 + $0xa8] sm:$0xff]  }
 0x145   : > { %2889 = vmatmul.mubr.bf16.gmra.mxu0 %v709_v61  ;;  %2813 = vmatmul.mubr.msk.bf16.vlgmr.msra.gmra.mxu1 %vm2462_vm9, %v2463_v44  ;;  %v3576_v61 = vsel %vm1786_vm0, %v1773_v33, %v1774_v25  ;;  %v3591_v44 = vsel %vm1786_vm0, %v1775_v13, %v1776_v41  ;;  %v1783_v33 = vrot.slane %v3494_v0, 1  ;;  %v3612_v18 = vsel %vm1786_vm0, %v1776_v41, %v1777_v37 }
 0x146   : > { %4048 = vst [vmem:[#allocation13_spill] sm:$0xff] %v3576_v61  ;;  %2893 = vmatpush3.bf16.msra.mxu1 %v3188_v8  ;;  %2816 = vmatprep.mubr.msk.bf16.mxu1 %vm3545_vm10, %v2467_v51  ;;  %v3600_v8 = vsel %vm1786_vm0, %v1774_v25, %v1775_v13  ;;  %v3604_v51 = vsel %vm1786_vm0, %v1777_v37, %v1778_v35  ;;  %v4051_v25 = vrot.slane %v3257_v56, 7  ;;  %v1785_v41 = vrot.slane %v3482_v47, 1 }
 0x147   : > { %2894 = vmatprep.subr.bf16.mxu1 %v2987_v42  ;;  %v782_v55 = vsel %vm759_vm1, %v735_v21, %v736_v60  ;;  %v3636_v37 = vsel %vm1786_vm0, %v1779_v52, %v1780_v11  ;;  %v3640_v5 = vsel %vm1786_vm0, %v1778_v35, %v1779_v52  ;;  %v3656_v35 = vsel %vm1786_vm0, %v1781_v3, %v1782_v6 }
 0x148   : > { %v784_v13 = vsel %vm759_vm1, %v4051_v25, %v4050_v40  ;;  %v4054_v25 = vrot.slane %v3253_v54, 7  ;;  %v2603_v61 = vpack.c.bf16 %v3636_v37, %v3640_v5  ;;  %v3661_v30 = vsel %vm1786_vm0, %v1780_v11, %v1781_v3 }
 0x149   : > { %v2471_v40 = vpack.c.bf16 %v784_v13, %v785_v29  ;;  %v880_v29 = vand.u32 15, %v3440_v63  ;;  %v740_v52 = vrot.slane %v3319_v48, 7  ;;  %v2607_v13 = vpack.c.bf16 %v3656_v35, %v3661_v30 }
 0x14a   : > { %2895 = vmatpush3.bf16.msra.mxu1 %v2987_v42  ;;  %v783_v39 = vsel %vm759_vm1, %v4054_v25, %v735_v21  ;;  %v2989_v42 = vld [vmem:[%s4007_s2 + $0xa0] sm:$0xff]   ;;  %v3665_v21 = vsel %vm1786_vm0, %v1783_v33, %v1784_v58  ;;  %v737_v63 = vrot.slane %v3296_v24, 7  ;;  %v738_v11 = vrot.slane %v3287_v17, 7  ;;  %v2990_v24 = vld [vmem:[%s4007_s2 + $0x98] sm:$0xff]   ;;  %v2991_v25 = vld [vmem:[%s4007_s2 + $0x90] sm:$0xff]  }
 0x14b   : > { %2896 = vmatprep.subr.bf16.mxu1 %v2988_v14  ;;  %v2475_v54 = vpack.c.bf16 %v782_v55, %v783_v39  ;;  %v3674_v55 = vsel %vm1786_vm0, %v1782_v6, %v1783_v33  ;;  %v3682_v48 = vsel %vm1786_vm0, %v1784_v58, %v1785_v41  ;;  %v739_v56 = vrot.slane %v3321_v50, 7 }
 0x14c   : > { %v2611_v3 = vpack.c.bf16 %v3665_v21, %v3674_v55  ;;  %vm2625_vm13 = vcmp.ne.s32.totalorder %v866_v45, 0  ;;  %v676_v6 = vadd.s32 112, %v3205_v19  ;;  %v4055_v17 = vrot.slane %v3218_v31, 1 }
 0x14d   : > { %2817 = vmatmul.mubr.msk.bf16.gmra.mxu1 %vm3630_vm11, %v2471_v40  ;;  %v781_v33 = vsel %vm759_vm1, %v736_v60, %v737_v63  ;;  %vm2626_vm14 = vcmp.ne.s32.totalorder %v880_v29, 0  ;;  %v678_v50 = vadd.s32 128, %v3205_v19  ;;  %v778_v58 = vsel %vm759_vm1, %v739_v56, %v740_v52  ;;  %vm2478_vm15 = vmpackc.low %vm3035_vm7, %vm2625_vm13 }
 0x14e   : > { %2820 = vmatprep.mubr.msk.bf16.mxu1 %vm2474_vm12, %v2475_v54  ;;  %2897 = vmatpush3.bf16.msra.mxu1 %v2988_v14  ;;  %v3693_v14 = vsel %vm1786_vm0, %v1785_v41, %v4055_v17  ;;  %v780_v40 = vsel %vm759_vm1, %v737_v63, %v738_v11  ;;  %v779_v41 = vsel %vm759_vm1, %v738_v11, %v739_v56  ;;  %vm2482_vm0 = vmpackc.low %vm3035_vm7, %vm2626_vm14  ;;  %v894_v60 = vand.u32 15, %v676_v6  ;;  %v2992_v6 = vld [vmem:[%s4007_s2 + $0x88] sm:$0xff]  }
 0x14f   : > { %2898 = vmatprep.subr.bf16.mxu1 %v2989_v42  ;;  %v2615_v45 = vpack.c.bf16 %v3693_v14, %v3682_v48  ;;  %v2479_v31 = vpack.c.bf16 %v780_v40, %v781_v33  ;;  %v2483_v39 = vpack.c.bf16 %v778_v58, %v779_v41  ;;  %v908_v54 = vand.u32 15, %v678_v50 }
 0x150   : > { %v744_v29 = vrot.slane %v3346_v23, 7  ;;  %v741_v63 = vrot.slane %v3328_v59, 7  ;;  %v743_v11 = vrot.slane %v3349_v28, 7  ;;  %vm2627_vm2 = vcmp.ne.s32.totalorder %v894_v60, 0 }
 0x151   : > { %v680_v56 = vadd.s32 144, %v3205_v19  ;;  %vm2628_vm3 = vcmp.ne.s32.totalorder %v908_v54, 0  ;;  %v682_v59 = vadd.s32 160, %v3205_v19  ;;  %vm2486_vm4 = vmpackc.low %vm3035_vm7, %vm2627_vm2  ;;  %v748_v40 = vrot.slane %v3377_v2, 7 }
 0x152   : > { %2899 = vmatpush3.bf16.msra.mxu1 %v2989_v42  ;;  %v742_v42 = vrot.slane %v3317_v46, 7  ;;  %v777_v23 = vsel %vm759_vm1, %v740_v52, %v741_v63  ;;  %v774_v46 = vsel %vm759_vm1, %v743_v11, %v744_v29  ;;  %vm2490_vm5 = vmpackc.low %vm3035_vm7, %vm2628_vm3  ;;  %v2993_v52 = vld [vmem:[%s4007_s2 + $0x80] sm:$0xff]   ;;  %v746_v41 = vrot.slane %v3344_v22, 7 }
 0x153   : > { %2900 = vmatprep.subr.bf16.mxu1 %v2990_v24  ;;  %v922_v33 = vand.u32 15, %v680_v56  ;;  %v936_v58 = vand.u32 15, %v682_v59  ;;  %v747_v60 = vrot.slane %v3380_v4, 7  ;;  %v686_v54 = vadd.s32 192, %v3205_v19 }
 0x154   : > { %v776_v28 = vsel %vm759_vm1, %v741_v63, %v742_v42  ;;  %v775_v17 = vsel %vm759_vm1, %v742_v42, %v743_v11  ;;  %v752_v11 = vrot.slane %v3424_v15, 7  ;;  %v749_v56 = vrot.slane %v3386_v12, 7 }
 0x155   : > { %2821 = vmatmul.mubr.msk.bf16.gmra.mxu1 %vm2478_vm15, %v2479_v31  ;;  %v2491_v50 = vpack.c.bf16 %v774_v46, %v775_v17  ;;  %v745_v31 = vrot.slane %v3352_v34, 7  ;;  %vm2629_vm6 = vcmp.ne.s32.totalorder %v922_v33, 0  ;;  %vm2630_vm8 = vcmp.ne.s32.totalorder %v936_v58, 0 }
 0x156   : > { %2824 = vmatprep.mubr.msk.bf16.mxu1 %vm2482_vm0, %v2483_v39  ;;  %2901 = vmatpush3.bf16.msra.mxu1 %v2990_v24  ;;  %v2487_v24 = vpack.c.bf16 %v776_v28, %v777_v23  ;;  %v770_v2 = vsel %vm759_vm1, %v747_v60, %v748_v40  ;;  %vm2494_vm9 = vmpackc.low %vm3035_vm7, %vm2629_vm6  ;;  %v771_v4 = vsel %vm759_vm1, %v746_v41, %v747_v60  ;;  %v964_v42 = vand.u32 15, %v686_v54 }
 0x157   : > { %2902 = vmatprep.subr.bf16.mxu1 %v2991_v25  ;;  %v773_v39 = vsel %vm759_vm1, %v744_v29, %v745_v31  ;;  %v772_v22 = vsel %vm759_vm1, %v745_v31, %v746_v41  ;;  %vm2498_vm10 = vmpackc.low %vm3035_vm7, %vm2630_vm8  ;;  %v2499_v29 = vpack.c.bf16 %v770_v2, %v771_v4  ;;  %v751_v23 = vrot.slane %v3432_v38, 7 }
 0x158   : > { %v2495_v34 = vpack.c.bf16 %v772_v22, %v773_v39  ;;  %v688_v59 = vadd.s32 208, %v3205_v19  ;;  %v769_v46 = vsel %vm759_vm1, %v748_v40, %v749_v56  ;;  %vm2632_vm12 = vcmp.ne.s32.totalorder %v964_v42, 0 }
 0x159   : > { %v690_v28 = vadd.s32 224, %v3205_v19  ;;  %v766_v15 = vsel %vm759_vm1, %v751_v23, %v752_v11  ;;  %vm2506_vm14 = vmpackc.low %vm3035_vm7, %vm2632_vm12  ;;  %v754_v58 = vrot.slane %v3422_v27, 7  ;;  %v755_v40 = vrot.slane %v3492_v62, 7 }
 0x15a   : > { %2903 = vmatpush3.bf16.msra.mxu1 %v2991_v25  ;;  %v684_v25 = vadd.s32 176, %v3205_v19  ;;  %v692_v31 = vadd.s32 240, %v3205_v19  ;;  %v663_v60 = vadd.s32 8, %v3205_v19  ;;  %v757_v2 = vrot.slane %v3510_v9, 7 }
 0x15b   : > { %2904 = vmatprep.subr.bf16.mxu1 %v2992_v6  ;;  %v992_v33 = vand.u32 15, %v690_v28  ;;  %v763_v62 = vsel %vm759_vm1, %v754_v58, %v755_v40  ;;  %v665_v22 = vadd.s32 24, %v3205_v19  ;;  %v667_v4 = vadd.s32 40, %v3205_v19 }
 0x15c   : > { %v950_v63 = vand.u32 15, %v684_v25  ;;  %v1006_v25 = vand.u32 15, %v692_v31  ;;  %v803_v54 = vand.u32 15, %v663_v60  ;;  %v675_v28 = vadd.s32 104, %v3205_v19  ;;  %v4069_v31 = vld [vmem:[#allocation11_spill] sm:$0xff] }
 0x15d   : > { %2825 = vmatmul.mubr.msk.bf16.gmra.mxu1 %vm2486_vm4, %v2487_v24  ;;  %v978_v24 = vand.u32 15, %v688_v59  ;;  %vm2634_vm0 = vcmp.ne.s32.totalorder %v992_v33, 0  ;;  %v817_v9 = vand.u32 15, %v665_v22 }
 0x15e   : > { %2828 = vmatprep.mubr.msk.bf16.mxu1 %vm2490_vm5, %v2491_v50  ;;  %2905 = vmatpush3.bf16.msra.mxu1 %v2992_v6  ;;  %v750_v6 = vrot.slane %v3375_v1, 7  ;;  %vm2631_vm11 = vcmp.ne.s32.totalorder %v950_v63, 0  ;;  %v753_v50 = vrot.slane %v3449_v43, 7  ;;  %vm2514_vm3 = vmpackc.low %vm3035_vm7, %vm2634_vm0  ;;  %vm2635_vm4 = vcmp.ne.s32.totalorder %v1006_v25, 0 }
 0x15f   : > { %2906 = vmatprep.subr.bf16.mxu1 %v2993_v52  ;;  %vm2502_vm13 = vmpackc.low %vm3035_vm7, %vm2631_vm11  ;;  %vm2633_vm15 = vcmp.ne.s32.totalorder %v978_v24, 0  ;;  %vm2636_vm5 = vcmp.ne.s32.totalorder %v803_v54, 15  ;;  %v4056_v63 = vrot.slane %v3482_v47, 7  ;;  %v671_v47 = vadd.s32 72, %v3205_v19  ;;  %v4064_v24 = vld [vmem:[#allocation8_spill] sm:$0xff] }
 0x160   : > { %v768_v12 = vsel %vm759_vm1, %v749_v56, %v750_v6  ;;  %v767_v38 = vsel %vm759_vm1, %v750_v6, %v751_v23  ;;  %v765_v41 = vsel %vm759_vm1, %v752_v11, %v753_v50  ;;  %v764_v43 = vsel %vm759_vm1, %v753_v50, %v754_v58  ;;  %vm2510_vm2 = vmpackc.low %vm3035_vm7, %vm2633_vm15  ;;  %v4066_v50 = vld [vmem:[#allocation9_spill] sm:$0xff]  ;;  %v4067_v58 = vld [vmem:[#allocation10_spill] sm:$0xff] }
 0x161   : > { %v2503_v1 = vpack.c.bf16 %v768_v12, %v769_v46  ;;  %v2507_v17 = vpack.c.bf16 %v766_v15, %v767_v38  ;;  %v2511_v27 = vpack.c.bf16 %v764_v43, %v765_v41  ;;  %vm2518_vm6 = vmpackc.low %vm3035_vm7, %vm2635_vm4  ;;  %v831_v11 = vand.u32 15, %v667_v4  ;;  %v4061_v38 = vld [vmem:[#allocation6_spill] sm:$0xff]  ;;  %v4070_v41 = vld [vmem:[#allocation12_spill] sm:$0xff] }
 0x162   : > { %2907 = vmatpush3.bf16.msra.mxu1 %v2993_v52  ;;  %v756_v52 = vrot.slane %v3494_v0, 7  ;;  %vm2554_vm8 = vmpackc.low %vm2636_vm5, %vm3035_vm7  ;;  %v4057_v56 = vpack.c.bf16 %v3243_v49, %v3251_v53  ;;  %v669_v6 = vadd.s32 56, %v3205_v19  ;;  %v859_v59 = vand.u32 15, %v671_v47  ;;  %v4074_v4 = vld [vmem:[#allocation13_spill] sm:$0xff] }
 0x163   : > { %v4058_v46 = vpack.c.bf16 %v3261_v57, %v3226_v36  ;;  %v4059_v49 = vpack.c.bf16 %v3285_v16, %v3293_v20  ;;  %v673_v53 = vadd.s32 88, %v3205_v19  ;;  %v887_v12 = vand.u32 15, %v675_v28  ;;  %v4063_v57 = vld [vmem:[#allocation7_spill] sm:$0xff] }
 0x164   : > { %v762_v0 = vsel %vm759_vm1, %v755_v40, %v756_v52  ;;  %v845_v23 = vand.u32 15, %v669_v6  ;;  %v4065_v16 = vpack.c.bf16 %v4063_v57, %v4064_v24  ;;  %v677_v20 = vadd.s32 120, %v3205_v19 }
 0x165   : > { %2829 = vmatmul.mubr.msk.bf16.gmra.mxu1 %vm2494_vm9, %v2495_v34  ;;  %v2515_v39 = vpack.c.bf16 %v762_v0, %v763_v62  ;;  %v761_v34 = vsel %vm759_vm1, %v756_v52, %v757_v2  ;;  %vm2637_vm9 = vcmp.ne.s32.totalorder %v817_v9, 15  ;;  %v873_v15 = vand.u32 15, %v673_v53 }
 0x166   : > { %2832 = vmatprep.mubr.msk.bf16.mxu1 %vm2498_vm10, %v2499_v29  ;;  %v760_v29 = vsel %vm759_vm1, %v757_v2, %v4056_v63  ;;  %vm2638_vm10 = vcmp.ne.s32.totalorder %v831_v11, 15  ;;  %vm2558_vm1 = vmpackc.low %vm2637_vm9, %vm3035_vm7  ;;  %vm2639_vm12 = vcmp.ne.s32.totalorder %v845_v23, 15  ;;  %v901_v33 = vand.u32 15, %v677_v20  ;;  %v4075_v63 = vld [vmem:[#allocation14_spill] sm:$0xff] }
 0x167   : > { %v2519_v42 = vpack.c.bf16 %v760_v29, %v761_v34  ;;  %vm2562_vm11 = vmpackc.low %vm2638_vm10, %vm3035_vm7  ;;  %vm2641_vm0 = vcmp.ne.s32.totalorder %v873_v15, 15  ;;  %v4068_v40 = vpack.c.bf16 %v4066_v50, %v4067_v58  ;;  %v4071_v60 = vpack.c.bf16 %v4069_v31, %v4070_v41 }
 0x168   : > { %vm2643_vm5 = vcmp.ne.s32.totalorder %v901_v33, 15  ;;  %v681_v0 = vadd.s32 152, %v3205_v19  ;;  %v683_v43 = vadd.s32 168, %v3205_v19  ;;  %v4072_v25 = vpack.c.bf16 %v3538_v7, %v3558_v10 }
 0x169   : > { %v685_v54 = vadd.s32 184, %v3205_v19  ;;  %v687_v2 = vadd.s32 200, %v3205_v19  ;;  %v4076_v7 = vpack.c.bf16 %v4074_v4, %v4075_v63  ;;  %v691_v10 = vadd.s32 232, %v3205_v19 }
 0x16a   : > { %v943_v62 = vand.u32 15, %v683_v43  ;;  %v4078_v9 = vpack.c.bf16 %v3604_v51, %v3612_v18 }
 0x16b   : > { %v957_v22 = vand.u32 15, %v685_v54  ;;  %v971_v34 = vand.u32 15, %v687_v2 }
 0x16d   : > { %2833 = vmatmul.mubr.msk.bf16.gmra.mxu1 %vm2502_vm13, %v2503_v1  ;;  %vm2640_vm13 = vcmp.ne.s32.totalorder %v859_v59, 15  ;;  %v4060_v1 = vld [vmem:[#allocation5_spill] sm:$0xff] }
 0x16e   : > { %2836 = vmatprep.mubr.msk.bf16.mxu1 %vm2506_vm14, %v2507_v17  ;;  %vm2566_vm14 = vmpackc.low %vm2639_vm12, %vm3035_vm7  ;;  %v4062_v36 = vpack.c.bf16 %v4060_v1, %v4061_v38  ;;  %v679_v17 = vadd.s32 136, %v3205_v19 }
 0x16f   : > { %vm2570_vm15 = vmpackc.low %vm2640_vm13, %vm3035_vm7  ;;  %vm2647_vm13 = vcmp.ne.s32.totalorder %v957_v22, 15 }
 0x170   : > { %v915_v52 = vand.u32 15, %v679_v17 }
 0x175   : > { %2837 = vmatmul.mubr.msk.bf16.gmra.mxu1 %vm2510_vm2, %v2511_v27  ;;  %vm2642_vm2 = vcmp.ne.s32.totalorder %v887_v12, 15  ;;  %v929_v27 = vand.u32 15, %v681_v0 }
 0x176   : > { %2840 = vmatprep.mubr.msk.bf16.mxu1 %vm2514_vm3, %v2515_v39  ;;  %vm2574_vm3 = vmpackc.low %vm2641_vm0, %vm3035_vm7  ;;  %v4073_v39 = vpack.c.bf16 %v3565_v32, %v3569_v26  ;;  %v4077_v26 = vpack.c.bf16 %v3591_v44, %v3600_v8  ;;  %v689_v32 = vadd.s32 216, %v3205_v19  ;;  %v693_v44 = vadd.s32 248, %v3205_v19 }
 0x177   : > { %vm2578_vm4 = vmpackc.low %vm2642_vm2, %vm3035_vm7  ;;  %vm2645_vm10 = vcmp.ne.s32.totalorder %v929_v27, 15 }
 0x178   : > { %v985_v29 = vand.u32 15, %v689_v32  ;;  %v1013_v8 = vand.u32 15, %v693_v44 }
 0x17a   : > { %vm2649_vm2 = vcmp.ne.s32.totalorder %v985_v29, 15 }
 0x17d   : > { %2841 = vmatmul.mubr.msk.bf16.gmra.mxu1 %vm2518_vm6, %v2519_v42  ;;  %vm2644_vm6 = vcmp.ne.s32.totalorder %v915_v52, 15  ;;  %v999_v42 = vand.u32 15, %v691_v10 }
 0x17e   : > { %2908 = vmatprep.mubr.msk.bf16.mxu1 %vm2554_vm8, %v4057_v56  ;;  %vm2582_vm8 = vmpackc.low %vm2643_vm5, %vm3035_vm7 }
 0x17f   : > { %vm2586_vm9 = vmpackc.low %vm2644_vm6, %vm3035_vm7  ;;  %vm2651_vm6 = vcmp.ne.s32.totalorder %v1013_v8, 15 }
 0x185   : > { %2909 = vmatmul.mubr.msk.bf16.vlgmr.msra.gmra.mxu1 %vm2558_vm1, %v4058_v46  ;;  %vm2646_vm1 = vcmp.ne.s32.totalorder %v943_v62, 15 }
 0x186   : > { %2912 = vmatprep.mubr.msk.bf16.mxu1 %vm2562_vm11, %v4059_v49  ;;  %vm2590_vm11 = vmpackc.low %vm2645_vm10, %vm3035_vm7 }
 0x187   : > { %vm2594_vm12 = vmpackc.low %vm2646_vm1, %vm3035_vm7 }
 0x18d   : > { %2913 = vmatmul.mubr.msk.bf16.gmra.mxu1 %vm2566_vm14, %v4062_v36  ;;  %vm2648_vm14 = vcmp.ne.s32.totalorder %v971_v34, 15 }
 0x18e   : > { %2916 = vmatprep.mubr.msk.bf16.mxu1 %vm2570_vm15, %v4065_v16  ;;  %vm2598_vm15 = vmpackc.low %vm2647_vm13, %vm3035_vm7 }
 0x18f   : > { %vm2602_vm0 = vmpackc.low %vm2648_vm14, %vm3035_vm7 }
 0x195   : > { %2917 = vmatmul.mubr.msk.bf16.gmra.mxu1 %vm2574_vm3, %v4068_v40  ;;  %vm2650_vm3 = vcmp.ne.s32.totalorder %v999_v42, 15 }
 0x196   : > { %2920 = vmatprep.mubr.msk.bf16.mxu1 %vm2578_vm4, %v4071_v60  ;;  %vm2606_vm4 = vmpackc.low %vm2649_vm2, %vm3035_vm7 }
 0x197   : > { %vm2610_vm5 = vmpackc.low %vm2650_vm3, %vm3035_vm7 }
 0x19d   : > { %2921 = vmatmul.mubr.msk.bf16.gmra.mxu1 %vm2582_vm8, %v4072_v25  ;;  %vm2614_vm8 = vmpackc.low %vm2651_vm6, %vm3035_vm7 }
 0x19e   : > { %2924 = vmatprep.mubr.msk.bf16.mxu1 %vm2586_vm9, %v4073_v39 }
 0x1a5   : > { %2925 = vmatmul.mubr.msk.bf16.gmra.mxu1 %vm2590_vm11, %v4076_v7 }
 0x1a6   : > { %2928 = vmatprep.mubr.msk.bf16.mxu1 %vm2594_vm12, %v4077_v26 }
 0x1ad   : > { %2929 = vmatmul.mubr.msk.bf16.gmra.mxu1 %vm2598_vm15, %v4078_v9 }
 0x1ae   : > { %2932 = vmatprep.mubr.msk.bf16.mxu1 %vm2602_vm0, %v2603_v61 }
 0x1b5   : > { %2933 = vmatmul.mubr.msk.bf16.gmra.mxu1 %vm2606_vm4, %v2607_v13 }
 0x1b6   : > { %2936 = vmatprep.mubr.msk.bf16.mxu1 %vm2610_vm5, %v2611_v3 }
 0x1bd   : > { %2937 = vmatmul.mubr.msk.bf16.gmra.mxu1 %vm2614_vm8, %v2615_v45 }
 0x1cd   : > { %v2862_v19 = vpop.f32.mrf.mxu0 }
 0x1cf   : > { %v1627_v51 = vpop.f32.mrf.mxu0 }
 0x1d1   : > { %v2863_v11 = vpop.f32.mrf.mxu0 }
 0x1d3   : > { %v1630_v13 = vpop.f32.mrf.mxu0 }
 0x1d5   : > { %v2866_v3 = vpop.f32.mrf.mxu0 }
 0x1d7   : > { %v1643_v14 = vpop.f32.mrf.mxu0 }
 0x1d9   : > { %v2867_v47 = vpop.f32.mrf.mxu0 }
 0x1db   : > { %v1646_v46 = vpop.f32.mrf.mxu0 }
 0x1dd   : > { %v3890_v28 = vpop.f32.mrf.mxu0 }
 0x1df   : > { %v1659_v1 = vpop.f32.mrf.mxu0 }
 0x1e1   : > { %v3900_v57 = vpop.f32.mrf.mxu0 }
 0x1e3   : > { %v3906_v20 = vpop.f32.mrf.mxu0 }
 0x1e5   : > { %v3912_v52 = vpop.f32.mrf.mxu0 }
 0x1e7   : > { %v3918_v40 = vpop.f32.mrf.mxu0 }
 0x1e9   : > { %v3924_v60 = vpop.f32.mrf.mxu0 }
 0x1eb   : > { %v3930_v27 = vpop.f32.mrf.mxu0 }
 0x1ed   : > { %v3936_v39 = vpop.f32.mrf.mxu0 }
 0x1ef   : > { %v3938_v34 = vpop.f32.mrf.mxu0 }
 0x1f1   : > { %v3940_v9 = vpop.f32.mrf.mxu0 }
 0x205   : > { %v2814_v61 = vpop.f32.mrf.mxu1 }
 0x206   : > { %v1636_v63 = vadd.f32 %v2862_v19, %v2814_v61  ;;  %v3942_v19 = vpop.f32.mrf.mxu0 }
 0x207   : > { %v1418_v18 = vpop.f32.mrf.mxu1 }
 0x208   : > { %v1628_v22 = vadd.f32 %v1627_v51, %v1418_v18 }
 0x209   : > { %v2815_v37 = vpop.f32.mrf.mxu1 }
 0x20a   : > { %v1639_v10 = vadd.f32 %v2863_v11, %v2815_v37 }
 0x20b   : > { %v1421_v5 = vpop.f32.mrf.mxu1 }
 0x20c   : > { %v1631_v7 = vadd.f32 %v1630_v13, %v1421_v5 }
 0x20d   : > { %v3868_v35 = vpop.f32.mrf.mxu1 }
 0x20e   : > { %v1652_v61 = vadd.f32 %v2866_v3, %v3868_v35 }
 0x20f   : > { %v1434_v30 = vpop.f32.mrf.mxu1 }
 0x210   : > { %v1644_v44 = vadd.f32 %v1643_v14, %v1434_v30 }
 0x211   : > { %v3870_v21 = vpop.f32.mrf.mxu1 }
 0x212   : > { %v1655_v14 = vadd.f32 %v2867_v47, %v3870_v21 }
 0x213   : > { %v3872_v55 = vpop.f32.mrf.mxu1 }
 0x214   : > { %v1647_v5 = vadd.f32 %v1646_v46, %v3872_v55 }
 0x215   : > { %v3874_v56 = vpop.f32.mrf.mxu1 }
 0x217   : > { %v3876_v48 = vpop.f32.mrf.mxu1 }
 0x219   : > { %v3878_v45 = vpop.f32.mrf.mxu1 }
 0x21b   : > { %v3880_v6 = vpop.f32.mrf.mxu1 }
 0x21d   : > { %v3882_v23 = vpop.f32.mrf.mxu1 }
 0x21f   : > { %v3884_v59 = vpop.f32.mrf.mxu1 }
 0x221   : > { %v3886_v49 = vpop.f32.mrf.mxu1 }
 0x223   : > { %v3888_v53 = vpop.f32.mrf.mxu1 }
 0x225   : > { %v3892_v15 = vpop.f32.mrf.mxu1 }
 0x227   : > { %v3894_v12 = vpop.f32.mrf.mxu1 }
 0x229   : > { %v3896_v38 = vpop.f32.mrf.mxu1 }
 0x22b   : > { %v3898_v36 = vpop.f32.mrf.mxu1 }
 0x22d   : > { %v3902_v24 = vpop.f32.mrf.mxu1 }
 0x22f   : > { %v3904_v16 = vpop.f32.mrf.mxu1 }
 0x231   : > { %v3908_v17 = vpop.f32.mrf.mxu1 }
 0x233   : > { %v3910_v33 = vpop.f32.mrf.mxu1 }
 0x235   : > { %v3914_v50 = vpop.f32.mrf.mxu1 }
 0x236   : > { %4079 = vst [vmem:[#allocation5_spill] sm:$0xff] %v3914_v50 }
 0x237   : > { %v3916_v58 = vpop.f32.mrf.mxu1 }
 0x239   : > { %v3920_v31 = vpop.f32.mrf.mxu1 }
 0x23a   : > { %4080 = vst [vmem:[#allocation6_spill] sm:$0xff] %v3920_v31 }
 0x23b   : > { %v3922_v41 = vpop.f32.mrf.mxu1 }
 0x23c   : > { %4081 = vst [vmem:[#allocation7_spill] sm:$0xff] %v3922_v41 }
 0x23d   : > { %v3926_v0 = vpop.f32.mrf.mxu1 }
 0x23e   : > { %4082 = vst [vmem:[#allocation8_spill] sm:$0xff] %v3926_v0 }
 0x23f   : > { %v3928_v43 = vpop.f32.mrf.mxu1 }
 0x240   : > { %4083 = vst [vmem:[#allocation9_spill] sm:$0xff] %v3928_v43 }
 0x241   : > { %v3932_v62 = vpop.f32.mrf.mxu1 }
 0x242   : > { %4084 = vst [vmem:[#allocation10_spill] sm:$0xff] %v3932_v62 }
 0x243   : > { %v3934_v25 = vpop.f32.mrf.mxu1 }
 0x244   : > { %4085 = vst [vmem:[#allocation11_spill] sm:$0xff] %v3934_v25 }
 0x245   : > { %v2910_v54 = vpop.f32.mrf.mxu1 }
 0x246   : > { %v2191_v29 = vadd.f32 %v2910_v54, %v1636_v63 }
 0x247   : > { %v2062_v2 = vpop.f32.mrf.mxu1 }
 0x248   : > { %v2189_v26 = vadd.f32 %v2062_v2, %v1628_v22  ;;  %v2261_v18 = vmul.f32 %v2191_v29, %v2191_v29 }
 0x249   : > { %v2911_v4 = vpop.f32.mrf.mxu1 }
 0x24a   : > { %v2259_v62 = vmul.f32 %v2189_v26, %v2189_v26  ;;  %v2192_v25 = vadd.f32 %v2911_v4, %v1639_v10  ;;  %v1663_v10 = vadd.f32 %v3906_v20, %v3880_v6 }
 0x24b   : > { %v2065_v32 = vpop.f32.mrf.mxu1 }
 0x24c   : > { %v2190_v42 = vadd.f32 %v2065_v32, %v1631_v7  ;;  %v2262_v11 = vmul.f32 %v2192_v25, %v2192_v25 }
 0x24d   : > { %v2914_v8 = vpop.f32.mrf.mxu1 }
 0x24e   : > { %v2221_v0 = vadd.f32 %v2190_v42, %v2189_v26  ;;  %v2260_v43 = vmul.f32 %v2190_v42, %v2190_v42  ;;  %v2195_v54 = vadd.f32 %v2914_v8, %v1652_v61  ;;  %v1671_v42 = vadd.f32 %v3900_v57, %v3878_v45 }
 0x24f   : > { %v2078_v31 = vpop.f32.mrf.mxu1 }
 0x250   : > { %v2222_v51 = vadd.f32 %v2221_v0, %v2191_v29  ;;  %v2291_v41 = vadd.f32 %v2260_v43, %v2259_v62  ;;  %v2193_v50 = vadd.f32 %v2078_v31, %v1644_v44  ;;  %v3947_v43 = vpop.f32.mrf.mxu0  ;;  %v1660_v31 = vadd.f32 %v1659_v1, %v3876_v48 }
 0x251   : > { %v2915_v37 = vpop.f32.mrf.mxu1 }
 0x252   : > { %v2292_v13 = vadd.f32 %v2291_v41, %v2261_v18  ;;  %v2223_v30 = vadd.f32 %v2222_v51, %v2192_v25  ;;  %v2263_v4 = vmul.f32 %v2193_v50, %v2193_v50  ;;  %v2196_v3 = vadd.f32 %v2915_v37, %v1655_v14  ;;  %v3950_v47 = vpop.f32.mrf.mxu0 }
 0x253   : > { %v2081_v2 = vpop.f32.mrf.mxu1  ;;  %v2265_v41 = vmul.f32 %v2195_v54, %v2195_v54 }
 0x254   : > { %v2224_v22 = vadd.f32 %v2223_v30, %v2193_v50  ;;  %v2293_v63 = vadd.f32 %v2292_v13, %v2262_v11  ;;  %v2194_v0 = vadd.f32 %v2081_v2, %v1647_v5  ;;  %v1668_v50 = vadd.f32 %v3890_v28, %v3874_v56  ;;  %v3958_v5 = vpop.f32.mrf.mxu0 }
 0x255   : > { %v2918_v62 = vpop.f32.mrf.mxu1  ;;  %v2266_v48 = vmul.f32 %v2196_v3, %v2196_v3  ;;  %v1676_v56 = vadd.f32 %v3918_v40, %v3884_v59 }
 0x256   : > { %v2294_v35 = vadd.f32 %v2293_v63, %v2263_v4  ;;  %v2225_v7 = vadd.f32 %v2224_v22, %v2194_v0  ;;  %v2264_v55 = vmul.f32 %v2194_v0, %v2194_v0  ;;  %v2199_v44 = vadd.f32 %v2918_v62, %v1668_v50  ;;  %v1710_v2 = vpop.f32.mrf.mxu0 }
 0x257   : > { %v2094_v46 = vpop.f32.mrf.mxu1  ;;  %v1684_v22 = vadd.f32 %v3912_v52, %v3882_v23  ;;  %v1679_v63 = vadd.f32 %v3930_v27, %v3888_v53  ;;  %v1692_v23 = vadd.f32 %v3938_v34, %v3894_v12 }
 0x258   : > { %v2226_v25 = vadd.f32 %v2225_v7, %v2195_v54  ;;  %v2295_v26 = vadd.f32 %v2294_v35, %v2264_v55  ;;  %v2197_v21 = vadd.f32 %v2094_v46, %v1660_v31  ;;  %v2269_v14 = vmul.f32 %v2199_v44, %v2199_v44 }
 0x259   : > { %v2919_v32 = vpop.f32.mrf.mxu1  ;;  %v1687_v31 = vadd.f32 %v3924_v60, %v3886_v49 }
 0x25a   : > { %v2296_v1 = vadd.f32 %v2295_v26, %v2265_v41  ;;  %v2227_v29 = vadd.f32 %v2226_v25, %v2196_v3  ;;  %v2267_v51 = vmul.f32 %v2197_v21, %v2197_v21  ;;  %v2200_v6 = vadd.f32 %v2919_v32, %v1671_v42  ;;  %v3968_v41 = vpop.f32.mrf.mxu0 }
 0x25b   : > { %v2097_v8 = vpop.f32.mrf.mxu1 }
 0x25c   : > { %v2228_v18 = vadd.f32 %v2227_v29, %v2197_v21  ;;  %v2297_v61 = vadd.f32 %v2296_v1, %v2266_v48  ;;  %v2198_v37 = vadd.f32 %v2097_v8, %v1663_v10  ;;  %v2270_v0 = vmul.f32 %v2200_v6, %v2200_v6  ;;  %v1723_v10 = vpop.f32.mrf.mxu0 }
 0x25d   : > { %v2922_v28 = vpop.f32.mrf.mxu1  ;;  %v1700_v48 = vadd.f32 %v3936_v39, %v3892_v15  ;;  %v1695_v29 = vadd.f32 %v3942_v19, %v3898_v36  ;;  %v1708_v15 = vadd.f32 %v3950_v47, %v3904_v16  ;;  %v1719_v47 = vadd.f32 %v3958_v5, %v3908_v17  ;;  %v4086_v5 = vld [vmem:[#allocation5_spill] sm:$0xff] }
 0x25e   : > { %v2298_v11 = vadd.f32 %v2297_v61, %v2267_v51  ;;  %v2229_v20 = vadd.f32 %v2228_v18, %v2198_v37  ;;  %v2268_v13 = vmul.f32 %v2198_v37, %v2198_v37  ;;  %v2203_v62 = vadd.f32 %v2922_v28, %v1684_v22  ;;  %v2887_v28 = vpop.f32.mrf.mxu0 }
 0x25f   : > { %v2110_v30 = vpop.f32.mrf.mxu1 }
 0x260   : > { %v2230_v54 = vadd.f32 %v2229_v20, %v2199_v44  ;;  %v2299_v45 = vadd.f32 %v2298_v11, %v2268_v13  ;;  %v2201_v57 = vadd.f32 %v2110_v30, %v1676_v56  ;;  %v2273_v50 = vmul.f32 %v2203_v62, %v2203_v62 }
 0x261   : > { %v2923_v4 = vpop.f32.mrf.mxu1  ;;  %v1703_v44 = vadd.f32 %v3940_v9, %v3896_v38  ;;  %v1726_v9 = vpop.f32.mrf.mxu0 }
 0x262   : > { %v2300_v59 = vadd.f32 %v2299_v45, %v2269_v14  ;;  %v2231_v40 = vadd.f32 %v2230_v54, %v2200_v6  ;;  %v2271_v7 = vmul.f32 %v2201_v57, %v2201_v57  ;;  %v2204_v53 = vadd.f32 %v2923_v4, %v1687_v31 }
 0x263   : > { %v2113_v35 = vpop.f32.mrf.mxu1  ;;  %v1716_v54 = vadd.f32 %v3947_v43, %v3902_v24 }
 0x264   : > { %v2232_v3 = vadd.f32 %v2231_v40, %v2201_v57  ;;  %v2301_v55 = vadd.f32 %v2300_v59, %v2270_v0  ;;  %v2202_v46 = vadd.f32 %v2113_v35, %v1679_v63  ;;  %v2274_v42 = vmul.f32 %v2204_v53, %v2204_v53  ;;  %v2890_v35 = vpop.f32.mrf.mxu0 }
 0x265   : > { %v2926_v52 = vpop.f32.mrf.mxu1  ;;  %v1711_v57 = vadd.f32 %v1710_v2, %v3910_v33 }
 0x266   : > { %v2302_v25 = vadd.f32 %v2301_v55, %v2271_v7  ;;  %v2233_v27 = vadd.f32 %v2232_v3, %v2202_v46  ;;  %v2272_v26 = vmul.f32 %v2202_v46, %v2202_v46  ;;  %v2207_v8 = vadd.f32 %v2926_v52, %v1700_v48  ;;  %v1739_v17 = vpop.f32.mrf.mxu0 }
 0x267   : > { %v2126_v21 = vpop.f32.mrf.mxu1  ;;  %v1724_v3 = vadd.f32 %v1723_v10, %v3916_v58 }
 0x268   : > { %v2234_v32 = vadd.f32 %v2233_v27, %v2203_v62  ;;  %v2303_v49 = vadd.f32 %v2302_v25, %v2272_v26  ;;  %v2205_v60 = vadd.f32 %v2126_v21, %v1692_v23  ;;  %v2277_v13 = vmul.f32 %v2207_v8, %v2207_v8  ;;  %v4087_v26 = vld [vmem:[#allocation7_spill] sm:$0xff] }
 0x269   : > { %v2927_v1 = vpop.f32.mrf.mxu1  ;;  %v1727_v21 = vadd.f32 %v1726_v9, %v4087_v26 }
 0x26a   : > { %v2304_v12 = vadd.f32 %v2303_v49, %v2273_v50  ;;  %v2235_v34 = vadd.f32 %v2234_v32, %v2204_v53  ;;  %v2275_v61 = vmul.f32 %v2205_v60, %v2205_v60  ;;  %v2208_v6 = vadd.f32 %v2927_v1, %v1703_v44  ;;  %v4088_v49 = vld [vmem:[#allocation6_spill] sm:$0xff]  ;;  %v4089_v44 = vld [vmem:[#allocation9_spill] sm:$0xff] }
 0x26b   : > { %v2129_v18 = vpop.f32.mrf.mxu1  ;;  %v1732_v53 = vadd.f32 %v3968_v41, %v4086_v5 }
 0x26c   : > { %v2236_v51 = vadd.f32 %v2235_v34, %v2205_v60  ;;  %v2305_v37 = vadd.f32 %v2304_v12, %v2274_v42  ;;  %v2206_v56 = vadd.f32 %v2129_v18, %v1695_v29  ;;  %v2278_v22 = vmul.f32 %v2208_v6, %v2208_v6  ;;  %v2891_v34 = vpop.f32.mrf.mxu0 }
 0x26d   : > { %v2930_v39 = vpop.f32.mrf.mxu1  ;;  %v1735_v60 = vadd.f32 %v2887_v28, %v4088_v49 }
 0x26e   : > { %v2306_v11 = vadd.f32 %v2305_v37, %v2275_v61  ;;  %v2237_v36 = vadd.f32 %v2236_v51, %v2206_v56  ;;  %v2276_v19 = vmul.f32 %v2206_v56, %v2206_v56  ;;  %v2211_v63 = vadd.f32 %v2930_v39, %v1716_v54  ;;  %v1742_v28 = vpop.f32.mrf.mxu0  ;;  %v4092_v54 = vld [vmem:[#allocation10_spill] sm:$0xff] }
 0x26f   : > { %v2142_v20 = vpop.f32.mrf.mxu1 }
 0x270   : > { %v2238_v30 = vadd.f32 %v2237_v36, %v2207_v8  ;;  %v2307_v14 = vadd.f32 %v2306_v11, %v2276_v19  ;;  %v2209_v38 = vadd.f32 %v2142_v20, %v1708_v15  ;;  %v2281_v46 = vmul.f32 %v2211_v63, %v2211_v63  ;;  %v4090_v36 = vld [vmem:[#allocation8_spill] sm:$0xff] }
 0x271   : > { %v2931_v45 = vpop.f32.mrf.mxu1  ;;  %v1740_v8 = vadd.f32 %v1739_v17, %v4089_v44  ;;  %v1748_v19 = vadd.f32 %v2890_v35, %v4090_v36 }
 0x272   : > { %v2308_v4 = vadd.f32 %v2307_v14, %v2277_v13  ;;  %v2239_v16 = vadd.f32 %v2238_v30, %v2208_v6  ;;  %v2279_v40 = vmul.f32 %v2209_v38, %v2209_v38  ;;  %v2212_v43 = vadd.f32 %v2931_v45, %v1719_v47  ;;  %v4091_v13 = vld [vmem:[#allocation11_spill] sm:$0xff] }
 0x273   : > { %v2145_v0 = vpop.f32.mrf.mxu1  ;;  %v1743_v30 = vadd.f32 %v1742_v28, %v4091_v13  ;;  %v1751_v45 = vadd.f32 %v2891_v34, %v4092_v54 }
 0x274   : > { %v2240_v59 = vadd.f32 %v2239_v16, %v2209_v38  ;;  %v2309_v31 = vadd.f32 %v2308_v4, %v2278_v22  ;;  %v2210_v62 = vadd.f32 %v2145_v0, %v1711_v57  ;;  %v2282_v50 = vmul.f32 %v2212_v43, %v2212_v43 }
 0x275   : > { %v2934_v7 = vpop.f32.mrf.mxu1 }
 0x276   : > { %v2310_v24 = vadd.f32 %v2309_v31, %v2279_v40  ;;  %v2241_v55 = vadd.f32 %v2240_v59, %v2210_v62  ;;  %v2280_v33 = vmul.f32 %v2210_v62, %v2210_v62  ;;  %v2215_v10 = vadd.f32 %v2934_v7, %v1732_v53 }
 0x277   : > { %v2158_v2 = vpop.f32.mrf.mxu1 }
 0x278   : > { %v2242_v23 = vadd.f32 %v2241_v55, %v2211_v63  ;;  %v2311_v52 = vadd.f32 %v2310_v24, %v2280_v33  ;;  %v2213_v25 = vadd.f32 %v2158_v2, %v1724_v3  ;;  %v2285_v15 = vmul.f32 %v2215_v10, %v2215_v10 }
 0x279   : > { %v2935_v27 = vpop.f32.mrf.mxu1 }
 0x27a   : > { %v2312_v32 = vadd.f32 %v2311_v52, %v2281_v46  ;;  %v2243_v58 = vadd.f32 %v2242_v23, %v2212_v43  ;;  %v2283_v29 = vmul.f32 %v2213_v25, %v2213_v25  ;;  %v2216_v41 = vadd.f32 %v2935_v27, %v1735_v60 }
 0x27b   : > { %v2161_v48 = vpop.f32.mrf.mxu1 }
 0x27c   : > { %v2244_v1 = vadd.f32 %v2243_v58, %v2213_v25  ;;  %v2313_v42 = vadd.f32 %v2312_v32, %v2282_v50  ;;  %v2214_v12 = vadd.f32 %v2161_v48, %v1727_v21  ;;  %v2286_v14 = vmul.f32 %v2216_v41, %v2216_v41 }
 0x27d   : > { %v2938_v18 = vpop.f32.mrf.mxu1 }
 0x27e   : > { %v2314_v51 = vadd.f32 %v2313_v42, %v2283_v29  ;;  %v2245_v61 = vadd.f32 %v2244_v1, %v2214_v12  ;;  %v2284_v37 = vmul.f32 %v2214_v12, %v2214_v12  ;;  %v2219_v57 = vadd.f32 %v2938_v18, %v1748_v19 }
 0x27f   : > { %v2174_v56 = vpop.f32.mrf.mxu1 }
 0x280   : > { %v2246_v39 = vadd.f32 %v2245_v61, %v2215_v10  ;;  %v2315_v11 = vadd.f32 %v2314_v51, %v2284_v37  ;;  %v2217_v6 = vadd.f32 %v2174_v56, %v1740_v8  ;;  %v2289_v62 = vmul.f32 %v2219_v57, %v2219_v57 }
 0x281   : > { %v2939_v20 = vpop.f32.mrf.mxu1 }
 0x282   : > { %v2316_v38 = vadd.f32 %v2315_v11, %v2285_v15  ;;  %v2247_v9 = vadd.f32 %v2246_v39, %v2216_v41  ;;  %v2287_v16 = vmul.f32 %v2217_v6, %v2217_v6  ;;  %v2220_v59 = vadd.f32 %v2939_v20, %v1751_v45 }
 0x283   : > { %v2177_v22 = vpop.f32.mrf.mxu1 }
 0x284   : > { %v2248_v4 = vadd.f32 %v2247_v9, %v2217_v6  ;;  %v2317_v47 = vadd.f32 %v2316_v38, %v2286_v14  ;;  %v2218_v63 = vadd.f32 %v2177_v22, %v1743_v30  ;;  %v2290_v7 = vmul.f32 %v2220_v59, %v2220_v59 }
 0x286   : > { %v2318_v0 = vadd.f32 %v2317_v47, %v2287_v16  ;;  %v2249_v40 = vadd.f32 %v2248_v4, %v2218_v63  ;;  %v2288_v31 = vmul.f32 %v2218_v63, %v2218_v63 }
 0x288   : > { %v2250_v35 = vadd.f32 %v2249_v40, %v2219_v57  ;;  %v2319_v3 = vadd.f32 %v2318_v0, %v2288_v31 }
 0x28a   : > { %v2251_v24 = vadd.f32 %v2250_v35, %v2220_v59  ;;  %v2320_v43 = vadd.f32 %v2319_v3, %v2289_v62 }
 0x28c   : > { %v2252_v55 = vrot.slane %v2251_v24, 4  ;;  %v2321_v33 = vadd.f32 %v2320_v43, %v2290_v7 }
 0x28e   : > { %v2253_v2 = vadd.f32 %v2252_v55, %v2251_v24  ;;  %v2322_v46 = vrot.slane %v2321_v33, 4 }
 0x290   : > { %v2254_v23 = vrot.slane %v2253_v2, 2  ;;  %v2323_v52 = vadd.f32 %v2322_v46, %v2321_v33 }
 0x292   : > { %v2255_v25 = vadd.f32 %v2254_v23, %v2253_v2  ;;  %v2324_v17 = vrot.slane %v2323_v52, 2 }
 0x294   : > { %v2256_v5 = vrot.slane %v2255_v25, 1  ;;  %v2325_v53 = vadd.f32 %v2324_v17, %v2323_v52 }
 0x296   : > { %v2257_v27 = vadd.f32 %v2256_v5, %v2255_v25  ;;  %v2326_v26 = vrot.slane %v2325_v53, 1 }
 0x298   : > { %2258 = vst [vmem:[%s273_s24] sm:$0x1] %v2257_v27  ;;  %v2327_v21 = vadd.f32 %v2326_v26, %v2325_v53 }
 0x29a   : > { %2328 = vst [vmem:[%s276_s27] sm:$0x1] %v2327_v21 }
 0x29b PF: > { %s18_s21 = sadd.s32 1, %s3030_s21  }
 0x29c   : > { %p15_p2 = scmp.ge.s32.totalorder %s18_s21, 4  }
 0x29e   :  { %17 = sbr.rel (!%p15_p2) target bundleno = 1 (0x1), region = 89 }
 0x2a3   :  { %2358 = vsyncpa [#allocation3], 1 }
 0x2a4   :  { %2360 = vsyncpa [#allocation3 + $0x1], 1 }

// kernel: residual_block_forward.5
= control target key start
LH: loop header
LB: loop body
LE: loop exit
PB: predicated region body
PF: predicated region fallthrough
CT: control target
= control target key end

     0   :  { %13 = vsyncpa [#allocation3], 0  ;;  %s5063_s0 = inlined_call_operand.vmem [shape: f32[32,16,128], index: 0, kind: input, shape index: {}]   ;;  %s5064_s1 = inlined_call_operand.vmem [shape: bf16[128,128], index: 1, kind: input, shape index: {}]   ;;  %s5065_s2 = inlined_call_operand.vmem [shape: bf16[3,128,128], index: 2, kind: input, shape index: {}]   ;;  %s5066_s3 = inlined_call_operand.vmem [shape: bf16[128,128], index: 3, kind: input, shape index: {}]   ;;  %s5067_s4 = inlined_call_operand.vmem [shape: f32[1,128], index: 4, kind: input, shape index: {}]   ;;  %s5068_s5 = inlined_call_operand.vmem [shape: f32[1,128], index: 5, kind: input, shape index: {}]   ;;  %s5069_s6 = inlined_call_operand.vmem [shape: f32[1,128], index: 6, kind: input, shape index: {}]   ;;  %s5070_s7 = inlined_call_operand.vmem [shape: f32[1,128], index: 7, kind: input, shape index: {}]   ;;  %s5071_s8 = inlined_call_operand.hbm [shape: f32[32,16,128], index: 8, kind: output, shape index: {}]  }
   0x1   :  { %15 = vsyncpa [#allocation3 + $0x1], 0  ;;  %s3584_s27 = smov 0   ;;  %s3586_s28 = smov 0  }
   0x2   :  { %s3588_s29 = smov 0   ;;  %s3590_s30 = smov 0  }
   0x3 LB: > { %s3605_s9 = sadd.s32 4294967295, %s3533_s30   ;;  %s2746_s10 = sadd.s32 4294967294, %s3533_s30   ;;  %s3533_s30 = sphi %s3590_s30, %s5186_s30   ;;  %s3529_s29 = sphi %s3588_s29, %s5185_s29   ;;  %s3525_s28 = sphi %s3586_s28, %s5184_s28   ;;  %s3521_s27 = sphi %s3584_s27, %s5183_s27  }
   0x4   : > { %s3609_s11 = sadd.s32 1, %s3533_s30   ;;  %s201_s12 = sadd.s32 1, %s3529_s29 }
   0x5   : > { %s198_s13 = ssub.s32 %s3533_s30, %s3609_s11  ;;  %p211_p0 = scmp.ne.s32.totalorder %s3529_s29, %s3525_s28 }
   0x6   : > { %p199_p1 = scmp.eq.s32.totalorder %s198_s13, 0  ;;  %p212_p2 = scmp.eq.s32.totalorder %s3605_s9, 1 }
   0x7   : > { %p217_p3 = scmp.ne.s32.totalorder %s3525_s28, %s3521_s27  ;;  %p218_p4 = scmp.eq.s32.totalorder %s2746_s10, 1 }
   0x8   : > { %s3620_s14 = scalar_select %p199_p1, %s3529_s29, %s201_s12  }
   0x9   : > { %p3622_p5 = por %p212_p2, %p211_p0  ;;  %p3626_p6 = por %p218_p4, %p217_p3 }
   0xa   : > { %p2749_p7 = scmp.ge.s32.totalorder %s3533_s30, 1  ;;  %p267_p8 = scmp.lt.s32.totalorder %s3533_s30, 3 }
   0xc   : > { %p268_p9 = pnand %p2749_p7, %p267_p8 }
   0xe   : > { %271 = sbr.rel (%p268_p9) target bundleno = 839 (0x347), region = 52 }
  0x13   : > { %v3417_v0 = vld [vmem:[%s5064_s1 + $0x38] sm:$0xff]   ;;  %v3418_v1 = vld [vmem:[%s5064_s1 + $0x30] sm:$0xff]   ;;  %v3419_v2 = vld [vmem:[%s5064_s1 + $0x28] sm:$0xff]   ;;  %s2751_s23 = sshll.u32 %s3605_s9, 4  ;;  %v694_v61 = vlaneseq  ;;  %vm3535_vm7 = vmmov 1   ;;  %s2966_s12 = sshll.u32 %s3605_s9, 12 }
  0x14   : > { %3119 = vmatprep.subr.bf16.mxu0 %v3417_v0  ;;  %3359 = vmatprep.subr.bf16.mxu1 %v3417_v0  ;;  %v3420_v3 = vld [vmem:[%s5064_s1 + $0x20] sm:$0xff]   ;;  %p303_p10 = scmp.lt.s32.totalorder %s2751_s23, 31  ;;  %v3421_v4 = vld [vmem:[%s5064_s1 + $0x18] sm:$0xff]   ;;  %v3422_v5 = vld [vmem:[%s5064_s1 + $0x10] sm:$0xff]   ;;  %s5015_s19 = scalar_lea.hbm %s5071_s8, %s2966_s12 }
  0x15   : > { %3120 = vmatpush3.bf16.msra.mxu0 %v3417_v0  ;;  %3367 = vmatpush3.bf16.msra.mxu1 %v3417_v0  ;;  %v3423_v6 = vld [vmem:[%s5064_s1 + $0x8] sm:$0xff]   ;;  %v3424_v7 = vld [vmem:[%s5064_s1] sm:$0xff]   ;;  %v3425_v12 = vld [vmem:[%s5065_s2 + $0x78] sm:$0xff]   ;;  %s3536_s20 = smov [#allocation2]  }
  0x16   : > { %3121 = vmatprep.subr.bf16.mxu0 %v3418_v1  ;;  %3360 = vmatprep.subr.bf16.mxu1 %v3418_v1  ;;  %s5188_s23 = smov (!%p303_p10, %s2751_s23), 31  ;;  %v3426_v15 = vld [vmem:[%s5065_s2 + $0x70] sm:$0xff]   ;;  %v3427_v20 = vld [vmem:[%s5065_s2 + $0x68] sm:$0xff]   ;;  %v3428_v23 = vld [vmem:[%s5065_s2 + $0x60] sm:$0xff]   ;;  %s3477_s21 = sshll.u32 %s3536_s20, 4  ;;  %s3478_s21 = int_to_ptr.vmem [resolvable:$false] %s3477_s21 }
  0x17   : > { %s2964_s17 = sshll.u32 %s5188_s23, 4  ;;  %v3429_v36 = vld [vmem:[%s5065_s2 + $0x58] sm:$0xff]   ;;  %v3430_v37 = vld [vmem:[%s5065_s2 + $0x50] sm:$0xff]   ;;  %v3432_v38 = vld [vmem:[%s5065_s2 + $0x48] sm:$0xff]   ;;  %s299_s23 = sand.u32 1, %s3525_s28  }
  0x18   : > { %s3660_s25 = scalar_lea.vmem %s5063_s0, %s2964_s17  ;;  %v3431_v39 = vld [vmem:[%s5065_s2 + $0x38] sm:$0xff]   ;;  %v3434_v40 = vld [vmem:[%s5065_s2 + $0x40] sm:$0xff]   ;;  %v3433_v41 = vld [vmem:[%s5065_s2 + $0x30] sm:$0xff]   ;;  %s2750_s26 = sshll.u32 %s299_s23, 8 }
  0x19   : > { %3122 = vmatpush3.bf16.msra.mxu0 %v3418_v1  ;;  %3368 = vmatpush3.bf16.msra.mxu1 %v3418_v1  ;;  %v313_v8 = vld [vmem:[%s3660_s25 + $0x10] sm:$0xff]  ;;  %v314_v9 = vld [vmem:[%s3660_s25 + $0x18] sm:$0xff]  ;;  %v3435_v42 = vld [vmem:[%s5065_s2 + $0x28] sm:$0xff]   ;;  %s4948_s10 = scalar_lea.vmem [#allocation2], %s2750_s26  ;;  %s5023_s9 = scalar_lea.sflag [#allocation3], %s299_s23 }
  0x1a   : > { %3123 = vmatprep.subr.bf16.mxu0 %v3419_v2  ;;  %3361 = vmatprep.subr.bf16.mxu1 %v3419_v2  ;;  %v329_v10 = vld [vmem:[%s3660_s25 + $0x90] sm:$0xff]  ;;  %v330_v11 = vld [vmem:[%s3660_s25 + $0x98] sm:$0xff]  ;;  %v344_v13 = vpack.c.bf16 %v314_v9, %v313_v8  ;;  %v3436_v43 = vld [vmem:[%s5065_s2 + $0x20] sm:$0xff]   ;;  %s2684_s13 = sshll.u32 %s4948_s10, 4  ;;  %s3479_s22 = scalar_lea.vmem %s3478_s21, 8192  ;;  %s5017_s13 = int_to_ptr.vmem [resolvable:$true] %s2684_s13 }
  0x1b   : > { %v352_v14 = vpack.c.bf16 %v330_v11, %v329_v10  ;;  %v317_v16 = vld [vmem:[%s3660_s25 + $0x30] sm:$0xff]  ;;  %v318_v17 = vld [vmem:[%s3660_s25 + $0x38] sm:$0xff]  ;;  %v3439_v46 = vld [vmem:[%s5065_s2 + $0x8] sm:$0xff]   ;;  %p3480_p0 = scmp.lt.s32.totalorder %s5017_s13, %s3478_s21 }
  0x1c   : > { %v333_v18 = vld [vmem:[%s3660_s25 + $0xb0] sm:$0xff]  ;;  %v334_v19 = vld [vmem:[%s3660_s25 + $0xb8] sm:$0xff]  ;;  %v346_v21 = vpack.c.bf16 %v318_v17, %v317_v16  ;;  %v3440_v47 = vld [vmem:[%s5065_s2] sm:$0xff]  }
  0x1d   : > { %3124 = vmatpush3.bf16.msra.mxu0 %v3419_v2  ;;  %3369 = vmatpush3.bf16.msra.mxu1 %v3419_v2  ;;  %v354_v22 = vpack.c.bf16 %v334_v19, %v333_v18  ;;  %v321_v24 = vld [vmem:[%s3660_s25 + $0x50] sm:$0xff]  ;;  %v322_v25 = vld [vmem:[%s3660_s25 + $0x58] sm:$0xff]  ;;  %v3735_v50 = vld [vmem:[%s5067_s4] ss:$0 sm:$0xff] }
  0x1e   : > { %3125 = vmatprep.subr.bf16.mxu0 %v3420_v3  ;;  %3362 = vmatprep.subr.bf16.mxu1 %v3420_v3  ;;  %v337_v26 = vld [vmem:[%s3660_s25 + $0xd0] sm:$0xff]  ;;  %v338_v27 = vld [vmem:[%s3660_s25 + $0xd8] sm:$0xff]  ;;  %v348_v28 = vpack.c.bf16 %v322_v25, %v321_v24  ;;  %v3741_v55 = vld [vmem:[%s5068_s5] ss:$0 sm:$0xff] }
  0x1f   : > { %v356_v29 = vpack.c.bf16 %v338_v27, %v337_v26  ;;  %v325_v30 = vld [vmem:[%s3660_s25 + $0x70] sm:$0xff]  ;;  %v326_v31 = vld [vmem:[%s3660_s25 + $0x78] sm:$0xff] }
  0x20   : > { %v341_v32 = vld [vmem:[%s3660_s25 + $0xf0] sm:$0xff]  ;;  %v342_v33 = vld [vmem:[%s3660_s25 + $0xf8] sm:$0xff]  ;;  %v350_v34 = vpack.c.bf16 %v326_v31, %v325_v30 }
  0x21   : > { %3126 = vmatpush3.bf16.msra.mxu0 %v3420_v3  ;;  %3370 = vmatpush3.bf16.msra.mxu1 %v3420_v3  ;;  %v358_v35 = vpack.c.bf16 %v342_v33, %v341_v32  ;;  %v3437_v44 = vld [vmem:[%s5065_s2 + $0x18] sm:$0xff]   ;;  %v3438_v45 = vld [vmem:[%s5065_s2 + $0x10] sm:$0xff]  }
  0x22   : > { %3127 = vmatprep.subr.bf16.mxu0 %v3421_v4  ;;  %3363 = vmatprep.subr.bf16.mxu1 %v3421_v4  ;;  %v3729_v48 = vld [vmem:[%s5065_s2 + $0xb8] sm:$0xff]  }
  0x25   : > { %3128 = vmatpush3.bf16.msra.mxu0 %v3421_v4  ;;  %3371 = vmatpush3.bf16.msra.mxu1 %v3421_v4 }
  0x26   : > { %3129 = vmatprep.subr.bf16.mxu0 %v3422_v5  ;;  %3364 = vmatprep.subr.bf16.mxu1 %v3422_v5 }
  0x29   : > { %3130 = vmatpush3.bf16.msra.mxu0 %v3422_v5  ;;  %3372 = vmatpush3.bf16.msra.mxu1 %v3422_v5 }
  0x2a   : > { %3131 = vmatprep.subr.bf16.mxu0 %v3423_v6  ;;  %3365 = vmatprep.subr.bf16.mxu1 %v3423_v6 }
  0x2d   : > { %3132 = vmatpush3.bf16.msra.mxu0 %v3423_v6  ;;  %3373 = vmatpush3.bf16.msra.mxu1 %v3423_v6  ;;  %v3753_v6 = vshrl.u32 %v694_v61, 7 }
  0x2e   : > { %3133 = vmatprep.subr.bf16.mxu0 %v3424_v7  ;;  %3366 = vmatprep.subr.bf16.mxu1 %v3424_v7 }
  0x2f   : > { %vm1819_vm0 = vcmp.lt.s32.totalorder %v3753_v6, 7  ;;  %v829_v33 = vand.u32 15, %v3753_v6  ;;  %vm792_vm1 = vcmp.lt.s32.totalorder %v3753_v6, 1 }
  0x31   : > { %3134 = vmatpush3.bf16.msra.mxu0 %v3424_v7  ;;  %3374 = vmatpush3.bf16.msra.mxu1 %v3424_v7  ;;  %vm3936_vm2 = vcmp.ne.s32.totalorder %v829_v33, 0  ;;  %v3442_v33 = vld [vmem:[%s5065_s2 + $0xb0] sm:$0xff]  }
  0x32   : > { %3215 = vmatprep.subr.bf16.mxu0 %v3425_v12  ;;  %3167 = vmatprep.subr.bf16.mxu1 %v3431_v39  ;;  %vm4038_vm8 = vmpackc.low %vm3535_vm7, %vm3936_vm2 }
  0x34   : > { %3136 = vmatmul.mubr.bf16.vlgmr.msra.gmra.mxu0 %v344_v13  ;;  %3152 = vmatmul.mubr.bf16.vlgmr.msra.gmra.mxu1 %v352_v14 }
  0x35   : > { %3216 = vmatpush3.bf16.msra.mxu0 %v3425_v12  ;;  %3168 = vmatpush3.bf16.msra.mxu1 %v3431_v39 }
  0x36   : > { %3217 = vmatprep.subr.bf16.mxu0 %v3426_v15  ;;  %3169 = vmatprep.subr.bf16.mxu1 %v3433_v41 }
  0x39   : > { %3218 = vmatpush3.bf16.msra.mxu0 %v3426_v15  ;;  %3170 = vmatpush3.bf16.msra.mxu1 %v3433_v41 }
  0x3a   : > { %3219 = vmatprep.subr.bf16.mxu0 %v3427_v20  ;;  %3171 = vmatprep.subr.bf16.mxu1 %v3435_v42 }
  0x3c   : > { %3140 = vmatmul.mubr.bf16.gmra.mxu0 %v346_v21  ;;  %3156 = vmatmul.mubr.bf16.gmra.mxu1 %v354_v22 }
  0x3d   : > { %3220 = vmatpush3.bf16.msra.mxu0 %v3427_v20  ;;  %3172 = vmatpush3.bf16.msra.mxu1 %v3435_v42 }
  0x3e   : > { %3221 = vmatprep.subr.bf16.mxu0 %v3428_v23  ;;  %3173 = vmatprep.subr.bf16.mxu1 %v3436_v43 }
  0x41   : > { %3222 = vmatpush3.bf16.msra.mxu0 %v3428_v23  ;;  %3174 = vmatpush3.bf16.msra.mxu1 %v3436_v43  ;;  %v3782_v23 = vadd.s32 16, %v3753_v6 }
  0x42   : > { %3223 = vmatprep.subr.bf16.mxu0 %v3429_v36  ;;  %3175 = vmatprep.subr.bf16.mxu1 %v3437_v44 }
  0x44   : > { %3144 = vmatmul.mubr.bf16.gmra.mxu0 %v348_v28  ;;  %3160 = vmatmul.mubr.bf16.gmra.mxu1 %v356_v29  ;;  %v3792_v28 = vadd.s32 32, %v3753_v6 }
  0x45   : > { %3224 = vmatpush3.bf16.msra.mxu0 %v3429_v36  ;;  %3176 = vmatpush3.bf16.msra.mxu1 %v3437_v44  ;;  %v3805_v36 = vadd.s32 64, %v3753_v6  ;;  %v3815_v44 = vadd.s32 80, %v3753_v6 }
  0x46   : > { %3225 = vmatprep.subr.bf16.mxu0 %v3430_v37  ;;  %3177 = vmatprep.subr.bf16.mxu1 %v3438_v45  ;;  %v857_v43 = vand.u32 15, %v3792_v28 }
  0x48   : > { %vm3962_vm4 = vcmp.ne.s32.totalorder %v857_v43, 0 }
  0x49   : > { %3226 = vmatpush3.bf16.msra.mxu0 %v3430_v37  ;;  %3178 = vmatpush3.bf16.msra.mxu1 %v3438_v45  ;;  %v3818_v45 = vadd.s32 96, %v3753_v6  ;;  %vm4071_vm10 = vmpackc.low %vm3535_vm7, %vm3962_vm4 }
  0x4a   : > { %3227 = vmatprep.subr.bf16.mxu0 %v3432_v38  ;;  %3179 = vmatprep.subr.bf16.mxu1 %v3439_v46 }
  0x4c   : > { %3148 = vmatmul.mubr.bf16.gmra.mxu0 %v350_v34  ;;  %3164 = vmatmul.mubr.bf16.gmra.mxu1 %v358_v35  ;;  %v843_v34 = vand.u32 15, %v3782_v23  ;;  %v3802_v35 = vadd.s32 48, %v3753_v6 }
  0x4d   : > { %3228 = vmatpush3.bf16.msra.mxu0 %v3432_v38  ;;  %3180 = vmatpush3.bf16.msra.mxu1 %v3439_v46  ;;  %v3821_v46 = vadd.s32 112, %v3753_v6 }
  0x4e   : > { %3229 = vmatprep.subr.bf16.mxu0 %v3434_v40  ;;  %3181 = vmatprep.subr.bf16.mxu1 %v3440_v47  ;;  %vm3951_vm3 = vcmp.ne.s32.totalorder %v843_v34, 0 }
  0x4f   : > { %vm4058_vm9 = vmpackc.low %vm3535_vm7, %vm3951_vm3 }
  0x51   : > { %3230 = vmatpush3.bf16.msra.mxu0 %v3434_v40  ;;  %3182 = vmatpush3.bf16.msra.mxu1 %v3440_v47 }
  0x52   : > { %3263 = vmatprep.subr.bf16.mxu1 %v3729_v48 }
  0xf4   : > { %v3137_v49 = vpop.f32.mrf.mxu0  ;;  %v3153_v51 = vpop.f32.mrf.mxu1 }
  0xf5   : > { %v593_v52 = vmul.f32 %v3137_v49, %v3735_v50  ;;  %v609_v24 = vmul.f32 %v3153_v51, %v3735_v50 }
  0xf6   : > { %v457_v53 = vpop.f32.mrf.mxu0  ;;  %v521_v54 = vpop.f32.mrf.mxu1 }
  0xf7   : > { %v591_v56 = vmul.f32 %v3735_v50, %v457_v53  ;;  %v632_v59 = vadd.f32 %v3741_v55, %v593_v52  ;;  %v607_v29 = vmul.f32 %v3735_v50, %v521_v54  ;;  %v648_v37 = vadd.f32 %v3741_v55, %v609_v24 }
  0xf8   : > { %v3138_v57 = vpop.f32.mrf.mxu0  ;;  %v3154_v58 = vpop.f32.mrf.mxu1  ;;  %v3832_v53 = vadd.s32 128, %v3753_v6 }
  0xf9   : > { %v594_v60 = vmul.f32 %v3138_v57, %v3735_v50  ;;  %v630_v0 = vadd.f32 %v3741_v55, %v591_v56  ;;  %v3750_v4 = vmax.f32 %v632_v59, 0.0  ;;  %v610_v38 = vmul.f32 %v3154_v58, %v3735_v50 }
  0xfa   : > { %v460_v62 = vpop.f32.mrf.mxu0  ;;  %v524_v63 = vpop.f32.mrf.mxu1  ;;  %v646_v47 = vadd.f32 %v3741_v55, %v607_v29  ;;  %v871_v57 = vand.u32 15, %v3802_v35  ;;  %v3839_v59 = vmax.f32 %v648_v37, 0.0 }
  0xfb   : > { %v633_v1 = vadd.f32 %v3741_v55, %v594_v60  ;;  %v592_v5 = vmul.f32 %v3735_v50, %v460_v62  ;;  %v5073_v9 = vrot.slane %v3750_v4, 1  ;;  %v3761_v12 = vmax.f32 %v630_v0, 0.0 }
  0xfc   : > { %v3141_v2 = vpop.f32.mrf.mxu0  ;;  %v3748_v3 = vpop.f32.mrf.mxu1  ;;  %v608_v49 = vmul.f32 %v3735_v50, %v524_v63  ;;  %v649_v60 = vadd.f32 %v3741_v55, %v610_v38  ;;  %vm4010_vm5 = vcmp.ne.s32.totalorder %v871_v57, 0 }
  0xfd   : > { %v3758_v10 = vmax.f32 %v633_v1, 0.0  ;;  %v631_v11 = vadd.f32 %v3741_v55, %v592_v5  ;;  %v597_v61 = vmul.f32 %v3141_v2, %v3735_v50  ;;  %v613_v1 = vmul.f32 %v3748_v3, %v3735_v50  ;;  %vm2801_vm13 = vmpackc.low %vm3535_vm7, %vm4010_vm5 }
  0xfe   : > { %v473_v7 = vpop.f32.mrf.mxu0  ;;  %v3755_v8 = vpop.f32.mrf.mxu1 }
  0xff   : > { %v595_v13 = vmul.f32 %v3735_v50, %v473_v7  ;;  %v1790_v16 = vrot.slane %v3758_v10, 1  ;;  %v3768_v17 = vmax.f32 %v631_v11, 0.0  ;;  %v728_v20 = vpack.c.bf16 %v3758_v10, %v3750_v4 }
 0x100   : > { %v3142_v14 = vpop.f32.mrf.mxu0  ;;  %v3764_v15 = vpop.f32.mrf.mxu1  ;;  %v636_v29 = vadd.f32 %v3741_v55, %v597_v61 }
 0x101   : > { %v3778_v21 = vsel %vm1819_vm0, %v5073_v9, %v1790_v16  ;;  %v634_v22 = vadd.f32 %v3741_v55, %v595_v13  ;;  %v727_v25 = vpack.c.bf16 %v3768_v17, %v3761_v12  ;;  %v598_v62 = vmul.f32 %v3142_v14, %v3735_v50 }
 0x102   : > { %v476_v18 = vpop.f32.mrf.mxu0  ;;  %v3770_v19 = vpop.f32.mrf.mxu1  ;;  %v3854_v13 = vmax.f32 %v646_v47, 0.0  ;;  %v3859_v14 = vadd.s32 144, %v3753_v6  ;;  %v760_v47 = vrot.slane %v3761_v12, 7 }
 0x103   : > { %v3795_v30 = vmax.f32 %v634_v22, 0.0  ;;  %3231 = vmatprep.mubr.bf16.mxu0 %v727_v25  ;;  %v596_v40 = vmul.f32 %v3735_v50, %v476_v18  ;;  %v762_v18 = vrot.slane %v3750_v4, 7  ;;  %v3866_v22 = vadd.s32 160, %v3753_v6 }
 0x104   : > { %v3787_v26 = vpop.f32.mrf.mxu0  ;;  %v3789_v27 = vpop.f32.mrf.mxu1  ;;  %3232 = vmatmul.mubr.bf16.vlgmr.msra.gmra.mxu0 %v728_v20  ;;  %v3869_v25 = vmax.f32 %v649_v60, 0.0  ;;  %v637_v37 = vadd.f32 %v3741_v55, %v598_v62 }
 0x105   : > { %v5072_v39 = vrot.slane %v3795_v30, 1  ;;  %v635_v56 = vadd.f32 %v3741_v55, %v596_v40  ;;  %v601_v61 = vmul.f32 %v3787_v26, %v3735_v50 }
 0x106   : > { %v489_v31 = vpop.f32.mrf.mxu0  ;;  %v3797_v32 = vpop.f32.mrf.mxu1  ;;  %v3893_v54 = vmax.f32 %v637_v37, 0.0 }
 0x107   : > { %v3829_v51 = vsel %vm1819_vm0, %v1790_v16, %v5072_v39  ;;  %v647_v16 = vadd.f32 %v3741_v55, %v608_v49  ;;  %v3862_v20 = vmax.f32 %v635_v56, 0.0  ;;  %v599_v3 = vmul.f32 %v3735_v50, %v489_v31 }
 0x108   : > { %v3146_v41 = vpop.f32.mrf.mxu0  ;;  %v3811_v42 = vpop.f32.mrf.mxu1  ;;  %v5074_v56 = vrot.slane %v3758_v10, 7  ;;  %v652_v31 = vadd.f32 %v3741_v55, %v613_v1  ;;  %v3889_v49 = vmax.f32 %v636_v29, 0.0  ;;  %v640_v5 = vadd.f32 %v3741_v55, %v601_v61 }
 0x109   : > { %v3879_v60 = vmax.f32 %v647_v16, 0.0  ;;  %v638_v62 = vadd.f32 %v3741_v55, %v599_v3  ;;  %v602_v2 = vmul.f32 %v3146_v41, %v3735_v50  ;;  %v729_v11 = vpack.c.bf16 %v3862_v20, %v3795_v30 }
 0x10a   : > { %v492_v52 = vpop.f32.mrf.mxu0  ;;  %v3845_v63 = vpop.f32.mrf.mxu1  ;;  %v611_v16 = vmul.f32 %v3735_v50, %v3755_v8  ;;  %v3901_v41 = vsel %vm792_vm1, %v762_v18, %v5074_v56  ;;  %v3904_v3 = vmax.f32 %v652_v31, 0.0  ;;  %v3966_v23 = vmax.f32 %v640_v5, 0.0 }
 0x10b   : > { %v600_v39 = vmul.f32 %v3735_v50, %v492_v52  ;;  %v761_v52 = vrot.slane %v3768_v17, 7  ;;  %3235 = vmatprep.mubr.bf16.mxu0 %v729_v11  ;;  %v3913_v56 = vmax.f32 %v638_v62, 0.0  ;;  %v641_v31 = vadd.f32 %v3741_v55, %v602_v2 }
 0x10c   : > { %v3847_v0 = vpop.f32.mrf.mxu0  ;;  %v3165_v38 = vpop.f32.mrf.mxu1  ;;  %v730_v11 = vpack.c.bf16 %v3893_v54, %v3889_v49  ;;  %v612_v62 = vmul.f32 %v3735_v50, %v3770_v19 }
 0x10d   : > { %v639_v29 = vadd.f32 %v3741_v55, %v600_v39  ;;  %v621_v39 = vmul.f32 %v3165_v38, %v3735_v50  ;;  %v3924_v7 = vsel %vm792_vm1, %v761_v52, %v762_v18  ;;  %v3930_v2 = vsel %vm792_vm1, %v760_v47, %v761_v52 }
 0x10e   : > { %v505_v40 = vpop.f32.mrf.mxu0  ;;  %v3895_v24 = vpop.f32.mrf.mxu1  ;;  %v650_v38 = vadd.f32 %v3741_v55, %v611_v16  ;;  %v614_v18 = vmul.f32 %v3764_v15, %v3735_v50  ;;  %v617_v52 = vmul.f32 %v3789_v27, %v3735_v50  ;;  %3236 = vmatmul.mubr.bf16.gmra.mxu0 %v730_v11  ;;  %v605_v16 = vmul.f32 %v3847_v0, %v3735_v50 }
 0x10f   : > { %v3916_v58 = vmax.f32 %v639_v29, 0.0  ;;  %v603_v37 = vmul.f32 %v3735_v50, %v505_v40  ;;  %v3947_v29 = vadd.f32 %v3741_v55, %v621_v39  ;;  %v3968_v34 = vmax.f32 %v641_v31, 0.0 }
 0x110   : > { %v3150_v26 = vpop.f32.mrf.mxu0  ;;  %v3166_v1 = vpop.f32.mrf.mxu1  ;;  %v651_v5 = vadd.f32 %v3741_v55, %v612_v62  ;;  %v656_v31 = vadd.f32 %v3741_v55, %v617_v52  ;;  %v644_v11 = vadd.f32 %v3741_v55, %v605_v16 }
 0x111   : > { %v642_v15 = vadd.f32 %v3741_v55, %v603_v37  ;;  %v622_v19 = vmul.f32 %v3166_v1, %v3735_v50  ;;  %v606_v39 = vmul.f32 %v3150_v26, %v3735_v50  ;;  %v731_v0 = vpack.c.bf16 %v3916_v58, %v3913_v56 }
 0x112   : > { %v508_v8 = vpop.f32.mrf.mxu0  ;;  %v3973_v37 = vmax.f32 %v650_v38, 0.0  ;;  %v615_v1 = vmul.f32 %v3735_v50, %v3797_v32  ;;  %v618_v26 = vmul.f32 %v3811_v42, %v3735_v50  ;;  %v732_v52 = vpack.c.bf16 %v3968_v34, %v3966_v23 }
 0x113   : > { %v604_v61 = vmul.f32 %v3735_v50, %v508_v8  ;;  %v661_v28 = vadd.f32 %v3741_v55, %v622_v19  ;;  %v653_v8 = vadd.f32 %v3741_v55, %v614_v18  ;;  %3239 = vmatprep.mubr.bf16.mxu0 %v731_v0  ;;  %v3985_v38 = vmax.f32 %v642_v15, 0.0 }
 0x114   : > { %v5076_v18 = vrot.slane %v3862_v20, 7  ;;  %v645_v62 = vadd.f32 %v3741_v55, %v606_v39  ;;  %v2794_v42 = vpack.c.bf16 %v3901_v41, %v3924_v7  ;;  %v654_v15 = vadd.f32 %v3741_v55, %v615_v1 }
 0x115   : > { %v643_v43 = vadd.f32 %v3741_v55, %v604_v61  ;;  %v3987_v9 = vmax.f32 %v661_v28, 0.0  ;;  %v764_v61 = vrot.slane %v3795_v30, 7  ;;  %v616_v19 = vmul.f32 %v3735_v50, %v3845_v63 }
 0x116   : > { %v767_v0 = vrot.slane %v3893_v54, 7  ;;  %v4003_v28 = vmax.f32 %v653_v8, 0.0  ;;  %3240 = vmatmul.mubr.bf16.gmra.mxu0 %v732_v52  ;;  %v4014_v41 = vmax.f32 %v656_v31, 0.0  ;;  %v657_v1 = vadd.f32 %v3741_v55, %v618_v26 }
 0x117   : > { %v3989_v32 = vmax.f32 %v643_v43, 0.0  ;;  %v4005_v43 = vmax.f32 %v651_v5, 0.0  ;;  %v5075_v39 = vrot.slane %v3987_v9, 7  ;;  %v4017_v63 = vmax.f32 %v644_v11, 0.0 }
 0x118   : > { %v5090_v5 = vand.u32 15, %v3805_v36  ;;  %v4027_v35 = vmax.f32 %v645_v62, 0.0  ;;  %v819_v36 = vsel %vm792_vm1, %v764_v61, %v5076_v18  ;;  %v5095_v26 = vrot.slane %v3758_v10, 7 }
 0x119   : > { %v733_v8 = vpack.c.bf16 %v3989_v32, %v3985_v38  ;;  %v824_v57 = vsel %vm792_vm1, %v5075_v39, %v760_v47  ;;  %v4051_v62 = vmax.f32 %v654_v15, 0.0  ;;  %v655_v40 = vadd.f32 %v3741_v55, %v616_v19 }
 0x11a   : > { %vm4023_vm6 = vcmp.ne.s32.totalorder %v5090_v5, 0  ;;  %v820_v11 = vsel %vm792_vm1, %v5095_v26, %v764_v61  ;;  %v2790_v52 = vpack.c.bf16 %v3930_v2, %v824_v57  ;;  %v619_v15 = vmul.f32 %v3735_v50, %v3895_v24  ;;  %v572_v24 = vpop.f32.mrf.mxu1 }
 0x11b   : > { %3243 = vmatprep.mubr.bf16.mxu0 %v733_v8  ;;  %v734_v19 = vpack.c.bf16 %v4027_v35, %v4017_v63  ;;  %v770_v57 = vrot.slane %v3966_v23, 7  ;;  %v4080_v26 = vmax.f32 %v657_v1, 0.0  ;;  %v2798_v27 = vpack.c.bf16 %v819_v36, %v820_v11  ;;  %vm2805_vm14 = vmpackc.low %vm3535_vm7, %vm4023_vm6 }
 0x11c   : > { %3183 = vmatprep.mubr.msk.bf16.mxu1 %vm4038_vm8, %v2790_v52  ;;  %v1797_v39 = vrot.slane %v3966_v23, 1  ;;  %v768_v47 = vrot.slane %v3913_v56, 7  ;;  %v769_v61 = vrot.slane %v3916_v58, 7  ;;  %v1795_v8 = vrot.slane %v3913_v56, 1 }
 0x11d   : > { %3184 = vmatmul.mubr.msk.bf16.vlgmr.msra.gmra.mxu1 %vm4058_vm9, %v2794_v42  ;;  %v4092_v18 = vmax.f32 %v655_v40, 0.0  ;;  %v735_v31 = vpack.c.bf16 %v3879_v60, %v3854_v13  ;;  %v771_v36 = vrot.slane %v3968_v34, 7  ;;  %v658_v42 = vadd.f32 %v3741_v55, %v619_v15  ;;  %v3443_v40 = vld [vmem:[%s5065_s2 + $0xa8] sm:$0xff]  }
 0x11e   : > { %3264 = vmatpush3.bf16.msra.mxu1 %v3729_v48  ;;  %3187 = vmatprep.mubr.msk.bf16.mxu1 %vm4071_vm10, %v2798_v27  ;;  %v620_v52 = vmul.f32 %v3735_v50, %v572_v24  ;;  %v5100_v5 = vand.u32 15, %v3815_v44  ;;  %v1796_v27 = vrot.slane %v3916_v58, 1  ;;  %v5103_v50 = vrot.slane %v3889_v49, 7 }
 0x11f   : > { %3244 = vmatmul.mubr.bf16.gmra.mxu0 %v734_v19  ;;  %3265 = vmatprep.subr.bf16.mxu1 %v3442_v33  ;;  %v5105_v44 = vrot.slane %v3862_v20, 7  ;;  %v772_v58 = vrot.slane %v3985_v38, 7  ;;  %v816_v10 = vsel %vm792_vm1, %v767_v0, %v768_v47  ;;  %v1799_v1 = vrot.slane %v3985_v38, 1 }
 0x120   : > { %vm4108_vm11 = vcmp.ne.s32.totalorder %v5100_v5, 0  ;;  %3247 = vmatprep.mubr.bf16.mxu0 %v735_v31  ;;  %v817_v15 = vsel %vm792_vm1, %v5103_v50, %v767_v0  ;;  %v5104_v19 = vmov %v5103_v50  ;;  %v5106_v5 = vand.u32 15, %v3818_v45 }
 0x121   : > { %v818_v24 = vsel %vm792_vm1, %v5105_v44, %v5104_v19  ;;  %v5077_v31 = vrot.slane %v3989_v32, 7  ;;  %v815_v50 = vsel %vm792_vm1, %v768_v47, %v769_v61  ;;  %v774_v45 = vrot.slane %v4017_v63, 7  ;;  %vm4276_vm3 = vmpackc.low %vm3535_vm7, %vm4108_vm11 }
 0x122   : > { %vm4128_vm12 = vcmp.ne.s32.totalorder %v5106_v5, 0  ;;  %v1801_v44 = vrot.slane %v4017_v63, 1  ;;  %v4144_v5 = vmax.f32 %v3947_v29, 0.0  ;;  %3266 = vmatpush3.bf16.msra.mxu1 %v3442_v33  ;;  %v4150_v11 = vmax.f32 %v658_v42, 0.0  ;;  %v3444_v29 = vld [vmem:[%s5065_s2 + $0xa0] sm:$0xff]  }
 0x123   : > { %v659_v0 = vadd.f32 %v3741_v55, %v620_v52  ;;  %v2802_v47 = vpack.c.bf16 %v817_v15, %v818_v24  ;;  %3267 = vmatprep.subr.bf16.mxu1 %v3443_v40  ;;  %v775_v7 = vrot.slane %v4027_v35, 7  ;;  %v1802_v33 = vrot.slane %v4027_v35, 1  ;;  %vm4295_vm4 = vmpackc.low %vm3535_vm7, %vm4128_vm12 }
 0x124   : > { %v736_v38 = vpack.c.bf16 %v3869_v25, %v3839_v59  ;;  %v2806_v42 = vpack.c.bf16 %v815_v50, %v816_v10  ;;  %v737_v55 = vpack.c.bf16 %v4005_v43, %v3973_v37  ;;  %v813_v16 = vsel %vm792_vm1, %v770_v57, %v771_v36 }
 0x125   : > { %3188 = vmatmul.mubr.msk.bf16.gmra.mxu1 %vm2801_vm13, %v2802_v47  ;;  %v814_v52 = vsel %vm792_vm1, %v769_v61, %v770_v57  ;;  %v811_v15 = vsel %vm792_vm1, %v772_v58, %v5077_v31  ;;  %v1800_v24 = vrot.slane %v3989_v32, 1  ;;  %v812_v10 = vsel %vm792_vm1, %v771_v36, %v772_v58 }
 0x126   : > { %3191 = vmatprep.mubr.msk.bf16.mxu1 %vm2805_vm14, %v2806_v42  ;;  %3268 = vmatpush3.bf16.msra.mxu1 %v3443_v40  ;;  %v5109_v50 = vrot.slane %v3750_v4, 1  ;;  %v5110_v47 = vrot.slane %v3768_v17, 1  ;;  %v5112_v57 = vrot.slane %v3761_v12, 1  ;;  %v4192_v40 = vmax.f32 %v659_v0, 0.0  ;;  %v3445_v17 = vld [vmem:[%s5065_s2 + $0x98] sm:$0xff]  }
 0x127   : > { %3248 = vmatmul.mubr.bf16.gmra.mxu0 %v736_v38  ;;  %3269 = vmatprep.subr.bf16.mxu1 %v3444_v29  ;;  %v5113_v4 = vand.u32 15, %v3821_v46  ;;  %v5116_v42 = vrot.slane %v3889_v49, 1  ;;  %v5117_v0 = vrot.slane %v3862_v20, 1  ;;  %v5123_v20 = vrot.slane %v3893_v54, 1 }
 0x128   : > { %v4182_v19 = vsel %vm1819_vm0, %v5110_v47, %v5109_v50  ;;  %v5111_v61 = vmov %v5110_v47  ;;  %v5119_v50 = vrot.slane %v3795_v30, 1  ;;  %3251 = vmatprep.mubr.bf16.mxu0 %v737_v55  ;;  %v5125_v55 = vrot.slane %v3889_v49, 1 }
 0x129   : > { %v4190_v31 = vsel %vm1819_vm0, %v5112_v57, %v5111_v61  ;;  %vm4196_vm15 = vcmp.ne.s32.totalorder %v5113_v4, 0  ;;  %v4211_v38 = vsel %vm1819_vm0, %v5117_v0, %v5116_v42  ;;  %v5118_v46 = vmov %v5117_v0 }
 0x12a   : > { %v4219_v47 = vsel %vm1819_vm0, %v5119_v50, %v5118_v46  ;;  %v5120_v61 = vand.u32 15, %v3832_v53  ;;  %v4235_v30 = vsel %vm1819_vm0, %v5123_v20, %v1795_v8  ;;  %v5124_v42 = vmov %v5123_v20  ;;  %3270 = vmatpush3.bf16.msra.mxu1 %v3444_v29  ;;  %v3446_v29 = vld [vmem:[%s5065_s2 + $0x90] sm:$0xff]   ;;  %vm4441_vm5 = vmpackc.low %vm3535_vm7, %vm4196_vm15 }
 0x12b   : > { %v4243_v53 = vsel %vm1819_vm0, %v5125_v55, %v5124_v42  ;;  %v4249_v0 = vsel %vm1819_vm0, %v1796_v27, %v1797_v39  ;;  %v4257_v54 = vsel %vm1819_vm0, %v1795_v8, %v1796_v27  ;;  %v5126_v49 = vrot.slane %v3968_v34, 1  ;;  %3271 = vmatprep.subr.bf16.mxu1 %v3445_v17  ;;  %v3447_v27 = vld [vmem:[%s5065_s2 + $0x88] sm:$0xff]  }
 0x12c   : > { %vm4223_vm2 = vcmp.ne.s32.totalorder %v5120_v61, 0  ;;  %v4286_v23 = vsel %vm1819_vm0, %v1800_v24, %v1801_v44  ;;  %v2810_v48 = vpack.c.bf16 %v813_v16, %v814_v52  ;;  %v5132_v55 = vrot.slane %v3854_v13, 1 }
 0x12d   : > { %v4263_v50 = vsel %vm1819_vm0, %v5126_v49, %v1799_v1  ;;  %v5127_v61 = vmov %v5126_v49  ;;  %v4312_v2 = vsel %vm1819_vm0, %v1801_v44, %v1802_v33  ;;  %v2814_v16 = vpack.c.bf16 %v811_v15, %v812_v10  ;;  %vm4462_vm6 = vmpackc.low %vm3535_vm7, %vm4223_vm2 }
 0x12e   : > { %v4271_v20 = vsel %vm1819_vm0, %v1797_v39, %v5127_v61  ;;  %v4290_v39 = vsel %vm1819_vm0, %v1799_v1, %v1800_v24  ;;  %v4308_v1 = vsel %vm1819_vm0, %v1802_v33, %v5132_v55  ;;  %v5133_v24 = vrot.slane %v3839_v59, 1  ;;  %3192 = vmatmul.mubr.msk.bf16.gmra.mxu1 %vm4276_vm3, %v2810_v48 }
 0x12f   : > { %v5134_v49 = vrot.slane %v3879_v60, 1  ;;  %v738_v33 = vpack.c.bf16 %v4003_v28, %v3904_v3  ;;  %v5136_v10 = vrot.slane %v3973_v37, 1  ;;  %v1815_v56 = vrot.slane %v4150_v11, 1  ;;  %3195 = vmatprep.mubr.msk.bf16.mxu1 %vm4295_vm4, %v2814_v16  ;;  %3272 = vmatpush3.bf16.msra.mxu1 %v3445_v17 }
 0x130   : > { %v739_v48 = vpack.c.bf16 %v4092_v18, %v4051_v62  ;;  %v5141_v15 = vrot.slane %v4005_v43, 1  ;;  %3273 = vmatprep.subr.bf16.mxu1 %v3446_v29  ;;  %v5144_v34 = vrot.slane %v4051_v62, 1  ;;  %v5147_v8 = vrot.slane %v3904_v3, 1 }
 0x131   : > { %v4322_v61 = vsel %vm1819_vm0, %v5134_v49, %v5133_v24  ;;  %v5135_v42 = vmov %v5134_v49  ;;  %v5137_v24 = vrot.slane %v3869_v25, 1  ;;  %3252 = vmatmul.mubr.bf16.gmra.mxu0 %v738_v33  ;;  %v5143_v16 = vmov %v5136_v10 }
 0x132   : > { %v4330_v44 = vsel %vm1819_vm0, %v5132_v55, %v5135_v42  ;;  %v5139_v55 = vrot.slane %v3839_v59, 1  ;;  %v5142_v17 = vmov %v5141_v15  ;;  %3255 = vmatprep.mubr.bf16.mxu0 %v739_v48  ;;  %v5149_v48 = vrot.slane %v3854_v13, 7 }
 0x133   : > { %v4344_v49 = vsel %vm1819_vm0, %v5137_v24, %v5136_v10  ;;  %v5138_v42 = vmov %v5137_v24  ;;  %v5140_v24 = vrot.slane %v3904_v3, 1  ;;  %v4379_v10 = vsel %vm1819_vm0, %v5143_v16, %v5142_v17  ;;  %3274 = vmatpush3.bf16.msra.mxu1 %v3446_v29 }
 0x134   : > { %v4352_v52 = vsel %vm1819_vm0, %v5139_v55, %v5138_v42  ;;  %v1816_v55 = vrot.slane %v4192_v40, 1  ;;  %v809_v17 = vsel %vm792_vm1, %v774_v45, %v775_v7  ;;  %v955_v63 = vand.u32 15, %v3859_v14  ;;  %3275 = vmatprep.subr.bf16.mxu1 %v3447_v27 }
 0x135   : > { %v4367_v42 = vsel %vm1819_vm0, %v5141_v15, %v5140_v24  ;;  %v5145_v15 = vrot.slane %v4003_v28, 1  ;;  %v5151_v4 = vrot.slane %v4092_v18, 1  ;;  %v1818_v14 = vrot.slane %v3987_v9, 1 }
 0x136   : > { %v5160_v36 = vrot.slane %v3854_v13, 7  ;;  %v5164_v13 = vrot.slane %v4014_v41, 1  ;;  %vm2976_vm8 = vcmp.ne.s32.totalorder %v955_v63, 0 }
 0x137   : > { %v4387_v33 = vsel %vm1819_vm0, %v5145_v15, %v5144_v34  ;;  %v5146_v24 = vmov %v5145_v15  ;;  %v5148_v34 = vrot.slane %v3989_v32, 7  ;;  %v5150_v32 = vrot.slane %v4014_v41, 1  ;;  %3276 = vmatpush3.bf16.msra.mxu1 %v3447_v27 }
 0x138   : > { %v4395_v46 = vsel %vm1819_vm0, %v5147_v8, %v5146_v24  ;;  %v808_v24 = vsel %vm792_vm1, %v775_v7, %v5149_v48  ;;  %v5154_v8 = vrot.slane %v4051_v62, 1  ;;  %v1817_v7 = vrot.slane %v4144_v5, 1 }
 0x139   : > { %v810_v16 = vsel %vm792_vm1, %v5148_v34, %v774_v45  ;;  %v4426_v45 = vsel %vm1819_vm0, %v5151_v4, %v5150_v32  ;;  %v5153_v34 = vmov %v5151_v4  ;;  %v5158_v32 = vrot.slane %v4080_v26, 1 }
 0x13a   : > { %5152 = vst [vmem:[#allocation5_spill] sm:$0xff] %v4426_v45  ;;  %v4434_v35 = vsel %vm1819_vm0, %v5154_v8, %v5153_v34  ;;  %v2818_v34 = vpack.c.bf16 %v809_v17, %v810_v16  ;;  %v5159_v15 = vrot.slane %v3879_v60, 7  ;;  %v969_v4 = vand.u32 15, %v3866_v22  ;;  %v3448_v17 = vld [vmem:[%s5065_s2 + $0x80] sm:$0xff]  }
 0x13b   : > { %5155 = vst [vmem:[#allocation6_spill] sm:$0xff] %v4434_v35  ;;  %v4451_v8 = vsel %vm1819_vm0, %v5158_v32, %v1815_v56  ;;  %v5163_v16 = vmov %v5158_v32  ;;  %v4482_v22 = vsel %vm1819_vm0, %v1816_v55, %v1817_v7  ;;  %v778_v35 = vrot.slane %v3839_v59, 7  ;;  %3277 = vmatprep.subr.bf16.mxu1 %v3448_v17 }
 0x13c   : > { %v807_v58 = vsel %vm792_vm1, %v5160_v36, %v5159_v15  ;;  %v4476_v15 = vsel %vm1819_vm0, %v5164_v13, %v5163_v16  ;;  %v4486_v36 = vsel %vm1819_vm0, %v1815_v56, %v1816_v55  ;;  %v781_v45 = vrot.slane %v4005_v43, 7  ;;  %3196 = vmatmul.mubr.msk.bf16.gmra.mxu1 %vm4441_vm5, %v2818_v34 }
 0x13d   : > { %v2822_v57 = vpack.c.bf16 %v807_v58, %v808_v24  ;;  %v2938_v32 = vpack.c.bf16 %v4451_v8, %v4476_v15  ;;  %v740_v16 = vpack.c.bf16 %v4080_v26, %v4014_v41  ;;  %v2942_v58 = vpack.c.bf16 %v4482_v22, %v4486_v36  ;;  %3278 = vmatpush3.bf16.msra.mxu1 %v3448_v17  ;;  %v3455_v8 = vld [vmem:[%s5066_s3 + $0x8] sm:$0xff]   ;;  %v3456_v15 = vld [vmem:[%s5066_s3] sm:$0xff]  }
 0x13e   : > { %v779_v24 = vrot.slane %v3869_v25, 7  ;;  %v741_v13 = vpack.c.bf16 %v4192_v40, %v4150_v11  ;;  %v4503_v59 = vsel %vm1819_vm0, %v1817_v7, %v1818_v14  ;;  %v5165_v43 = vrot.slane %v3761_v12, 1 }
 0x13f   : > { %3199 = vmatprep.mubr.msk.bf16.mxu1 %vm4462_vm6, %v2822_v57  ;;  %v780_v55 = vrot.slane %v3973_v37, 7  ;;  %3256 = vmatmul.mubr.bf16.gmra.mxu0 %v740_v16  ;;  %v717_v25 = vadd.s32 176, %v3753_v6  ;;  %v5166_v7 = vrot.slane %v3879_v60, 7  ;;  %vm2977_vm9 = vcmp.ne.s32.totalorder %v969_v4, 0 }
 0x140   : > { %v4509_v56 = vsel %vm1819_vm0, %v1818_v14, %v5165_v43  ;;  %3259 = vmatprep.mubr.bf16.mxu0 %v741_v13  ;;  %v719_v14 = vadd.s32 192, %v3753_v6  ;;  %v805_v63 = vsel %vm792_vm1, %v778_v35, %v779_v24  ;;  %vm2825_vm0 = vmpackc.low %vm3535_vm7, %vm2976_vm8  ;;  %v785_v57 = vrot.slane %v4092_v18, 7 }
 0x141   : > { %v2946_v27 = vpack.c.bf16 %v4509_v56, %v4503_v59  ;;  %v806_v12 = vsel %vm792_vm1, %v5166_v7, %v778_v35  ;;  %v803_v37 = vsel %vm792_vm1, %v780_v55, %v781_v45  ;;  %v804_v34 = vsel %vm792_vm1, %v779_v24, %v780_v55  ;;  %vm2829_vm10 = vmpackc.low %vm3535_vm7, %vm2977_vm9 }
 0x142   : > { %v2826_v48 = vpack.c.bf16 %v805_v63, %v806_v12  ;;  %v983_v60 = vand.u32 15, %v717_v25  ;;  %v2830_v29 = vpack.c.bf16 %v803_v37, %v804_v34  ;;  %v997_v4 = vand.u32 15, %v719_v14 }
 0x143   : > { %v742_v16 = vpack.c.bf16 %v3987_v9, %v4144_v5  ;;  %v782_v35 = vrot.slane %v3904_v3, 7  ;;  %v783_v13 = vrot.slane %v4003_v28, 7  ;;  %v784_v17 = vrot.slane %v4051_v62, 7 }
 0x144   : > { %3200 = vmatmul.mubr.msk.bf16.gmra.mxu1 %vm2825_vm0, %v2826_v48  ;;  %vm2978_vm11 = vcmp.ne.s32.totalorder %v983_v60, 0  ;;  %v721_v24 = vadd.s32 208, %v3753_v6  ;;  %vm2979_vm12 = vcmp.ne.s32.totalorder %v997_v4, 0  ;;  %v723_v18 = vadd.s32 224, %v3753_v6 }
 0x145   : > { %3203 = vmatprep.mubr.msk.bf16.mxu1 %vm2829_vm10, %v2830_v29  ;;  %v802_v43 = vsel %vm792_vm1, %v781_v45, %v782_v35  ;;  %v799_v55 = vsel %vm792_vm1, %v784_v17, %v785_v57  ;;  %v801_v3 = vsel %vm792_vm1, %v782_v35, %v783_v13  ;;  %vm2833_vm13 = vmpackc.low %vm3535_vm7, %vm2978_vm11  ;;  %v800_v62 = vsel %vm792_vm1, %v783_v13, %v784_v17 }
 0x146   : > { %v2834_v28 = vpack.c.bf16 %v801_v3, %v802_v43  ;;  %vm2837_vm14 = vmpackc.low %vm3535_vm7, %vm2979_vm12  ;;  %v1011_v25 = vand.u32 15, %v721_v24  ;;  %v2838_v7 = vpack.c.bf16 %v799_v55, %v800_v62  ;;  %v1025_v45 = vand.u32 15, %v723_v18 }
 0x147   : > { %3260 = vmatmul.mubr.bf16.gmra.mxu0 %v742_v16  ;;  %v789_v12 = vrot.slane %v4192_v40, 7  ;;  %v786_v14 = vrot.slane %v4014_v41, 7  ;;  %v787_v37 = vrot.slane %v4080_v26, 7  ;;  %v788_v63 = vrot.slane %v4150_v11, 7 }
 0x148   : > { %vm2980_vm15 = vcmp.ne.s32.totalorder %v1011_v25, 0  ;;  %v725_v48 = vadd.s32 240, %v3753_v6  ;;  %vm2981_vm2 = vcmp.ne.s32.totalorder %v1025_v45, 0  ;;  %v696_v60 = vadd.s32 8, %v3753_v6 }
 0x149   : > { %v798_v34 = vsel %vm792_vm1, %v785_v57, %v786_v14  ;;  %v795_v40 = vsel %vm792_vm1, %v788_v63, %v789_v12  ;;  %v797_v41 = vsel %vm792_vm1, %v786_v14, %v787_v37  ;;  %vm2841_vm3 = vmpackc.low %vm3535_vm7, %vm2980_vm15  ;;  %v796_v11 = vsel %vm792_vm1, %v787_v37, %v788_v63 }
 0x14a   : > { %v2842_v26 = vpack.c.bf16 %v797_v41, %v798_v34  ;;  %vm2845_vm4 = vmpackc.low %vm3535_vm7, %vm2981_vm2  ;;  %v1039_v29 = vand.u32 15, %v725_v48  ;;  %v2846_v4 = vpack.c.bf16 %v795_v40, %v796_v11  ;;  %v836_v57 = vand.u32 15, %v696_v60  ;;  %v3449_v48 = vld [vmem:[%s5066_s3 + $0x38] sm:$0xff]   ;;  %v3450_v40 = vld [vmem:[%s5066_s3 + $0x30] sm:$0xff]  }
 0x14b   : > { %v790_v16 = vrot.slane %v4144_v5, 7  ;;  %v698_v35 = vadd.s32 24, %v3753_v6  ;;  %v700_v17 = vadd.s32 40, %v3753_v6  ;;  %v5167_v24 = vrot.slane %v3987_v9, 7  ;;  %3311 = vmatprep.subr.bf16.mxu0 %v3449_v48  ;;  %v3451_v11 = vld [vmem:[%s5066_s3 + $0x28] sm:$0xff]  }
 0x14c   : > { %3204 = vmatmul.mubr.msk.bf16.gmra.mxu1 %vm2833_vm13, %v2834_v28  ;;  %vm2982_vm5 = vcmp.ne.s32.totalorder %v1039_v29, 0  ;;  %vm2983_vm6 = vcmp.ne.s32.totalorder %v836_v57, 15  ;;  %v5168_v3 = vpack.c.bf16 %v4182_v19, %v4190_v31  ;;  %v702_v28 = vadd.s32 56, %v3753_v6  ;;  %3312 = vmatpush3.bf16.msra.mxu0 %v3449_v48  ;;  %v5181_v29 = vld [vmem:[#allocation6_spill] sm:$0xff]  ;;  %v3452_v57 = vld [vmem:[%s5066_s3 + $0x20] sm:$0xff]  }
 0x14d   : > { %3207 = vmatprep.mubr.msk.bf16.mxu1 %vm2837_vm14, %v2838_v7  ;;  %v794_v13 = vsel %vm792_vm1, %v789_v12, %v790_v16  ;;  %v793_v43 = vsel %vm792_vm1, %v790_v16, %v5167_v24  ;;  %vm2849_vm8 = vmpackc.low %vm3535_vm7, %vm2982_vm5  ;;  %v850_v5 = vand.u32 15, %v698_v35  ;;  %v864_v55 = vand.u32 15, %v700_v17  ;;  %3313 = vmatprep.subr.bf16.mxu0 %v3450_v40 }
 0x14e   : > { %v2850_v18 = vpack.c.bf16 %v793_v43, %v794_v13  ;;  %vm2885_vm9 = vmpackc.low %vm2983_vm6, %vm3535_vm7  ;;  %v704_v9 = vadd.s32 72, %v3753_v6  ;;  %v878_v62 = vand.u32 15, %v702_v28  ;;  %v5169_v7 = vpack.c.bf16 %v3829_v51, %v3778_v21 }
 0x14f   : > { %vm2984_vm0 = vcmp.ne.s32.totalorder %v850_v5, 15  ;;  %vm2985_vm10 = vcmp.ne.s32.totalorder %v864_v55, 15  ;;  %v5170_v31 = vpack.c.bf16 %v4211_v38, %v4219_v47  ;;  %v706_v19 = vadd.s32 88, %v3753_v6 }
 0x150   : > { %vm2889_vm1 = vmpackc.low %vm2984_vm0, %vm3535_vm7  ;;  %v892_v25 = vand.u32 15, %v704_v9  ;;  %vm2986_vm12 = vcmp.ne.s32.totalorder %v878_v62, 15  ;;  %v708_v45 = vadd.s32 104, %v3753_v6  ;;  %v5171_v21 = vpack.c.bf16 %v4235_v30, %v4243_v53  ;;  %3314 = vmatpush3.bf16.msra.mxu0 %v3450_v40 }
 0x151   : > { %vm2893_vm11 = vmpackc.low %vm2985_vm10, %vm3535_vm7  ;;  %v906_v12 = vand.u32 15, %v706_v19  ;;  %v5172_v51 = vpack.c.bf16 %v4249_v0, %v4257_v54  ;;  %v710_v38 = vadd.s32 120, %v3753_v6  ;;  %v712_v47 = vadd.s32 136, %v3753_v6  ;;  %3315 = vmatprep.subr.bf16.mxu0 %v3451_v11 }
 0x152   : > { %vm2987_vm13 = vcmp.ne.s32.totalorder %v892_v25, 15  ;;  %vm2897_vm14 = vmpackc.low %vm2986_vm12, %vm3535_vm7  ;;  %v920_v14 = vand.u32 15, %v708_v45  ;;  %v5173_v30 = vpack.c.bf16 %v4263_v50, %v4271_v20  ;;  %v5174_v53 = vpack.c.bf16 %v4286_v23, %v4290_v39 }
 0x153   : > { %vm2901_vm15 = vmpackc.low %vm2987_vm13, %vm3535_vm7  ;;  %vm2988_vm2 = vcmp.ne.s32.totalorder %v906_v12, 15  ;;  %v934_v37 = vand.u32 15, %v710_v38  ;;  %v948_v63 = vand.u32 15, %v712_v47  ;;  %v714_v0 = vadd.s32 152, %v3753_v6 }
 0x154   : > { %3208 = vmatmul.mubr.msk.bf16.gmra.mxu1 %vm2841_vm3, %v2842_v26  ;;  %vm2989_vm3 = vcmp.ne.s32.totalorder %v920_v14, 15  ;;  %v716_v54 = vadd.s32 168, %v3753_v6  ;;  %v5175_v23 = vpack.c.bf16 %v4308_v1, %v4312_v2  ;;  %v5176_v39 = vpack.c.bf16 %v4322_v61, %v4330_v44  ;;  %3316 = vmatpush3.bf16.msra.mxu0 %v3451_v11 }
 0x155   : > { %3211 = vmatprep.mubr.msk.bf16.mxu1 %vm2845_vm4, %v2846_v4  ;;  %vm2905_vm4 = vmpackc.low %vm2988_vm2, %vm3535_vm7  ;;  %vm2990_vm6 = vcmp.ne.s32.totalorder %v934_v37, 15  ;;  %v962_v50 = vand.u32 15, %v714_v0  ;;  %v718_v34 = vadd.s32 184, %v3753_v6  ;;  %v720_v60 = vadd.s32 200, %v3753_v6  ;;  %3317 = vmatprep.subr.bf16.mxu0 %v3452_v57 }
 0x156   : > { %vm2909_vm5 = vmpackc.low %vm2989_vm3, %vm3535_vm7  ;;  %v976_v20 = vand.u32 15, %v716_v54  ;;  %v5177_v61 = vpack.c.bf16 %v4344_v49, %v4352_v52  ;;  %v5178_v44 = vpack.c.bf16 %v4367_v42, %v4379_v10  ;;  %v722_v41 = vadd.s32 216, %v3753_v6  ;;  %v5180_v42 = vld [vmem:[#allocation5_spill] sm:$0xff] }
 0x157   : > { %vm2992_vm10 = vcmp.ne.s32.totalorder %v962_v50, 15  ;;  %v990_v1 = vand.u32 15, %v718_v34  ;;  %v1004_v2 = vand.u32 15, %v720_v60  ;;  %v724_v26 = vadd.s32 232, %v3753_v6 }
 0x158   : > { %v1018_v52 = vand.u32 15, %v722_v41  ;;  %v5179_v10 = vpack.c.bf16 %v4387_v33, %v4395_v46  ;;  %v5182_v4 = vpack.c.bf16 %v5180_v42, %v5181_v29  ;;  %v726_v16 = vadd.s32 248, %v3753_v6  ;;  %3318 = vmatpush3.bf16.msra.mxu0 %v3452_v57  ;;  %v3453_v6 = vld [vmem:[%s5066_s3 + $0x18] sm:$0xff]   ;;  %v3454_v33 = vld [vmem:[%s5066_s3 + $0x10] sm:$0xff]  }
 0x159   : > { %vm2994_vm13 = vcmp.ne.s32.totalorder %v990_v1, 15  ;;  %v1032_v49 = vand.u32 15, %v724_v26  ;;  %3319 = vmatprep.subr.bf16.mxu0 %v3453_v6 }
 0x15a   : > { %vm2996_vm3 = vcmp.ne.s32.totalorder %v1018_v52, 15  ;;  %v1046_v46 = vand.u32 15, %v726_v16  ;;  %v4748_v52 = vld [vmem:[%s5069_s6] ss:$0 sm:$0xff] }
 0x15c   : > { %3212 = vmatmul.mubr.msk.bf16.gmra.mxu1 %vm2849_vm8, %v2850_v18  ;;  %vm2991_vm8 = vcmp.ne.s32.totalorder %v948_v63, 15  ;;  %3320 = vmatpush3.bf16.msra.mxu0 %v3453_v6 }
 0x15d   : > { %3279 = vmatprep.mubr.msk.bf16.mxu1 %vm2885_vm9, %v5168_v3  ;;  %vm2913_vm9 = vmpackc.low %vm2990_vm6, %vm3535_vm7  ;;  %3321 = vmatprep.subr.bf16.mxu0 %v3454_v33 }
 0x15e   : > { %vm2917_vm0 = vmpackc.low %vm2991_vm8, %vm3535_vm7  ;;  %vm2998_vm8 = vcmp.ne.s32.totalorder %v1046_v46, 15  ;;  %v4756_v46 = vld [vmem:[%s5070_s7] ss:$0 sm:$0xff] }
 0x160   : > { %3322 = vmatpush3.bf16.msra.mxu0 %v3454_v33 }
 0x161   : > { %3323 = vmatprep.subr.bf16.mxu0 %v3455_v8 }
 0x164   : > { %3280 = vmatmul.mubr.msk.bf16.vlgmr.msra.gmra.mxu1 %vm2889_vm1, %v5169_v7  ;;  %vm2993_vm1 = vcmp.ne.s32.totalorder %v976_v20, 15  ;;  %3324 = vmatpush3.bf16.msra.mxu0 %v3455_v8 }
 0x165   : > { %3283 = vmatprep.mubr.msk.bf16.mxu1 %vm2893_vm11, %v5170_v31  ;;  %vm2921_vm11 = vmpackc.low %vm2992_vm10, %vm3535_vm7  ;;  %3325 = vmatprep.subr.bf16.mxu0 %v3456_v15 }
 0x166   : > { %vm2925_vm12 = vmpackc.low %vm2993_vm1, %vm3535_vm7 }
 0x168   : > { %3326 = vmatpush3.bf16.msra.mxu0 %v3456_v15 }
 0x16c   : > { %3284 = vmatmul.mubr.msk.bf16.gmra.mxu1 %vm2897_vm14, %v5171_v21  ;;  %vm2995_vm14 = vcmp.ne.s32.totalorder %v1004_v2, 15 }
 0x16d   : > { %3287 = vmatprep.mubr.msk.bf16.mxu1 %vm2901_vm15, %v5172_v51  ;;  %vm2929_vm15 = vmpackc.low %vm2994_vm13, %vm3535_vm7 }
 0x16e   : > { %vm2933_vm2 = vmpackc.low %vm2995_vm14, %vm3535_vm7 }
 0x174   : > { %3288 = vmatmul.mubr.msk.bf16.gmra.mxu1 %vm2905_vm4, %v5173_v30  ;;  %vm2997_vm4 = vcmp.ne.s32.totalorder %v1032_v49, 15 }
 0x175   : > { %3291 = vmatprep.mubr.msk.bf16.mxu1 %vm2909_vm5, %v5174_v53  ;;  %vm2937_vm5 = vmpackc.low %vm2996_vm3, %vm3535_vm7 }
 0x176   : > { %vm2941_vm6 = vmpackc.low %vm2997_vm4, %vm3535_vm7 }
 0x17c   : > { %3292 = vmatmul.mubr.msk.bf16.gmra.mxu1 %vm2913_vm9, %v5175_v23  ;;  %vm2945_vm9 = vmpackc.low %vm2998_vm8, %vm3535_vm7 }
 0x17d   : > { %3295 = vmatprep.mubr.msk.bf16.mxu1 %vm2917_vm0, %v5176_v39 }
 0x184   : > { %3296 = vmatmul.mubr.msk.bf16.gmra.mxu1 %vm2921_vm11, %v5177_v61 }
 0x185   : > { %3299 = vmatprep.mubr.msk.bf16.mxu1 %vm2925_vm12, %v5178_v44 }
 0x18c   : > { %3300 = vmatmul.mubr.msk.bf16.gmra.mxu1 %vm2929_vm15, %v5179_v10 }
 0x18d   : > { %3303 = vmatprep.mubr.msk.bf16.mxu1 %vm2933_vm2, %v5182_v4 }
 0x194   : > { %3304 = vmatmul.mubr.msk.bf16.gmra.mxu1 %vm2937_vm5, %v2938_v32 }
 0x195   : > { %3307 = vmatprep.mubr.msk.bf16.mxu1 %vm2941_vm6, %v2942_v58 }
 0x19c   : > { %3308 = vmatmul.mubr.msk.bf16.gmra.mxu1 %vm2945_vm9, %v2946_v27 }
 0x1c4   : > { %v3233_v32 = vpop.f32.mrf.mxu0 }
 0x1c6   : > { %v1660_v58 = vpop.f32.mrf.mxu0 }
 0x1c8   : > { %v3234_v27 = vpop.f32.mrf.mxu0 }
 0x1ca   : > { %v1663_v17 = vpop.f32.mrf.mxu0 }
 0x1ce   : > { %v3237_v18 = vpop.f32.mrf.mxu0 }
 0x1d0   : > { %v1676_v3 = vpop.f32.mrf.mxu0 }
 0x1d2   : > { %v4685_v62 = vpop.f32.mrf.mxu0 }
 0x1d4   : > { %v1679_v31 = vpop.f32.mrf.mxu0 }
 0x1d6   : > { %v4695_v12 = vpop.f32.mrf.mxu0 }
 0x1d8   : > { %v4701_v51 = vpop.f32.mrf.mxu0 }
 0x1da   : > { %v4707_v37 = vpop.f32.mrf.mxu0 }
 0x1dc   : > { %v4713_v53 = vpop.f32.mrf.mxu0 }
 0x1dd   : > { %v3185_v22 = vpop.f32.mrf.mxu1 }
 0x1de   : > { %v1669_v41 = vadd.f32 %v3233_v32, %v3185_v22 }
 0x1df   : > { %v1451_v36 = vpop.f32.mrf.mxu1  ;;  %v4719_v48 = vpop.f32.mrf.mxu0 }
 0x1e0   : > { %v1661_v49 = vadd.f32 %v1660_v58, %v1451_v36 }
 0x1e1   : > { %v3186_v59 = vpop.f32.mrf.mxu1  ;;  %v4725_v23 = vpop.f32.mrf.mxu0 }
 0x1e2   : > { %v1672_v29 = vadd.f32 %v3234_v27, %v3186_v59 }
 0x1e3   : > { %v1454_v56 = vpop.f32.mrf.mxu1  ;;  %v4731_v60 = vpop.f32.mrf.mxu0 }
 0x1e4   : > { %v1664_v33 = vadd.f32 %v1663_v17, %v1454_v56 }
 0x1e5   : > { %v3189_v35 = vpop.f32.mrf.mxu1  ;;  %v4737_v2 = vpop.f32.mrf.mxu0 }
 0x1e6   : > { %v1685_v22 = vadd.f32 %v3237_v18, %v3189_v35 }
 0x1e7   : > { %v1467_v13 = vpop.f32.mrf.mxu1  ;;  %v4743_v26 = vpop.f32.mrf.mxu0 }
 0x1e9   : > { %v4673_v24 = vpop.f32.mrf.mxu1  ;;  %v4750_v4 = vpop.f32.mrf.mxu0 }
 0x1eb   : > { %v4675_v43 = vpop.f32.mrf.mxu1  ;;  %v4759_v36 = vpop.f32.mrf.mxu0 }
 0x1ed   : > { %v4766_v35 = vpop.f32.mrf.mxu0 }
 0x1ee   : > { %v4677_v5 = vpop.f32.mrf.mxu1 }
 0x1f0   : > { %v4679_v55 = vpop.f32.mrf.mxu1 }
 0x1f2   : > { %v4681_v28 = vpop.f32.mrf.mxu1 }
 0x1f4   : > { %v4683_v9 = vpop.f32.mrf.mxu1 }
 0x1fc   : > { %v4687_v25 = vpop.f32.mrf.mxu1 }
 0x1fe   : > { %v4689_v7 = vpop.f32.mrf.mxu1 }
 0x200   : > { %v4691_v19 = vpop.f32.mrf.mxu1 }
 0x202   : > { %v4693_v45 = vpop.f32.mrf.mxu1 }
 0x204   : > { %v4697_v14 = vpop.f32.mrf.mxu1 }
 0x206   : > { %v4699_v21 = vpop.f32.mrf.mxu1 }
 0x208   : > { %v4703_v38 = vpop.f32.mrf.mxu1 }
 0x20a   : > { %v4705_v47 = vpop.f32.mrf.mxu1 }
 0x20c   : > { %v4709_v63 = vpop.f32.mrf.mxu1 }
 0x20e   : > { %v4711_v30 = vpop.f32.mrf.mxu1 }
 0x210   : > { %v4715_v0 = vpop.f32.mrf.mxu1 }
 0x212   : > { %v4717_v54 = vpop.f32.mrf.mxu1 }
 0x214   : > { %v4721_v50 = vpop.f32.mrf.mxu1 }
 0x216   : > { %v4723_v20 = vpop.f32.mrf.mxu1 }
 0x218   : > { %v4727_v39 = vpop.f32.mrf.mxu1 }
 0x21a   : > { %v4729_v34 = vpop.f32.mrf.mxu1 }
 0x21c   : > { %v4733_v40 = vpop.f32.mrf.mxu1 }
 0x21e   : > { %v4735_v1 = vpop.f32.mrf.mxu1 }
 0x220   : > { %v4739_v61 = vpop.f32.mrf.mxu1 }
 0x222   : > { %v4741_v44 = vpop.f32.mrf.mxu1 }
 0x224   : > { %v3281_v11 = vpop.f32.mrf.mxu1 }
 0x225   : > { %v2224_v10 = vadd.f32 %v3281_v11, %v1669_v41  ;;  %v1677_v41 = vadd.f32 %v1676_v3, %v1467_v13  ;;  %v1688_v13 = vadd.f32 %v4685_v62, %v4673_v24  ;;  %v1680_v3 = vadd.f32 %v1679_v31, %v4675_v43 }
 0x226   : > { %v2095_v42 = vpop.f32.mrf.mxu1  ;;  %v1701_v24 = vadd.f32 %v4695_v12, %v4677_v5 }
 0x227   : > { %v2263_v57 = vmul.f32 %v4748_v52, %v2224_v10  ;;  %v2222_v16 = vadd.f32 %v2095_v42, %v1661_v49 }
 0x228   : > { %v3282_v6 = vpop.f32.mrf.mxu1 }
 0x229   : > { %v2261_v8 = vmul.f32 %v4748_v52, %v2222_v16  ;;  %v2225_v15 = vadd.f32 %v3282_v6, %v1672_v29  ;;  %v2302_v58 = vadd.f32 %v4756_v46, %v2263_v57 }
 0x22a   : > { %v2098_v32 = vpop.f32.mrf.mxu1 }
 0x22b   : > { %v2264_v59 = vmul.f32 %v4748_v52, %v2225_v15  ;;  %v2223_v27 = vadd.f32 %v2098_v32, %v1664_v33  ;;  %v2300_v49 = vadd.f32 %v4756_v46, %v2261_v8  ;;  %v2334_v18 = vmax.f32 %v2302_v58, 0.0  ;;  %v4774_v8 = vld [vmem:[%s3660_s25] sm:$0xff]  ;;  %v4777_v15 = vld [vmem:[%s3660_s25 + $0x8] sm:$0xff] }
 0x22c   : > { %v3285_v11 = vpop.f32.mrf.mxu1  ;;  %v343_v31 = vpack.c.bf16 %v4777_v15, %v4774_v8 }
 0x22d   : > { %v2303_v56 = vadd.f32 %v4756_v46, %v2264_v59  ;;  %v2262_v17 = vmul.f32 %v4748_v52, %v2223_v27  ;;  %v2228_v10 = vadd.f32 %v3285_v11, %v1685_v22  ;;  %v2332_v32 = vmax.f32 %v2300_v49, 0.0 }
 0x22e   : > { %v2111_v42 = vpop.f32.mrf.mxu1 }
 0x22f   : > { %v2335_v29 = vmax.f32 %v2303_v56, 0.0  ;;  %v2301_v57 = vadd.f32 %v4756_v46, %v2262_v17  ;;  %v2226_v16 = vadd.f32 %v2111_v42, %v1677_v41  ;;  %v2267_v6 = vmul.f32 %v4748_v52, %v2228_v10  ;;  %v4780_v41 = vpop.f32.mrf.mxu0 }
 0x230   : > { %v3286_v33 = vpop.f32.mrf.mxu1  ;;  %v1693_v10 = vadd.f32 %v4701_v51, %v4679_v55  ;;  %v4799_v55 = vld [vmem:[%s3660_s25 + $0x20] sm:$0xff]  ;;  %v4802_v51 = vld [vmem:[%s3660_s25 + $0x28] sm:$0xff] }
 0x231   : > { %v2365_v22 = vpack.c.bf16 %v2335_v29, %v2334_v18  ;;  %v2333_v59 = vmax.f32 %v2301_v57, 0.0  ;;  %v2265_v58 = vmul.f32 %v4748_v52, %v2226_v16  ;;  %v2229_v27 = vadd.f32 %v3286_v33, %v1688_v13  ;;  %v4793_v57 = vpop.f32.mrf.mxu0 }
 0x232   : > { %v2114_v11 = vpop.f32.mrf.mxu1  ;;  %v2306_v56 = vadd.f32 %v4756_v46, %v2267_v6  ;;  %v1704_v16 = vadd.f32 %v4707_v37, %v4681_v28  ;;  %v1696_v6 = vadd.f32 %v4713_v53, %v4683_v9  ;;  %v1717_v9 = vadd.f32 %v4719_v48, %v4687_v25 }
 0x233   : > { %v2227_v43 = vadd.f32 %v2114_v11, %v1680_v3  ;;  %v2364_v62 = vpack.c.bf16 %v2333_v59, %v2332_v32  ;;  %v2268_v49 = vmul.f32 %v4748_v52, %v2229_v27  ;;  %v2304_v5 = vadd.f32 %v4756_v46, %v2265_v58 }
 0x234   : > { %v3289_v17 = vpop.f32.mrf.mxu1  ;;  %v2338_v33 = vmax.f32 %v2306_v56, 0.0 }
 0x235   : > { %v2266_v42 = vmul.f32 %v4748_v52, %v2227_v43  ;;  %v2232_v18 = vadd.f32 %v3289_v17, %v1701_v24  ;;  %3327 = vmatprep.mubr.bf16.mxu0 %v2364_v62  ;;  %v2307_v12 = vadd.f32 %v4756_v46, %v2268_v49  ;;  %v2336_v28 = vmax.f32 %v2304_v5, 0.0  ;;  %v4810_v62 = vpop.f32.mrf.mxu0 }
 0x236   : > { %v2127_v29 = vpop.f32.mrf.mxu1  ;;  %3328 = vmatmul.mubr.bf16.vlgmr.msra.gmra.mxu0 %v2365_v22  ;;  %v345_v43 = vpack.c.bf16 %v4802_v51, %v4799_v55  ;;  %v1709_v49 = vadd.f32 %v4725_v23, %v4689_v7  ;;  %v1720_v7 = vadd.f32 %v4731_v60, %v4691_v19 }
 0x237   : > { %v2230_v13 = vadd.f32 %v2127_v29, %v1693_v10  ;;  %3135 = vmatprep.mubr.bf16.mxu0 %v343_v31  ;;  %v2305_v3 = vadd.f32 %v4756_v46, %v2266_v42  ;;  %v2339_v32 = vmax.f32 %v2307_v12, 0.0  ;;  %v2271_v22 = vmul.f32 %v4748_v52, %v2232_v18  ;;  %v4821_v12 = vpop.f32.mrf.mxu0 }
 0x238   : > { %v3290_v59 = vpop.f32.mrf.mxu1 }
 0x239   : > { %v2269_v58 = vmul.f32 %v4748_v52, %v2230_v13  ;;  %v2233_v27 = vadd.f32 %v3290_v59, %v1704_v16  ;;  %v2337_v37 = vmax.f32 %v2305_v3, 0.0  ;;  %v2367_v24 = vpack.c.bf16 %v2339_v32, %v2338_v33  ;;  %v4827_v13 = vld [vmem:[%s3660_s25 + $0x40] sm:$0xff]  ;;  %v4830_v3 = vld [vmem:[%s3660_s25 + $0x48] sm:$0xff] }
 0x23a   : > { %v2130_v11 = vpop.f32.mrf.mxu1  ;;  %v2310_v17 = vadd.f32 %v4756_v46, %v2271_v22 }
 0x23b   : > { %v2272_v53 = vmul.f32 %v4748_v52, %v2233_v27  ;;  %v2231_v31 = vadd.f32 %v2130_v11, %v1696_v6  ;;  %v2366_v56 = vpack.c.bf16 %v2337_v37, %v2336_v28  ;;  %v2308_v25 = vadd.f32 %v4756_v46, %v2269_v58  ;;  %v4838_v11 = vpop.f32.mrf.mxu0 }
 0x23c   : > { %v3293_v10 = vpop.f32.mrf.mxu1  ;;  %v1712_v6 = vadd.f32 %v4737_v2, %v4693_v45  ;;  %v2342_v33 = vmax.f32 %v2310_v17, 0.0  ;;  %v347_v37 = vpack.c.bf16 %v4830_v3, %v4827_v13 }
 0x23d   : > { %v2311_v42 = vadd.f32 %v4756_v46, %v2272_v53  ;;  %v2270_v18 = vmul.f32 %v4748_v52, %v2231_v31  ;;  %v2236_v5 = vadd.f32 %v3293_v10, %v1717_v9  ;;  %3331 = vmatprep.mubr.bf16.mxu0 %v2366_v56  ;;  %v2340_v19 = vmax.f32 %v2308_v25, 0.0  ;;  %v1756_v10 = vpop.f32.mrf.mxu0  ;;  %v4856_v25 = vld [vmem:[%s3660_s25 + $0x68] sm:$0xff] }
 0x23e   : > { %v2143_v48 = vpop.f32.mrf.mxu1  ;;  %3332 = vmatmul.mubr.bf16.gmra.mxu0 %v2367_v24  ;;  %v1733_v24 = vadd.f32 %v4743_v26, %v4697_v14  ;;  %v1725_v9 = vadd.f32 %v4750_v4, %v4699_v21 }
 0x23f   : > { %v2343_v23 = vmax.f32 %v2311_v42, 0.0  ;;  %v2234_v29 = vadd.f32 %v2143_v48, %v1709_v49  ;;  %3139 = vmatprep.mubr.bf16.mxu0 %v345_v43  ;;  %v2309_v16 = vadd.f32 %v4756_v46, %v2270_v18  ;;  %v2275_v32 = vmul.f32 %v4748_v52, %v2236_v5  ;;  %v4853_v5 = vld [vmem:[%s3660_s25 + $0x60] sm:$0xff] }
 0x240   : > { %v3294_v22 = vpop.f32.mrf.mxu1  ;;  %v1736_v42 = vadd.f32 %v4759_v36, %v4703_v38  ;;  %v1728_v48 = vadd.f32 %v4766_v35, %v4705_v47 }
 0x241   : > { %v2273_v59 = vmul.f32 %v4748_v52, %v2234_v29  ;;  %v2237_v58 = vadd.f32 %v3294_v22, %v1720_v7  ;;  %v2341_v60 = vmax.f32 %v2309_v16, 0.0  ;;  %v2369_v28 = vpack.c.bf16 %v2343_v23, %v2342_v33 }
 0x242   : > { %v2146_v27 = vpop.f32.mrf.mxu1  ;;  %v2314_v53 = vadd.f32 %v4756_v46, %v2275_v32  ;;  %v349_v22 = vpack.c.bf16 %v4856_v25, %v4853_v5 }
 0x243   : > { %v2276_v45 = vmul.f32 %v4748_v52, %v2237_v58  ;;  %v2235_v2 = vadd.f32 %v2146_v27, %v1712_v6  ;;  %v2368_v43 = vpack.c.bf16 %v2341_v60, %v2340_v19  ;;  %v2312_v14 = vadd.f32 %v4756_v46, %v2273_v59  ;;  %v3258_v59 = vpop.f32.mrf.mxu0 }
 0x244   : > { %v3297_v31 = vpop.f32.mrf.mxu1  ;;  %v2346_v7 = vmax.f32 %v2314_v53, 0.0  ;;  %v1749_v58 = vadd.f32 %v4780_v41, %v4709_v63  ;;  %v1741_v60 = vadd.f32 %v4793_v57, %v4711_v30  ;;  %v4877_v53 = vld [vmem:[%s3660_s25 + $0x80] sm:$0xff] }
 0x245   : > { %v2315_v56 = vadd.f32 %v4756_v46, %v2276_v45  ;;  %v2274_v49 = vmul.f32 %v4748_v52, %v2235_v2  ;;  %v2240_v17 = vadd.f32 %v3297_v31, %v1733_v24  ;;  %3335 = vmatprep.mubr.bf16.mxu0 %v2368_v43  ;;  %v2344_v38 = vmax.f32 %v2312_v14, 0.0  ;;  %v1759_v2 = vpop.f32.mrf.mxu0  ;;  %v4880_v31 = vld [vmem:[%s3660_s25 + $0x88] sm:$0xff] }
 0x246   : > { %v2159_v26 = vpop.f32.mrf.mxu1  ;;  %3336 = vmatmul.mubr.bf16.gmra.mxu0 %v2369_v28  ;;  %v1752_v43 = vadd.f32 %v4810_v62, %v4715_v0 }
 0x247   : > { %v2347_v21 = vmax.f32 %v2315_v56, 0.0  ;;  %v2238_v4 = vadd.f32 %v2159_v26, %v1725_v9  ;;  %3143 = vmatprep.mubr.bf16.mxu0 %v347_v37  ;;  %v2313_v18 = vadd.f32 %v4756_v46, %v2274_v49  ;;  %v2279_v23 = vmul.f32 %v4748_v52, %v2240_v17 }
 0x248   : > { %v3298_v29 = vpop.f32.mrf.mxu1  ;;  %v1744_v56 = vadd.f32 %v4821_v12, %v4717_v54 }
 0x249   : > { %v2277_v16 = vmul.f32 %v4748_v52, %v2238_v4  ;;  %v2241_v6 = vadd.f32 %v3298_v29, %v1736_v42  ;;  %v2345_v36 = vmax.f32 %v2313_v18, 0.0  ;;  %v2371_v32 = vpack.c.bf16 %v2347_v21, %v2346_v7 }
 0x24a   : > { %v2162_v33 = vpop.f32.mrf.mxu1  ;;  %v2318_v27 = vadd.f32 %v4756_v46, %v2279_v23  ;;  %v351_v18 = vpack.c.bf16 %v4880_v31, %v4877_v53  ;;  %v1765_v7 = vadd.f32 %v4838_v11, %v4721_v50  ;;  %v1757_v29 = vadd.f32 %v1756_v10, %v4723_v20 }
 0x24b   : > { %v2280_v47 = vmul.f32 %v4748_v52, %v2241_v6  ;;  %v2239_v35 = vadd.f32 %v2162_v33, %v1728_v48  ;;  %v2370_v19 = vpack.c.bf16 %v2345_v36, %v2344_v38  ;;  %v2316_v63 = vadd.f32 %v4756_v46, %v2277_v16  ;;  %v3261_v48 = vpop.f32.mrf.mxu0 }
 0x24c   : > { %v3301_v28 = vpop.f32.mrf.mxu1  ;;  %v2350_v49 = vmax.f32 %v2318_v27, 0.0 }
 0x24d   : > { %v2319_v37 = vadd.f32 %v4756_v46, %v2280_v47  ;;  %v2278_v24 = vmul.f32 %v4748_v52, %v2239_v35  ;;  %v2244_v45 = vadd.f32 %v3301_v28, %v1749_v58  ;;  %3339 = vmatprep.mubr.bf16.mxu0 %v2370_v19  ;;  %v2348_v0 = vmax.f32 %v2316_v63, 0.0  ;;  %v1772_v11 = vpop.f32.mrf.mxu0  ;;  %v4899_v47 = vld [vmem:[%s3660_s25 + $0xa0] sm:$0xff]  ;;  %v4902_v35 = vld [vmem:[%s3660_s25 + $0xa8] sm:$0xff] }
 0x24e   : > { %v2175_v41 = vpop.f32.mrf.mxu1  ;;  %3340 = vmatmul.mubr.bf16.gmra.mxu0 %v2371_v32  ;;  %v1760_v19 = vadd.f32 %v1759_v2, %v4729_v34 }
 0x24f   : > { %v2351_v30 = vmax.f32 %v2319_v37, 0.0  ;;  %v2242_v57 = vadd.f32 %v2175_v41, %v1741_v60  ;;  %3147 = vmatprep.mubr.bf16.mxu0 %v349_v22  ;;  %v2317_v9 = vadd.f32 %v4756_v46, %v2278_v24  ;;  %v2283_v17 = vmul.f32 %v4748_v52, %v2244_v45 }
 0x250   : > { %v3302_v14 = vpop.f32.mrf.mxu1  ;;  %v1768_v22 = vadd.f32 %v3258_v59, %v4727_v39  ;;  %v353_v41 = vpack.c.bf16 %v4902_v35, %v4899_v47 }
 0x251   : > { %v2281_v26 = vmul.f32 %v4748_v52, %v2242_v57  ;;  %v2245_v42 = vadd.f32 %v3302_v14, %v1752_v43  ;;  %v2349_v62 = vmax.f32 %v2317_v9, 0.0  ;;  %v2373_v4 = vpack.c.bf16 %v2351_v30, %v2350_v49  ;;  %v3262_v43 = vpop.f32.mrf.mxu0 }
 0x252   : > { %v2178_v21 = vpop.f32.mrf.mxu1  ;;  %v2322_v16 = vadd.f32 %v4756_v46, %v2283_v17  ;;  %v1781_v30 = vadd.f32 %v3261_v48, %v4733_v40  ;;  %v1773_v9 = vadd.f32 %v1772_v11, %v4735_v1  ;;  %v1784_v40 = vadd.f32 %v3262_v43, %v4739_v61  ;;  %v4920_v48 = vld [vmem:[%s3660_s25 + $0xc0] sm:$0xff] }
 0x253   : > { %v2284_v54 = vmul.f32 %v4748_v52, %v2245_v42  ;;  %v2243_v12 = vadd.f32 %v2178_v21, %v1744_v56  ;;  %v2372_v23 = vpack.c.bf16 %v2349_v62, %v2348_v0  ;;  %v2320_v32 = vadd.f32 %v4756_v46, %v2281_v26  ;;  %v1775_v62 = vpop.f32.mrf.mxu0 }
 0x254   : > { %v3305_v6 = vpop.f32.mrf.mxu1  ;;  %v2354_v60 = vmax.f32 %v2322_v16, 0.0 }
 0x255   : > { %v2323_v38 = vadd.f32 %v4756_v46, %v2284_v54  ;;  %v2282_v36 = vmul.f32 %v4748_v52, %v2243_v12  ;;  %v2248_v33 = vadd.f32 %v3305_v6, %v1765_v7  ;;  %3343 = vmatprep.mubr.bf16.mxu0 %v2372_v23  ;;  %v2352_v45 = vmax.f32 %v2320_v32, 0.0  ;;  %v4923_v7 = vld [vmem:[%s3660_s25 + $0xc8] sm:$0xff] }
 0x256   : > { %v2191_v50 = vpop.f32.mrf.mxu1  ;;  %3344 = vmatmul.mubr.bf16.gmra.mxu0 %v2373_v4  ;;  %v1776_v54 = vadd.f32 %v1775_v62, %v4741_v44 }
 0x257   : > { %v2355_v58 = vmax.f32 %v2323_v38, 0.0  ;;  %v2246_v20 = vadd.f32 %v2191_v50, %v1757_v29  ;;  %3151 = vmatprep.mubr.bf16.mxu0 %v351_v18  ;;  %v2321_v10 = vadd.f32 %v4756_v46, %v2282_v36  ;;  %v2287_v27 = vmul.f32 %v4748_v52, %v2248_v33 }
 0x258   : > { %v3306_v28 = vpop.f32.mrf.mxu1  ;;  %v355_v33 = vpack.c.bf16 %v4923_v7, %v4920_v48 }
 0x259   : > { %v2285_v37 = vmul.f32 %v4748_v52, %v2246_v20  ;;  %v2249_v24 = vadd.f32 %v3306_v28, %v1768_v22  ;;  %v2353_v39 = vmax.f32 %v2321_v10, 0.0  ;;  %v2375_v63 = vpack.c.bf16 %v2355_v58, %v2354_v60 }
 0x25a   : > { %v2194_v59 = vpop.f32.mrf.mxu1  ;;  %v2326_v56 = vadd.f32 %v4756_v46, %v2287_v27 }
 0x25b   : > { %v2288_v57 = vmul.f32 %v4748_v52, %v2249_v24  ;;  %v2247_v34 = vadd.f32 %v2194_v59, %v1760_v19  ;;  %v2374_v2 = vpack.c.bf16 %v2353_v39, %v2352_v45  ;;  %v2324_v42 = vadd.f32 %v4756_v46, %v2285_v37  ;;  %v4936_v45 = vld [vmem:[%s3660_s25 + $0xe0] sm:$0xff] }
 0x25c   : > { %v3309_v49 = vpop.f32.mrf.mxu1  ;;  %v2358_v12 = vmax.f32 %v2326_v56, 0.0 }
 0x25d   : > { %v2327_v17 = vadd.f32 %v4756_v46, %v2288_v57  ;;  %v2286_v14 = vmul.f32 %v4748_v52, %v2247_v34  ;;  %v2252_v26 = vadd.f32 %v3309_v49, %v1781_v30  ;;  %3347 = vmatprep.mubr.bf16.mxu0 %v2374_v2  ;;  %v2356_v16 = vmax.f32 %v2324_v42, 0.0  ;;  %v3458_v2 = vld [vmem:[%s3660_s25 + $0x18] sm:$0xff] }
 0x25e   : > { %v2207_v0 = vpop.f32.mrf.mxu1  ;;  %3348 = vmatmul.mubr.bf16.gmra.mxu0 %v2375_v63 }
 0x25f   : > { %v2359_v21 = vmax.f32 %v2327_v17, 0.0  ;;  %v2291_v1 = vmul.f32 %v4748_v52, %v2252_v26  ;;  %v2250_v4 = vadd.f32 %v2207_v0, %v1773_v9  ;;  %3155 = vmatprep.mubr.bf16.mxu0 %v353_v41  ;;  %v2325_v18 = vadd.f32 %v4756_v46, %v2286_v14  ;;  %v3459_v26 = vld [vmem:[%s3660_s25 + $0x30] sm:$0xff] }
 0x260   : > { %v3310_v23 = vpop.f32.mrf.mxu1 }
 0x261   : > { %v2289_v61 = vmul.f32 %v4748_v52, %v2250_v4  ;;  %v2253_v29 = vadd.f32 %v3310_v23, %v1784_v40  ;;  %v2357_v6 = vmax.f32 %v2325_v18, 0.0  ;;  %v2377_v36 = vpack.c.bf16 %v2359_v21, %v2358_v12  ;;  %v3460_v4 = vld [vmem:[%s3660_s25 + $0x38] sm:$0xff] }
 0x262   : > { %v2210_v38 = vpop.f32.mrf.mxu1  ;;  %v2330_v32 = vadd.f32 %v4756_v46, %v2291_v1 }
 0x263   : > { %v2292_v50 = vmul.f32 %v4748_v52, %v2253_v29  ;;  %v2251_v11 = vadd.f32 %v2210_v38, %v1776_v54  ;;  %v2376_v22 = vpack.c.bf16 %v2357_v6, %v2356_v16  ;;  %v2328_v20 = vadd.f32 %v4756_v46, %v2289_v61  ;;  %v3461_v29 = vld [vmem:[%s3660_s25 + $0x50] sm:$0xff] }
 0x264   : > { %v2362_v10 = vmax.f32 %v2330_v32, 0.0  ;;  %v3462_v32 = vld [vmem:[%s3660_s25 + $0x58] sm:$0xff] }
 0x265   : > { %v2331_v44 = vadd.f32 %v4756_v46, %v2292_v50  ;;  %v2290_v58 = vmul.f32 %v4748_v52, %v2251_v11  ;;  %3351 = vmatprep.mubr.bf16.mxu0 %v2376_v22  ;;  %v2360_v27 = vmax.f32 %v2328_v20, 0.0  ;;  %v4939_v52 = vld [vmem:[%s3660_s25 + $0xe8] sm:$0xff]  ;;  %v3463_v20 = vld [vmem:[%s3660_s25 + $0x70] sm:$0xff] }
 0x266   : > { %3352 = vmatmul.mubr.bf16.gmra.mxu0 %v2377_v36  ;;  %v357_v39 = vpack.c.bf16 %v4939_v52, %v4936_v45 }
 0x267   : > { %v2363_v19 = vmax.f32 %v2331_v44, 0.0  ;;  %3159 = vmatprep.mubr.bf16.mxu0 %v355_v33  ;;  %v2329_v60 = vadd.f32 %v4756_v46, %v2290_v58  ;;  %v3457_v46 = vld [vmem:[%s3660_s25 + $0x10] sm:$0xff] }
 0x269   : > { %v2361_v28 = vmax.f32 %v2329_v60, 0.0  ;;  %v2379_v37 = vpack.c.bf16 %v2363_v19, %v2362_v10 }
 0x26b   : > { %v2378_v24 = vpack.c.bf16 %v2361_v28, %v2360_v27 }
 0x26d   : > { %3355 = vmatprep.mubr.bf16.mxu0 %v2378_v24 }
 0x26e   : > { %3356 = vmatmul.mubr.bf16.gmra.mxu0 %v2379_v37  ;;  %v3464_v37 = vld [vmem:[%s3660_s25 + $0x78] sm:$0xff] }
 0x26f   : > { %3163 = vmatprep.mubr.bf16.mxu0 %v357_v39 }
 0x2f6   : > { %v3329_v59 = vpop.f32.mrf.mxu0 }
 0x2f7   : > { %v2487_v63 = vadd.f32 %v3457_v46, %v3329_v59 }
 0x2f8   : > { %v2478_v41 = vpop.f32.mrf.mxu0 }
 0x2f9   : > { %v2607_v43 = vmax.f32 %v2487_v63, 0.0  ;;  %v2479_v30 = vadd.f32 %v2478_v41, %v4774_v8  ;;  %v3465_v41 = vld [vmem:[%s3660_s25 + $0x90] sm:$0xff] }
 0x2fa   : > { %v3330_v57 = vpop.f32.mrf.mxu0 }
 0x2fb   : > { %2639 = vst [vmem:[%s4948_s10 + $0x10] sm:$0xff] %v2607_v43  ;;  %v2605_v34 = vmax.f32 %v2479_v30, 0.0  ;;  %v2490_v9 = vadd.f32 %v3458_v2, %v3330_v57 }
 0x2fc   : > { %v2481_v56 = vpop.f32.mrf.mxu0 }
 0x2fd   : > { %2637 = vst [vmem:[%s4948_s10] sm:$0xff] %v2605_v34  ;;  %v2608_v49 = vmax.f32 %v2490_v9, 0.0  ;;  %v2482_v17 = vadd.f32 %v2481_v56, %v4777_v15  ;;  %v3466_v9 = vld [vmem:[%s3660_s25 + $0x98] sm:$0xff] }
 0x2fe   : > { %v3333_v8 = vpop.f32.mrf.mxu0 }
 0x2ff   : > { %2640 = vst [vmem:[%s4948_s10 + $0x18] sm:$0xff] %v2608_v49  ;;  %v2606_v14 = vmax.f32 %v2482_v17, 0.0  ;;  %v2503_v42 = vadd.f32 %v3459_v26, %v3333_v8  ;;  %v3467_v26 = vld [vmem:[%s3660_s25 + $0xb0] sm:$0xff] }
 0x300   : > { %v2494_v40 = vpop.f32.mrf.mxu0 }
 0x301   : > { %2638 = vst [vmem:[%s4948_s10 + $0x8] sm:$0xff] %v2606_v14  ;;  %v2611_v0 = vmax.f32 %v2503_v42, 0.0  ;;  %v2495_v62 = vadd.f32 %v2494_v40, %v4799_v55 }
 0x302   : > { %v3334_v21 = vpop.f32.mrf.mxu0 }
 0x303   : > { %2643 = vst [vmem:[%s4948_s10 + $0x30] sm:$0xff] %v2611_v0  ;;  %v2609_v1 = vmax.f32 %v2495_v62, 0.0  ;;  %v2506_v15 = vadd.f32 %v3460_v4, %v3334_v21 }
 0x304   : > { %v2497_v18 = vpop.f32.mrf.mxu0 }
 0x305   : > { %2641 = vst [vmem:[%s4948_s10 + $0x20] sm:$0xff] %v2609_v1  ;;  %v2612_v54 = vmax.f32 %v2506_v15, 0.0  ;;  %v2498_v12 = vadd.f32 %v2497_v18, %v4802_v51  ;;  %v3468_v1 = vld [vmem:[%s3660_s25 + $0xb8] sm:$0xff] }
 0x306   : > { %v3337_v23 = vpop.f32.mrf.mxu0 }
 0x307   : > { %2644 = vst [vmem:[%s4948_s10 + $0x38] sm:$0xff] %v2612_v54  ;;  %v2610_v61 = vmax.f32 %v2498_v12, 0.0  ;;  %v2519_v55 = vadd.f32 %v3461_v29, %v3337_v23  ;;  %v3469_v23 = vld [vmem:[%s3660_s25 + $0xd0] sm:$0xff] }
 0x308   : > { %v2510_v16 = vpop.f32.mrf.mxu0 }
 0x309   : > { %2642 = vst [vmem:[%s4948_s10 + $0x28] sm:$0xff] %v2610_v61  ;;  %v2615_v6 = vmax.f32 %v2519_v55, 0.0  ;;  %v2511_v38 = vadd.f32 %v2510_v16, %v4827_v13 }
 0x30a   : > { %v3338_v36 = vpop.f32.mrf.mxu0 }
 0x30b   : > { %2647 = vst [vmem:[%s4948_s10 + $0x50] sm:$0xff] %v2615_v6  ;;  %v2613_v33 = vmax.f32 %v2511_v38, 0.0  ;;  %v2522_v51 = vadd.f32 %v3462_v32, %v3338_v36  ;;  %v3470_v38 = vld [vmem:[%s3660_s25 + $0xd8] sm:$0xff] }
 0x30c   : > { %v2513_v50 = vpop.f32.mrf.mxu0 }
 0x30d   : > { %2645 = vst [vmem:[%s4948_s10 + $0x40] sm:$0xff] %v2613_v33  ;;  %v2616_v11 = vmax.f32 %v2522_v51, 0.0  ;;  %v2514_v22 = vadd.f32 %v2513_v50, %v4830_v3 }
 0x30e   : > { %v3341_v44 = vpop.f32.mrf.mxu0 }
 0x30f   : > { %2648 = vst [vmem:[%s4948_s10 + $0x58] sm:$0xff] %v2616_v11  ;;  %v2614_v58 = vmax.f32 %v2514_v22, 0.0  ;;  %v2535_v13 = vadd.f32 %v3463_v20, %v3341_v44 }
 0x310   : > { %v2526_v10 = vpop.f32.mrf.mxu0 }
 0x311   : > { %2646 = vst [vmem:[%s4948_s10 + $0x48] sm:$0xff] %v2614_v58  ;;  %v2619_v19 = vmax.f32 %v2535_v13, 0.0  ;;  %v2527_v60 = vadd.f32 %v2526_v10, %v4853_v5  ;;  %v3472_v10 = vld [vmem:[%s3660_s25 + $0xf8] sm:$0xff] }
 0x312   : > { %v3342_v27 = vpop.f32.mrf.mxu0 }
 0x313   : > { %2651 = vst [vmem:[%s4948_s10 + $0x70] sm:$0xff] %v2619_v19  ;;  %v2617_v28 = vmax.f32 %v2527_v60, 0.0  ;;  %v2538_v3 = vadd.f32 %v3464_v37, %v3342_v27 }
 0x314   : > { %v2529_v24 = vpop.f32.mrf.mxu0 }
 0x315   : > { %2649 = vst [vmem:[%s4948_s10 + $0x60] sm:$0xff] %v2617_v28  ;;  %v2620_v39 = vmax.f32 %v2538_v3, 0.0  ;;  %v2530_v59 = vadd.f32 %v2529_v24, %v4856_v25 }
 0x316   : > { %v3345_v46 = vpop.f32.mrf.mxu0 }
 0x317   : > { %2652 = vst [vmem:[%s4948_s10 + $0x78] sm:$0xff] %v2620_v39  ;;  %v2618_v63 = vmax.f32 %v2530_v59, 0.0  ;;  %v2551_v5 = vadd.f32 %v3465_v41, %v3345_v46 }
 0x318   : > { %v2542_v43 = vpop.f32.mrf.mxu0 }
 0x319   : > { %2650 = vst [vmem:[%s4948_s10 + $0x68] sm:$0xff] %v2618_v63  ;;  %v2623_v30 = vmax.f32 %v2551_v5, 0.0  ;;  %v2543_v57 = vadd.f32 %v2542_v43, %v4877_v53 }
 0x31a   : > { %v3346_v34 = vpop.f32.mrf.mxu0 }
 0x31b   : > { %2655 = vst [vmem:[%s4948_s10 + $0x90] sm:$0xff] %v2623_v30  ;;  %v2621_v2 = vmax.f32 %v2543_v57, 0.0  ;;  %v2554_v25 = vadd.f32 %v3466_v9, %v3346_v34 }
 0x31c   : > { %v2545_v56 = vpop.f32.mrf.mxu0 }
 0x31d   : > { %2653 = vst [vmem:[%s4948_s10 + $0x80] sm:$0xff] %v2621_v2  ;;  %v2624_v49 = vmax.f32 %v2554_v25, 0.0  ;;  %v2546_v17 = vadd.f32 %v2545_v56, %v4880_v31 }
 0x31e   : > { %v3349_v8 = vpop.f32.mrf.mxu0 }
 0x31f   : > { %2656 = vst [vmem:[%s4948_s10 + $0x98] sm:$0xff] %v2624_v49  ;;  %v2622_v14 = vmax.f32 %v2546_v17, 0.0  ;;  %v2567_v53 = vadd.f32 %v3467_v26, %v3349_v8 }
 0x320   : > { %v2558_v42 = vpop.f32.mrf.mxu0 }
 0x321   : > { %2654 = vst [vmem:[%s4948_s10 + $0x88] sm:$0xff] %v2622_v14  ;;  %v2627_v40 = vmax.f32 %v2567_v53, 0.0  ;;  %v2559_v0 = vadd.f32 %v2558_v42, %v4899_v47 }
 0x322   : > { %v3350_v62 = vpop.f32.mrf.mxu0 }
 0x323   : > { %2659 = vst [vmem:[%s4948_s10 + $0xb0] sm:$0xff] %v2627_v40  ;;  %v2625_v21 = vmax.f32 %v2559_v0, 0.0  ;;  %v2570_v31 = vadd.f32 %v3468_v1, %v3350_v62 }
 0x324   : > { %v2561_v4 = vpop.f32.mrf.mxu0 }
 0x325   : > { %2657 = vst [vmem:[%s4948_s10 + $0xa0] sm:$0xff] %v2625_v21  ;;  %v2628_v15 = vmax.f32 %v2570_v31, 0.0  ;;  %v2562_v18 = vadd.f32 %v2561_v4, %v4902_v35 }
 0x326   : > { %v3353_v54 = vpop.f32.mrf.mxu0 }
 0x327   : > { %2660 = vst [vmem:[%s4948_s10 + $0xb8] sm:$0xff] %v2628_v15  ;;  %v2626_v12 = vmax.f32 %v2562_v18, 0.0  ;;  %v2583_v47 = vadd.f32 %v3469_v23, %v3353_v54 }
 0x328   : > { %v2574_v61 = vpop.f32.mrf.mxu0 }
 0x329   : > { %2658 = vst [vmem:[%s4948_s10 + $0xa8] sm:$0xff] %v2626_v12  ;;  %v2631_v29 = vmax.f32 %v2583_v47, 0.0  ;;  %v2575_v55 = vadd.f32 %v2574_v61, %v4920_v48  ;;  %v3471_v48 = vld [vmem:[%s3660_s25 + $0xf0] sm:$0xff]  ;;  %s3473_s25 = scalar_lea.vmem %s5017_s13, 4096 }
 0x32a   : > { %v3354_v16 = vpop.f32.mrf.mxu0  ;;  %p3474_p11 = scmp.ne.s32.totalorder %s5017_s13, %s3473_s25  ;;  %p3481_p1 = scmp.lt.s32.totalorder %s3479_s22, %s3473_s25 }
 0x32b   : > { %2663 = vst [vmem:[%s4948_s10 + $0xd0] sm:$0xff] %v2631_v29  ;;  %v2629_v6 = vmax.f32 %v2575_v55, 0.0  ;;  %v2586_v35 = vadd.f32 %v3470_v38, %v3354_v16 }
 0x32c   : > { %v2577_v36 = vpop.f32.mrf.mxu0  ;;  %p3475_p12 = pnand %p3474_p11, %p3622_p5  ;;  %p3482_p2 = por %p3481_p1, %p3480_p0 }
 0x32d   : > { %2661 = vst [vmem:[%s4948_s10 + $0xc0] sm:$0xff] %v2629_v6  ;;  %v2632_v33 = vmax.f32 %v2586_v35, 0.0  ;;  %v2578_v32 = vadd.f32 %v2577_v36, %v4923_v7 }
 0x32e   : > { %v3357_v51 = vpop.f32.mrf.mxu0  ;;  %p3476_p13 = pneg %p3475_p12 }
 0x32f   : > { %2664 = vst [vmem:[%s4948_s10 + $0xd8] sm:$0xff] %v2632_v33  ;;  %v2630_v50 = vmax.f32 %v2578_v32, 0.0  ;;  %v2599_v11 = vadd.f32 %v3471_v48, %v3357_v51 }
 0x330   : > { %v2590_v22 = vpop.f32.mrf.mxu0  ;;  %p3483_p3 = pnand %p3482_p2, %p3476_p13 }
 0x331   : > { %2662 = vst [vmem:[%s4948_s10 + $0xc8] sm:$0xff] %v2630_v50  ;;  %v2635_v44 = vmax.f32 %v2599_v11, 0.0  ;;  %v2591_v58 = vadd.f32 %v2590_v22, %v4936_v45 }
 0x332   : > { %v3358_v20 = vpop.f32.mrf.mxu0 }
 0x333   : > { %2667 = vst [vmem:[%s4948_s10 + $0xf0] sm:$0xff] %v2635_v44  ;;  %v2633_v13 = vmax.f32 %v2591_v58, 0.0  ;;  %v2602_v7 = vadd.f32 %v3472_v10, %v3358_v20 }
 0x334   : > { %v2593_v19 = vpop.f32.mrf.mxu0 }
 0x335   : > { %2665 = vst [vmem:[%s4948_s10 + $0xe0] sm:$0xff] %v2633_v13  ;;  %v2636_v60 = vmax.f32 %v2602_v7, 0.0  ;;  %v2594_v27 = vadd.f32 %v2593_v19, %v4939_v52 }
 0x337   : > { %2668 = vst [vmem:[%s4948_s10 + $0xf8] sm:$0xff] %v2636_v60  ;;  %v2634_v45 = vmax.f32 %v2594_v27, 0.0 }
 0x339   : > { %2666 = vst [vmem:[%s4948_s10 + $0xe8] sm:$0xff] %v2634_v45 }
 0x33a   : > { %3486 = shalt.err (!%p3483_p3)
}
 0x33b   : > { %s3487_s24 = scalar_lea.hbm %s5015_s19, 4096  ;;  %s3491_s10 = scalar_lea.hbm %s5071_s8, 8192 }
 0x33c   : > { %p3488_p4 = scmp.ne.s32.totalorder %s5015_s19, %s3487_s24  ;;  %p3492_p9 = scmp.lt.s32.totalorder %s5015_s19, %s5071_s8 }
 0x33d   : > { %p3493_p10 = scmp.lt.s32.totalorder %s3491_s10, %s3487_s24 }
 0x33e   : > { %p3489_p7 = pnand %p3488_p4, %p3622_p5 }
 0x33f   : > { %p3494_p11 = por %p3493_p10, %p3492_p9 }
 0x340   : > { %p3490_p8 = pneg %p3489_p7 }
 0x342   : > { %p3495_p12 = pnand %p3494_p11, %p3490_p8 }
 0x344   : > { %3498 = shalt.err (!%p3495_p12)
}
 0x345   : > { %s3537_s18 = smov 128   ;;  %s3538_s25 = smov 8  }
 0x346   : > { %3375 = dma.vmem_to_hbm [thread:$0]  (%p3622_p5), %s5017_s13, 4096, %s5015_s19, %s5023_s9, %s3537_s18, %s3537_s18, %s3538_s25  }
 0x347 PF: > { %p3381_p13 = scmp.ge.s32.totalorder %s3533_s30, 2  ;;  %s2699_s20 = sand.u32 1, %s3521_s27  }
 0x348   : > { %s2700_s21 = scalar_lea.sflag [#allocation3], %s2699_s20 }
 0x349   : > { %p3378_p0 = pnand %p3381_p13, %p3626_p6 }
 0x34b   : > { %p3379_p1 = pneg %p3378_p0 }
 0x34d   : > { %3516 = dma.done.wait (%p3379_p1), %s2700_s21, 4096  }
 0x34e   : > { %3518 = vsyncadd (%p3379_p1), %s2700_s21, 4294963200  ;;  %p18_p2 = scmp.ge.s32.totalorder %s3609_s11, 4   ;;  %s5183_s27 = smov %s3525_s28 }
 0x34f   : > { %s5184_s28 = smov %s3529_s29  ;;  %s5185_s29 = smov %s3620_s14 }
 0x350   : > { %s5186_s30 = smov %s3609_s11  ;;  %20 = sbr.rel (!%p18_p2) target bundleno = 3 (0x3), region = 89 }
 0x355   :  { %2705 = vsyncpa [#allocation3], 1 }
 0x356   :  { %2707 = vsyncpa [#allocation3 + $0x1], 1 }

</bundles_post_ra>
